<compile_context>
chip_gen: v6e
topology: v6e:2x2x1
jax: 0.10.0
libtpu: 0.0.40
codegen_flags: <defaults>
</compile_context>

<pallas_src>
import functools

import jax
import jax.numpy as jnp
from jax.experimental import pallas as pl
from jax.experimental.pallas import tpu as pltpu

EPS = 1e-5  # matches torch GroupNorm default


def _gn1(x, w, b):
    """GroupNorm(num_groups=1) over the last dim, one-pass variance (E[x^2]-E[x]^2)."""
    mu = jnp.mean(x, axis=-1, keepdims=True)
    ex2 = jnp.mean(x * x, axis=-1, keepdims=True)
    var = jnp.maximum(ex2 - mu * mu, 0.0)
    return (x - mu) * jax.lax.rsqrt(var + EPS) * w + b


def _gn1_ref(x, w, b):
    """Literal two-pass GroupNorm(1) used only by the pure-JAX reference."""
    mu = jnp.mean(x, axis=-1, keepdims=True)
    var = jnp.mean((x - mu) ** 2, axis=-1, keepdims=True)
    return (x - mu) * jax.lax.rsqrt(var + EPS) * w + b


# ------------------------------------------------------------------------------- kernel
def _m2a_kernel(dist_th2, n_blocks,
                actors_ref, actr_ref, nodes_ref, nctr_ref,
                wd1_ref, wsq_ref, wqa_ref, wdq_ref, wcc_ref, vec_ref,
                out_ref):
    bt, NA, A = actors_ref.shape
    _, NC, C = nodes_ref.shape
    MA = bt * NA
    MC = bt * NC
    MP = bt * NA * NC

    agts = actors_ref[...].reshape(MA, A)       # (MA, A)
    nodes = nodes_ref[...].reshape(MC, C)       # (MC, C)
    a_ctr = actr_ref[...]                       # (bt, NA, 2)
    c_ctr = nctr_ref[...]                       # (bt, NC, 2)

    # ---- pairwise geometry: computed ONCE, reused by both Att blocks -----------------
    diff = a_ctr[:, :, None, :] - c_ctr[:, None, :, :]                   # (bt, NA, NC, 2)
    # squared-distance threshold (no sqrt) -> same mask as sqrt(d2) <= dist_th
    mask = (jnp.sum(diff * diff, axis=-1, keepdims=True)
            <= dist_th2).astype(jnp.float32)                             # (bt, NA, NC, 1)
    # hoisted loop-invariant broadcasts (JAX does not CSE broadcast_in_dim)
    mask_b = jnp.broadcast_to(mask, (bt, NA, NC, A))                     # (bt, NA, NC, A)
    dflat = diff.reshape(MP, 2)
    dx0 = jnp.broadcast_to(dflat[:, 0:1], (MP, C))
    dx1 = jnp.broadcast_to(dflat[:, 1:2], (MP, C))

    # ---- ctx-node projection for ALL blocks in one 256-wide matmul -------------------
    # nodes (map features) never change across the stacked Att blocks, so
    # nodes @ [wc1c_0 | wc1c_1 | ...] is exact and replaces L narrow matmuls.
    nq_all = jnp.dot(nodes, wcc_ref[...], preferred_element_type=jnp.float32)  # (MC, L*A)

    # ---- agts-independent dist-embedding path (Linear(2,C)+ReLU, Linear(C,C), GN, ReLU)
    d2_list = []
    for t in range(n_blocks):
        wd1 = wd1_ref[t]                          # (2, C)
        vec = vec_ref[t]                          # (11, n)
        bd1, gd2w, gd2b = vec[0:1], vec[1:2], vec[2:3]
        d1 = jnp.maximum(dx0 * wd1[0:1, :] + dx1 * wd1[1:2, :] + bd1, 0.0)   # (MP, C)
        d2 = jnp.dot(d1, wsq_ref[t, 0], preferred_element_type=jnp.float32)  # (MP, C)
        d2_list.append(jnp.maximum(_gn1(d2, gd2w, gd2b), 0.0))

    # ---- actor-dependent chain, static unroll over the stacked Att blocks ------------
    for t in range(n_blocks):
        vec = vec_ref[t]
        gqw, gqb = vec[3:4], vec[4:5]
        gc1w, gc1b = vec[5:6], vec[6:7]
        normw, normb = vec[7:8], vec[8:9]
        glinw, glinb = vec[9:10], vec[10:11]
        wc2 = wsq_ref[t, 1]                       # (A, A)
        wlin = wsq_ref[t, 2]                      # (A, A)

        res = agts

        # fused [query | agt] projection of agts -> one 256-wide MXU pass
        qa = jnp.dot(agts, wqa_ref[t], preferred_element_type=jnp.float32)   # (MA, C+A)
        q = jnp.maximum(_gn1(qa[:, :C], gqw, gqb), 0.0)                      # (MA, C)
        agt_proj = qa[:, C:]                                                 # (MA, A)

        # fused [dist | query] halves of ctx[0] in ONE 256-wide pass:
        # [d2; q] @ [wc1d | wc1q] -> take the diagonal blocks.
        dqz = jnp.dot(jnp.concatenate([d2_list[t], q], axis=0), wdq_ref[t],
                      preferred_element_type=jnp.float32)                    # (MP+MA, 2A)
        dq = dqz[:MP, :A].reshape(bt, NA, NC, A)
        qq = dqz[MP:, A:].reshape(bt, NA, 1, A)
        nq = nq_all[:, t * A:(t + 1) * A].reshape(bt, 1, NC, A)

        # self.ctx[0]: Linear(3C, A) on cat(dist, query, ctx) == dq + qq + nq, then GN+ReLU
        h = jnp.maximum(_gn1(dq + qq + nq, gc1w, gc1b), 0.0)                 # (bt,NA,NC,A)

        # mask + index_add_ over context nodes BEFORE ctx[1] (exact: wc2 linear, bias-free)
        agg_h = jnp.sum(mask_b * h, axis=2).reshape(MA, A)                   # (MA, A)
        agg = jnp.dot(agg_h, wc2, preferred_element_type=jnp.float32)        # (MA, A)

        # self.agt (no bias) + aggregate + GN + ReLU
        out = jnp.maximum(_gn1(agt_proj + agg, normw, normb), 0.0)

        # self.linear (Linear + GN, act=False), residual, ReLU
        out = _gn1(jnp.dot(out, wlin, preferred_element_type=jnp.float32), glinw, glinb)
        agts = jnp.maximum(out + res, 0.0)

    out_ref[...] = agts.reshape(bt, NA, A)


# ----------------------------------------------------------------------- packing / wrapper
def _pack_params(params_list, A, C):
    """Pack per-block weight dicts into 6 stacked arrays (few DMA descriptors)."""
    assert A == C, "packed path assumes n_actor == n_map (true for LaneGCN/SRFNet configs)"
    wd1 = jnp.stack([p['wd1'] for p in params_list])                           # (L, 2, C)
    wsq = jnp.stack([jnp.stack([p['wd2'], p['wc2'], p['wlin']])
                     for p in params_list])                                    # (L, 3, n, n)
    wqa = jnp.stack([jnp.concatenate([p['wq'], p['wagt']], axis=1)
                     for p in params_list])                                    # (L, A, C+A)
    wdq = jnp.stack([jnp.concatenate([p['wc1d'], p['wc1q']], axis=1)
                     for p in params_list])                                    # (L, C, 2A)
    wcc = jnp.concatenate([p['wc1c'] for p in params_list], axis=1)            # (C, L*A)
    vec = jnp.stack([jnp.concatenate([p['bd1'], p['gd2w'], p['gd2b'],
                                      p['gqw'], p['gqb'],
                                      p['gc1w'], p['gc1b'],
                                      p['normw'], p['normb'],
                                      p['glinw'], p['glinb']], axis=0)
                     for p in params_list])                                    # (L, 11, n)
    return wd1, wsq, wqa, wdq, wcc, vec


def m2a_forward(actors, actor_ctrs, nodes, node_ctrs, params_list, dist_th,
                batch_tile=None):
    """M2A.forward: the stacked Att blocks fused into a single pallas_call."""
    B, NA, A = actors.shape
    _, NC, C = nodes.shape
    L = len(params_list)
    wd1, wsq, wqa, wdq, wcc, vec = _pack_params(params_list, A, C)

    # Generation-aware batch tiling (review): default to ONE grid step.  v5e/v6e have a
    # single TensorCore, so any split is a pure serial-loop + per-step-overhead tax; on
    # v7x, megacore sharding only pays off once each core keeps a reasonably fat matmul M
    # and the duplicated weight DMA is amortized -> split only when per-core M >= 128 rows.
    if batch_tile is None:
        if B % 2 == 0 and (B // 2) * NA >= 128:
            batch_tile = B // 2
        else:
            batch_tile = B
    assert B % batch_tile == 0
    grid = (B // batch_tile,)

    kernel = functools.partial(_m2a_kernel, float(dist_th) ** 2, L)

    return pl.pallas_call(
        kernel,
        out_shape=jax.ShapeDtypeStruct((B, NA, A), jnp.float32),
        grid=grid,
        in_specs=[
            pl.BlockSpec((batch_tile, NA, A), lambda b: (b, 0, 0)),
            pl.BlockSpec((batch_tile, NA, 2), lambda b: (b, 0, 0)),
            pl.BlockSpec((batch_tile, NC, C), lambda b: (b, 0, 0)),
            pl.BlockSpec((batch_tile, NC, 2), lambda b: (b, 0, 0)),
            pl.BlockSpec(wd1.shape, lambda b: (0, 0, 0)),
            pl.BlockSpec(wsq.shape, lambda b: (0, 0, 0, 0)),
            pl.BlockSpec(wqa.shape, lambda b: (0, 0, 0)),
            pl.BlockSpec(wdq.shape, lambda b: (0, 0, 0)),
            pl.BlockSpec(wcc.shape, lambda b: (0, 0)),
            pl.BlockSpec(vec.shape, lambda b: (0, 0, 0)),
        ],
        out_specs=pl.BlockSpec((batch_tile, NA, A), lambda b: (b, 0, 0)),
        compiler_params=pltpu.CompilerParams(dimension_semantics=("parallel",)),
    )(actors, actor_ctrs, nodes, node_ctrs, wd1, wsq, wqa, wdq, wcc, vec)


# --------------------------------------------------------------------- params / reference
def init_att_params(key, n_actor, n_map):
    A, C = n_actor, n_map
    ks = iter(jax.random.split(key, 32))

    def nrm(shape, scale=0.2):
        return jax.random.normal(next(ks), shape, jnp.float32) * scale

    # projection weights stored as (in, out); GN affine / biases as (1, dim)
    return {
        'wd1': nrm((2, C)), 'bd1': nrm((1, C)),
        'wd2': nrm((C, C)), 'gd2w': 1.0 + nrm((1, C), 0.1), 'gd2b': nrm((1, C), 0.1),
        'wq': nrm((A, C)), 'gqw': 1.0 + nrm((1, C), 0.1), 'gqb': nrm((1, C), 0.1),
        'wc1d': nrm((C, A)), 'wc1q': nrm((C, A)), 'wc1c': nrm((C, A)),
        'gc1w': 1.0 + nrm((1, A), 0.1), 'gc1b': nrm((1, A), 0.1),
        'wc2': nrm((A, A)), 'wagt': nrm((A, A)),
        'normw': 1.0 + nrm((1, A), 0.1), 'normb': nrm((1, A), 0.1),
        'wlin': nrm((A, A)), 'glinw': 1.0 + nrm((1, A), 0.1), 'glinb': nrm((1, A), 0.1),
    }


def _att_ref_single(actors, a_ctr, nodes, c_ctr, p, dist_th):
    """Pure-JAX reference for one batch (literal concat + per-edge ops, unfused)."""
    NA, A = actors.shape
    NC, C = nodes.shape
    res = actors
    diff = a_ctr[:, None, :] - c_ctr[None, :, :]
    mask = (jnp.sqrt((diff ** 2).sum(-1)) <= dist_th).astype(jnp.float32)
    d = diff.reshape(-1, 2)
    d1 = jax.nn.relu(d @ p['wd1'] + p['bd1'])
    d2 = jax.nn.relu(_gn1_ref(d1 @ p['wd2'], p['gd2w'], p['gd2b']))
    q = jax.nn.relu(_gn1_ref(actors @ p['wq'], p['gqw'], p['gqb']))
    qp = jnp.broadcast_to(q[:, None, :], (NA, NC, C)).reshape(NA * NC, C)
    cp = jnp.broadcast_to(nodes[None], (NA, NC, C)).reshape(NA * NC, C)
    cat = jnp.concatenate([d2, qp, cp], axis=1)
    wc1 = jnp.concatenate([p['wc1d'], p['wc1q'], p['wc1c']], axis=0)   # (3C, A)
    h = jax.nn.relu(_gn1_ref(cat @ wc1, p['gc1w'], p['gc1b']))
    ce = h @ p['wc2']
    agg = (mask.reshape(NA, NC, 1) * ce.reshape(NA, NC, A)).sum(1)
    out = actors @ p['wagt'] + agg
    out = jax.nn.relu(_gn1_ref(out, p['normw'], p['normb']))
    out = _gn1_ref(out @ p['wlin'], p['glinw'], p['glinb'])
    return jax.nn.relu(out + res)


def m2a_ref(actors, actor_ctrs, nodes, node_ctrs, params_list, dist_th):
    for p in params_list:
        actors = jax.vmap(_att_ref_single, in_axes=(0, 0, 0, 0, None, None))(
            actors, actor_ctrs, nodes, node_ctrs, p, dist_th)
    return actors


# --------------------------------------------------------------------------------- main
if __name__ == "__main__":
    key = jax.random.PRNGKey(0)
    B, NA, NC = 2, 8, 8
    # Production LaneGCN widths: lane-dense (128-wide) activations and unmasked stores.
    n_actor, n_map = 128, 128
    config = {'n_actor': n_actor, 'n_map': n_map, 'map2actor_dist': 6.0}

    k1, k2, k3, k4, kp = jax.random.split(key, 5)
    actors = jax.random.normal(k1, (B, NA, n_actor), jnp.float32)
    actor_ctrs = jax.random.uniform(k2, (B, NA, 2), jnp.float32, -5.0, 5.0)
    nodes = jax.random.normal(k3, (B, NC, n_map), jnp.float32)
    node_ctrs = jax.random.uniform(k4, (B, NC, 2), jnp.float32, -5.0, 5.0)

    kp1, kp2 = jax.random.split(kp)
    params = [init_att_params(kp1, n_actor, n_map),
              init_att_params(kp2, n_actor, n_map)]

    out = m2a_forward(actors, actor_ctrs, nodes, node_ctrs,
                      params, config['map2actor_dist'])
    out = jax.block_until_ready(out)

    ref = m2a_ref(actors, actor_ctrs, nodes, node_ctrs,
                  params, config['map2actor_dist'])
    assert out.shape == (B, NA, n_actor)
    assert bool(jnp.all(jnp.isfinite(out)))
    assert bool(jnp.allclose(out, ref, rtol=1e-3, atol=1e-3))
    print("KERNEL_OK")
</pallas_src>

<mosaic_0001>
module attributes {stable_mosaic.version = 11 : i64} {
  func.func @_m2a_kernel(%arg0: i32, %arg1: memref<2x8x128xf32, #tpu.memory_space<vmem>>, %arg2: memref<2x8x2xf32, #tpu.memory_space<vmem>>, %arg3: memref<2x8x128xf32, #tpu.memory_space<vmem>>, %arg4: memref<2x8x2xf32, #tpu.memory_space<vmem>>, %arg5: memref<2x2x128xf32, #tpu.memory_space<vmem>>, %arg6: memref<2x3x128x128xf32, #tpu.memory_space<vmem>>, %arg7: memref<2x128x256xf32, #tpu.memory_space<vmem>>, %arg8: memref<2x128x256xf32, #tpu.memory_space<vmem>>, %arg9: memref<128x256xf32, #tpu.memory_space<vmem>>, %arg10: memref<2x11x128xf32, #tpu.memory_space<vmem>>, %arg11: memref<2x8x128xf32, #tpu.memory_space<vmem>>) attributes {dimension_semantics = [#tpu.dimension_semantics<parallel>], iteration_bounds = array<i64: 1>, scalar_prefetch = 0 : i64, scratch_operands = 0 : i64, tpu.core_type = #tpu.core_type<tc>, window_params = [{transform_indices = @transform_0, window_bounds = array<i64: 2, 8, 128>}, {transform_indices = @transform_1, window_bounds = array<i64: 2, 8, 2>}, {transform_indices = @transform_2, window_bounds = array<i64: 2, 8, 128>}, {transform_indices = @transform_3, window_bounds = array<i64: 2, 8, 2>}, {pipeline_mode = #tpu.pipeline_mode<synchronous>, transform_indices = @transform_4, window_bounds = array<i64: 2, 2, 128>}, {pipeline_mode = #tpu.pipeline_mode<synchronous>, transform_indices = @transform_5, window_bounds = array<i64: 2, 3, 128, 128>}, {pipeline_mode = #tpu.pipeline_mode<synchronous>, transform_indices = @transform_6, window_bounds = array<i64: 2, 128, 256>}, {pipeline_mode = #tpu.pipeline_mode<synchronous>, transform_indices = @transform_7, window_bounds = array<i64: 2, 128, 256>}, {pipeline_mode = #tpu.pipeline_mode<synchronous>, transform_indices = @transform_8, window_bounds = array<i64: 128, 256>}, {pipeline_mode = #tpu.pipeline_mode<synchronous>, transform_indices = @transform_9, window_bounds = array<i64: 2, 11, 128>}, {transform_indices = @transform_10, window_bounds = array<i64: 2, 8, 128>}]} {
    %c0 = arith.constant 0 : index
    %c0_0 = arith.constant 0 : index
    %c0_1 = arith.constant 0 : index
    %0 = vector.load %arg1[%c0, %c0_0, %c0_1] : memref<2x8x128xf32, #tpu.memory_space<vmem>>, vector<2x8x128xf32>
    %1 = vector.shape_cast %0 : vector<2x8x128xf32> to vector<16x128xf32>
    %c0_2 = arith.constant 0 : index
    %c0_3 = arith.constant 0 : index
    %c0_4 = arith.constant 0 : index
    %2 = vector.load %arg3[%c0_2, %c0_3, %c0_4] : memref<2x8x128xf32, #tpu.memory_space<vmem>>, vector<2x8x128xf32>
    %3 = vector.shape_cast %2 : vector<2x8x128xf32> to vector<16x128xf32>
    %c0_5 = arith.constant 0 : index
    %c0_6 = arith.constant 0 : index
    %c0_7 = arith.constant 0 : index
    %4 = vector.load %arg2[%c0_5, %c0_6, %c0_7] : memref<2x8x2xf32, #tpu.memory_space<vmem>>, vector<2x8x2xf32>
    %c0_8 = arith.constant 0 : index
    %c0_9 = arith.constant 0 : index
    %c0_10 = arith.constant 0 : index
    %5 = vector.load %arg4[%c0_8, %c0_9, %c0_10] : memref<2x8x2xf32, #tpu.memory_space<vmem>>, vector<2x8x2xf32>
    %6 = vector.shape_cast %4 : vector<2x8x2xf32> to vector<2x8x1x2xf32>
    %7 = vector.shape_cast %5 : vector<2x8x2xf32> to vector<2x1x8x2xf32>
    %8 = vector.broadcast %6 : vector<2x8x1x2xf32> to vector<2x8x8x2xf32>
    %9 = vector.broadcast %7 : vector<2x1x8x2xf32> to vector<2x8x8x2xf32>
    %10 = arith.subf %8, %9 : vector<2x8x8x2xf32>
    %11 = arith.mulf %10, %10 : vector<2x8x8x2xf32>
    %cst = arith.constant dense<0.000000e+00> : vector<2x8x8xf32>
    %12 = vector.multi_reduction <add>, %11, %cst [3] : vector<2x8x8x2xf32> to vector<2x8x8xf32>
    %13 = vector.shape_cast %12 : vector<2x8x8xf32> to vector<2x8x8x1xf32>
    %cst_11 = arith.constant 3.600000e+01 : f32
    %14 = vector.broadcast %cst_11 : f32 to vector<2x8x8x1xf32>
    %15 = arith.cmpf ole, %13, %14 : vector<2x8x8x1xf32>
    %16 = arith.extui %15 : vector<2x8x8x1xi1> to vector<2x8x8x1xi32>
    %17 = arith.sitofp %16 : vector<2x8x8x1xi32> to vector<2x8x8x1xf32>
    %18 = vector.shape_cast %17 : vector<2x8x8x1xf32> to vector<2x8x8x1xf32>
    %19 = vector.broadcast %18 : vector<2x8x8x1xf32> to vector<2x8x8x128xf32>
    %20 = vector.shape_cast %10 : vector<2x8x8x2xf32> to vector<128x2xf32>
    %21 = vector.extract_strided_slice %20 {offsets = [0, 0], sizes = [128, 1], strides = [1, 1]} : vector<128x2xf32> to vector<128x1xf32>
    %22 = vector.shape_cast %21 : vector<128x1xf32> to vector<128x1xf32>
    %23 = vector.broadcast %22 : vector<128x1xf32> to vector<128x128xf32>
    %24 = vector.extract_strided_slice %20 {offsets = [0, 1], sizes = [128, 1], strides = [1, 1]} : vector<128x2xf32> to vector<128x1xf32>
    %25 = vector.shape_cast %24 : vector<128x1xf32> to vector<128x1xf32>
    %26 = vector.broadcast %25 : vector<128x1xf32> to vector<128x128xf32>
    %c0_12 = arith.constant 0 : index
    %c0_13 = arith.constant 0 : index
    %27 = vector.load %arg9[%c0_12, %c0_13] : memref<128x256xf32, #tpu.memory_space<vmem>>, vector<128x256xf32>
    %cst_14 = arith.constant dense<0.000000e+00> : vector<16x256xf32>
    %28 = tpu.matmul %3, %27, %cst_14 {dimension_numbers = #tpu.dot_dimension_numbers<[1], [0], [0], [1], [0, 0, 1, 1], [], []>} : vector<16x128xf32>, vector<128x256xf32>, vector<16x256xf32> -> vector<16x256xf32>
    %c0_15 = arith.constant 0 : index
    %c0_16 = arith.constant 0 : index
    %c0_17 = arith.constant 0 : index
    %29 = vector.load %arg5[%c0_15, %c0_16, %c0_17] : memref<2x2x128xf32, #tpu.memory_space<vmem>>, vector<1x2x128xf32>
    %30 = vector.shape_cast %29 : vector<1x2x128xf32> to vector<2x128xf32>
    %c0_18 = arith.constant 0 : index
    %c0_19 = arith.constant 0 : index
    %c0_20 = arith.constant 0 : index
    %31 = vector.load %arg10[%c0_18, %c0_19, %c0_20] : memref<2x11x128xf32, #tpu.memory_space<vmem>>, vector<1x11x128xf32>
    %32 = vector.shape_cast %31 : vector<1x11x128xf32> to vector<11x128xf32>
    %33 = vector.extract_strided_slice %32 {offsets = [0, 0], sizes = [1, 128], strides = [1, 1]} : vector<11x128xf32> to vector<1x128xf32>
    %34 = vector.extract_strided_slice %32 {offsets = [1, 0], sizes = [1, 128], strides = [1, 1]} : vector<11x128xf32> to vector<1x128xf32>
    %35 = vector.extract_strided_slice %32 {offsets = [2, 0], sizes = [1, 128], strides = [1, 1]} : vector<11x128xf32> to vector<1x128xf32>
    %36 = vector.extract_strided_slice %30 {offsets = [0, 0], sizes = [1, 128], strides = [1, 1]} : vector<2x128xf32> to vector<1x128xf32>
    %37 = vector.broadcast %36 : vector<1x128xf32> to vector<128x128xf32>
    %38 = arith.mulf %23, %37 : vector<128x128xf32>
    %39 = vector.extract_strided_slice %30 {offsets = [1, 0], sizes = [1, 128], strides = [1, 1]} : vector<2x128xf32> to vector<1x128xf32>
    %40 = vector.broadcast %39 : vector<1x128xf32> to vector<128x128xf32>
    %41 = arith.mulf %26, %40 : vector<128x128xf32>
    %42 = arith.addf %38, %41 : vector<128x128xf32>
    %43 = vector.broadcast %33 : vector<1x128xf32> to vector<128x128xf32>
    %44 = arith.addf %42, %43 : vector<128x128xf32>
    %cst_21 = arith.constant 0.000000e+00 : f32
    %45 = vector.broadcast %cst_21 : f32 to vector<128x128xf32>
    %46 = arith.maximumf %44, %45 : vector<128x128xf32>
    %c0_22 = arith.constant 0 : index
    %c0_23 = arith.constant 0 : index
    %c0_24 = arith.constant 0 : index
    %c0_25 = arith.constant 0 : index
    %47 = vector.load %arg6[%c0_22, %c0_23, %c0_24, %c0_25] : memref<2x3x128x128xf32, #tpu.memory_space<vmem>>, vector<1x1x128x128xf32>
    %48 = vector.shape_cast %47 : vector<1x1x128x128xf32> to vector<128x128xf32>
    %cst_26 = arith.constant dense<0.000000e+00> : vector<128x128xf32>
    %49 = tpu.matmul %46, %48, %cst_26 {dimension_numbers = #tpu.dot_dimension_numbers<[1], [0], [0], [1], [0, 0, 1, 1], [], []>} : vector<128x128xf32>, vector<128x128xf32>, vector<128x128xf32> -> vector<128x128xf32>
    %cst_27 = arith.constant dense<0.000000e+00> : vector<128xf32>
    %50 = vector.multi_reduction <add>, %49, %cst_27 [1] : vector<128x128xf32> to vector<128xf32>
    %51 = vector.shape_cast %50 : vector<128xf32> to vector<128x1xf32>
    %cst_28 = arith.constant 1.280000e+02 : f32
    %52 = vector.broadcast %cst_28 : f32 to vector<128x1xf32>
    %53 = arith.divf %51, %52 : vector<128x1xf32>
    %54 = arith.mulf %49, %49 : vector<128x128xf32>
    %cst_29 = arith.constant dense<0.000000e+00> : vector<128xf32>
    %55 = vector.multi_reduction <add>, %54, %cst_29 [1] : vector<128x128xf32> to vector<128xf32>
    %56 = vector.shape_cast %55 : vector<128xf32> to vector<128x1xf32>
    %cst_30 = arith.constant 1.280000e+02 : f32
    %57 = vector.broadcast %cst_30 : f32 to vector<128x1xf32>
    %58 = arith.divf %56, %57 : vector<128x1xf32>
    %59 = arith.mulf %53, %53 : vector<128x1xf32>
    %60 = arith.subf %58, %59 : vector<128x1xf32>
    %cst_31 = arith.constant 0.000000e+00 : f32
    %61 = vector.broadcast %cst_31 : f32 to vector<128x1xf32>
    %62 = arith.maximumf %60, %61 : vector<128x1xf32>
    %63 = vector.broadcast %53 : vector<128x1xf32> to vector<128x128xf32>
    %64 = arith.subf %49, %63 : vector<128x128xf32>
    %cst_32 = arith.constant 9.99999974E-6 : f32
    %65 = vector.broadcast %cst_32 : f32 to vector<128x1xf32>
    %66 = arith.addf %62, %65 : vector<128x1xf32>
    %67 = math.rsqrt %66 : vector<128x1xf32>
    %68 = vector.broadcast %67 : vector<128x1xf32> to vector<128x128xf32>
    %69 = arith.mulf %64, %68 : vector<128x128xf32>
    %70 = vector.broadcast %34 : vector<1x128xf32> to vector<128x128xf32>
    %71 = arith.mulf %69, %70 : vector<128x128xf32>
    %72 = vector.broadcast %35 : vector<1x128xf32> to vector<128x128xf32>
    %73 = arith.addf %71, %72 : vector<128x128xf32>
    %cst_33 = arith.constant 0.000000e+00 : f32
    %74 = vector.broadcast %cst_33 : f32 to vector<128x128xf32>
    %75 = arith.maximumf %73, %74 : vector<128x128xf32>
    %c1 = arith.constant 1 : index
    %c0_34 = arith.constant 0 : index
    %c0_35 = arith.constant 0 : index
    %76 = vector.load %arg5[%c1, %c0_34, %c0_35] : memref<2x2x128xf32, #tpu.memory_space<vmem>>, vector<1x2x128xf32>
    %77 = vector.shape_cast %76 : vector<1x2x128xf32> to vector<2x128xf32>
    %c1_36 = arith.constant 1 : index
    %c0_37 = arith.constant 0 : index
    %c0_38 = arith.constant 0 : index
    %78 = vector.load %arg10[%c1_36, %c0_37, %c0_38] : memref<2x11x128xf32, #tpu.memory_space<vmem>>, vector<1x11x128xf32>
    %79 = vector.shape_cast %78 : vector<1x11x128xf32> to vector<11x128xf32>
    %80 = vector.extract_strided_slice %79 {offsets = [0, 0], sizes = [1, 128], strides = [1, 1]} : vector<11x128xf32> to vector<1x128xf32>
    %81 = vector.extract_strided_slice %79 {offsets = [1, 0], sizes = [1, 128], strides = [1, 1]} : vector<11x128xf32> to vector<1x128xf32>
    %82 = vector.extract_strided_slice %79 {offsets = [2, 0], sizes = [1, 128], strides = [1, 1]} : vector<11x128xf32> to vector<1x128xf32>
    %83 = vector.extract_strided_slice %77 {offsets = [0, 0], sizes = [1, 128], strides = [1, 1]} : vector<2x128xf32> to vector<1x128xf32>
    %84 = vector.broadcast %83 : vector<1x128xf32> to vector<128x128xf32>
    %85 = arith.mulf %23, %84 : vector<128x128xf32>
    %86 = vector.extract_strided_slice %77 {offsets = [1, 0], sizes = [1, 128], strides = [1, 1]} : vector<2x128xf32> to vector<1x128xf32>
    %87 = vector.broadcast %86 : vector<1x128xf32> to vector<128x128xf32>
    %88 = arith.mulf %26, %87 : vector<128x128xf32>
    %89 = arith.addf %85, %88 : vector<128x128xf32>
    %90 = vector.broadcast %80 : vector<1x128xf32> to vector<128x128xf32>
    %91 = arith.addf %89, %90 : vector<128x128xf32>
    %cst_39 = arith.constant 0.000000e+00 : f32
    %92 = vector.broadcast %cst_39 : f32 to vector<128x128xf32>
    %93 = arith.maximumf %91, %92 : vector<128x128xf32>
    %c1_40 = arith.constant 1 : index
    %c0_41 = arith.constant 0 : index
    %c0_42 = arith.constant 0 : index
    %c0_43 = arith.constant 0 : index
    %94 = vector.load %arg6[%c1_40, %c0_41, %c0_42, %c0_43] : memref<2x3x128x128xf32, #tpu.memory_space<vmem>>, vector<1x1x128x128xf32>
    %95 = vector.shape_cast %94 : vector<1x1x128x128xf32> to vector<128x128xf32>
    %cst_44 = arith.constant dense<0.000000e+00> : vector<128x128xf32>
    %96 = tpu.matmul %93, %95, %cst_44 {dimension_numbers = #tpu.dot_dimension_numbers<[1], [0], [0], [1], [0, 0, 1, 1], [], []>} : vector<128x128xf32>, vector<128x128xf32>, vector<128x128xf32> -> vector<128x128xf32>
    %cst_45 = arith.constant dense<0.000000e+00> : vector<128xf32>
    %97 = vector.multi_reduction <add>, %96, %cst_45 [1] : vector<128x128xf32> to vector<128xf32>
    %98 = vector.shape_cast %97 : vector<128xf32> to vector<128x1xf32>
    %cst_46 = arith.constant 1.280000e+02 : f32
    %99 = vector.broadcast %cst_46 : f32 to vector<128x1xf32>
    %100 = arith.divf %98, %99 : vector<128x1xf32>
    %101 = arith.mulf %96, %96 : vector<128x128xf32>
    %cst_47 = arith.constant dense<0.000000e+00> : vector<128xf32>
    %102 = vector.multi_reduction <add>, %101, %cst_47 [1] : vector<128x128xf32> to vector<128xf32>
    %103 = vector.shape_cast %102 : vector<128xf32> to vector<128x1xf32>
    %cst_48 = arith.constant 1.280000e+02 : f32
    %104 = vector.broadcast %cst_48 : f32 to vector<128x1xf32>
    %105 = arith.divf %103, %104 : vector<128x1xf32>
    %106 = arith.mulf %100, %100 : vector<128x1xf32>
    %107 = arith.subf %105, %106 : vector<128x1xf32>
    %cst_49 = arith.constant 0.000000e+00 : f32
    %108 = vector.broadcast %cst_49 : f32 to vector<128x1xf32>
    %109 = arith.maximumf %107, %108 : vector<128x1xf32>
    %110 = vector.broadcast %100 : vector<128x1xf32> to vector<128x128xf32>
    %111 = arith.subf %96, %110 : vector<128x128xf32>
    %cst_50 = arith.constant 9.99999974E-6 : f32
    %112 = vector.broadcast %cst_50 : f32 to vector<128x1xf32>
    %113 = arith.addf %109, %112 : vector<128x1xf32>
    %114 = math.rsqrt %113 : vector<128x1xf32>
    %115 = vector.broadcast %114 : vector<128x1xf32> to vector<128x128xf32>
    %116 = arith.mulf %111, %115 : vector<128x128xf32>
    %117 = vector.broadcast %81 : vector<1x128xf32> to vector<128x128xf32>
    %118 = arith.mulf %116, %117 : vector<128x128xf32>
    %119 = vector.broadcast %82 : vector<1x128xf32> to vector<128x128xf32>
    %120 = arith.addf %118, %119 : vector<128x128xf32>
    %cst_51 = arith.constant 0.000000e+00 : f32
    %121 = vector.broadcast %cst_51 : f32 to vector<128x128xf32>
    %122 = arith.maximumf %120, %121 : vector<128x128xf32>
    %c0_52 = arith.constant 0 : index
    %c0_53 = arith.constant 0 : index
    %c0_54 = arith.constant 0 : index
    %123 = vector.load %arg10[%c0_52, %c0_53, %c0_54] : memref<2x11x128xf32, #tpu.memory_space<vmem>>, vector<1x11x128xf32>
    %124 = vector.shape_cast %123 : vector<1x11x128xf32> to vector<11x128xf32>
    %125 = vector.extract_strided_slice %124 {offsets = [3, 0], sizes = [1, 128], strides = [1, 1]} : vector<11x128xf32> to vector<1x128xf32>
    %126 = vector.extract_strided_slice %124 {offsets = [4, 0], sizes = [1, 128], strides = [1, 1]} : vector<11x128xf32> to vector<1x128xf32>
    %127 = vector.extract_strided_slice %124 {offsets = [5, 0], sizes = [1, 128], strides = [1, 1]} : vector<11x128xf32> to vector<1x128xf32>
    %128 = vector.extract_strided_slice %124 {offsets = [6, 0], sizes = [1, 128], strides = [1, 1]} : vector<11x128xf32> to vector<1x128xf32>
    %129 = vector.extract_strided_slice %124 {offsets = [7, 0], sizes = [1, 128], strides = [1, 1]} : vector<11x128xf32> to vector<1x128xf32>
    %130 = vector.extract_strided_slice %124 {offsets = [8, 0], sizes = [1, 128], strides = [1, 1]} : vector<11x128xf32> to vector<1x128xf32>
    %131 = vector.extract_strided_slice %124 {offsets = [9, 0], sizes = [1, 128], strides = [1, 1]} : vector<11x128xf32> to vector<1x128xf32>
    %132 = vector.extract_strided_slice %124 {offsets = [10, 0], sizes = [1, 128], strides = [1, 1]} : vector<11x128xf32> to vector<1x128xf32>
    %c0_55 = arith.constant 0 : index
    %c1_56 = arith.constant 1 : index
    %c0_57 = arith.constant 0 : index
    %c0_58 = arith.constant 0 : index
    %133 = vector.load %arg6[%c0_55, %c1_56, %c0_57, %c0_58] : memref<2x3x128x128xf32, #tpu.memory_space<vmem>>, vector<1x1x128x128xf32>
    %134 = vector.shape_cast %133 : vector<1x1x128x128xf32> to vector<128x128xf32>
    %c0_59 = arith.constant 0 : index
    %c2 = arith.constant 2 : index
    %c0_60 = arith.constant 0 : index
    %c0_61 = arith.constant 0 : index
    %135 = vector.load %arg6[%c0_59, %c2, %c0_60, %c0_61] : memref<2x3x128x128xf32, #tpu.memory_space<vmem>>, vector<1x1x128x128xf32>
    %136 = vector.shape_cast %135 : vector<1x1x128x128xf32> to vector<128x128xf32>
    %c0_62 = arith.constant 0 : index
    %c0_63 = arith.constant 0 : index
    %c0_64 = arith.constant 0 : index
    %137 = vector.load %arg7[%c0_62, %c0_63, %c0_64] : memref<2x128x256xf32, #tpu.memory_space<vmem>>, vector<1x128x256xf32>
    %138 = vector.shape_cast %137 : vector<1x128x256xf32> to vector<128x256xf32>
    %cst_65 = arith.constant dense<0.000000e+00> : vector<16x256xf32>
    %139 = tpu.matmul %1, %138, %cst_65 {dimension_numbers = #tpu.dot_dimension_numbers<[1], [0], [0], [1], [0, 0, 1, 1], [], []>} : vector<16x128xf32>, vector<128x256xf32>, vector<16x256xf32> -> vector<16x256xf32>
    %140 = vector.extract_strided_slice %139 {offsets = [0, 0], sizes = [16, 128], strides = [1, 1]} : vector<16x256xf32> to vector<16x128xf32>
    %cst_66 = arith.constant dense<0.000000e+00> : vector<16xf32>
    %141 = vector.multi_reduction <add>, %140, %cst_66 [1] : vector<16x128xf32> to vector<16xf32>
    %142 = vector.shape_cast %141 : vector<16xf32> to vector<16x1xf32>
    %cst_67 = arith.constant 1.280000e+02 : f32
    %143 = vector.broadcast %cst_67 : f32 to vector<16x1xf32>
    %144 = arith.divf %142, %143 : vector<16x1xf32>
    %145 = arith.mulf %140, %140 : vector<16x128xf32>
    %cst_68 = arith.constant dense<0.000000e+00> : vector<16xf32>
    %146 = vector.multi_reduction <add>, %145, %cst_68 [1] : vector<16x128xf32> to vector<16xf32>
    %147 = vector.shape_cast %146 : vector<16xf32> to vector<16x1xf32>
    %cst_69 = arith.constant 1.280000e+02 : f32
    %148 = vector.broadcast %cst_69 : f32 to vector<16x1xf32>
    %149 = arith.divf %147, %148 : vector<16x1xf32>
    %150 = arith.mulf %144, %144 : vector<16x1xf32>
    %151 = arith.subf %149, %150 : vector<16x1xf32>
    %cst_70 = arith.constant 0.000000e+00 : f32
    %152 = vector.broadcast %cst_70 : f32 to vector<16x1xf32>
    %153 = arith.maximumf %151, %152 : vector<16x1xf32>
    %154 = vector.broadcast %144 : vector<16x1xf32> to vector<16x128xf32>
    %155 = arith.subf %140, %154 : vector<16x128xf32>
    %cst_71 = arith.constant 9.99999974E-6 : f32
    %156 = vector.broadcast %cst_71 : f32 to vector<16x1xf32>
    %157 = arith.addf %153, %156 : vector<16x1xf32>
    %158 = math.rsqrt %157 : vector<16x1xf32>
    %159 = vector.broadcast %158 : vector<16x1xf32> to vector<16x128xf32>
    %160 = arith.mulf %155, %159 : vector<16x128xf32>
    %161 = vector.broadcast %125 : vector<1x128xf32> to vector<16x128xf32>
    %162 = arith.mulf %160, %161 : vector<16x128xf32>
    %163 = vector.broadcast %126 : vector<1x128xf32> to vector<16x128xf32>
    %164 = arith.addf %162, %163 : vector<16x128xf32>
    %cst_72 = arith.constant 0.000000e+00 : f32
    %165 = vector.broadcast %cst_72 : f32 to vector<16x128xf32>
    %166 = arith.maximumf %164, %165 : vector<16x128xf32>
    %167 = vector.extract_strided_slice %139 {offsets = [0, 128], sizes = [16, 128], strides = [1, 1]} : vector<16x256xf32> to vector<16x128xf32>
    %168 = tpu.concatenate %75, %166 in 0 : vector<128x128xf32>, vector<16x128xf32> -> vector<144x128xf32>
    %c0_73 = arith.constant 0 : index
    %c0_74 = arith.constant 0 : index
    %c0_75 = arith.constant 0 : index
    %169 = vector.load %arg8[%c0_73, %c0_74, %c0_75] : memref<2x128x256xf32, #tpu.memory_space<vmem>>, vector<1x128x256xf32>
    %170 = vector.shape_cast %169 : vector<1x128x256xf32> to vector<128x256xf32>
    %cst_76 = arith.constant dense<0.000000e+00> : vector<144x256xf32>
    %171 = tpu.matmul %168, %170, %cst_76 {dimension_numbers = #tpu.dot_dimension_numbers<[1], [0], [0], [1], [0, 0, 1, 1], [], []>} : vector<144x128xf32>, vector<128x256xf32>, vector<144x256xf32> -> vector<144x256xf32>
    %172 = vector.extract_strided_slice %171 {offsets = [0, 0], sizes = [128, 128], strides = [1, 1]} : vector<144x256xf32> to vector<128x128xf32>
    %173 = vector.shape_cast %172 : vector<128x128xf32> to vector<2x8x8x128xf32>
    %174 = vector.extract_strided_slice %171 {offsets = [128, 128], sizes = [16, 128], strides = [1, 1]} : vector<144x256xf32> to vector<16x128xf32>
    %175 = vector.shape_cast %174 : vector<16x128xf32> to vector<2x8x1x128xf32>
    %176 = vector.extract_strided_slice %28 {offsets = [0, 0], sizes = [16, 128], strides = [1, 1]} : vector<16x256xf32> to vector<16x128xf32>
    %177 = vector.shape_cast %176 : vector<16x128xf32> to vector<2x1x8x128xf32>
    %178 = vector.broadcast %175 : vector<2x8x1x128xf32> to vector<2x8x8x128xf32>
    %179 = arith.addf %173, %178 : vector<2x8x8x128xf32>
    %180 = vector.broadcast %177 : vector<2x1x8x128xf32> to vector<2x8x8x128xf32>
    %181 = arith.addf %179, %180 : vector<2x8x8x128xf32>
    %cst_77 = arith.constant dense<0.000000e+00> : vector<2x8x8xf32>
    %182 = vector.multi_reduction <add>, %181, %cst_77 [3] : vector<2x8x8x128xf32> to vector<2x8x8xf32>
    %183 = vector.shape_cast %182 : vector<2x8x8xf32> to vector<2x8x8x1xf32>
    %cst_78 = arith.constant 1.280000e+02 : f32
    %184 = vector.broadcast %cst_78 : f32 to vector<2x8x8x1xf32>
    %185 = arith.divf %183, %184 : vector<2x8x8x1xf32>
    %186 = arith.mulf %181, %181 : vector<2x8x8x128xf32>
    %cst_79 = arith.constant dense<0.000000e+00> : vector<2x8x8xf32>
    %187 = vector.multi_reduction <add>, %186, %cst_79 [3] : vector<2x8x8x128xf32> to vector<2x8x8xf32>
    %188 = vector.shape_cast %187 : vector<2x8x8xf32> to vector<2x8x8x1xf32>
    %cst_80 = arith.constant 1.280000e+02 : f32
    %189 = vector.broadcast %cst_80 : f32 to vector<2x8x8x1xf32>
    %190 = arith.divf %188, %189 : vector<2x8x8x1xf32>
    %191 = arith.mulf %185, %185 : vector<2x8x8x1xf32>
    %192 = arith.subf %190, %191 : vector<2x8x8x1xf32>
    %cst_81 = arith.constant 0.000000e+00 : f32
    %193 = vector.broadcast %cst_81 : f32 to vector<2x8x8x1xf32>
    %194 = arith.maximumf %192, %193 : vector<2x8x8x1xf32>
    %195 = vector.broadcast %185 : vector<2x8x8x1xf32> to vector<2x8x8x128xf32>
    %196 = arith.subf %181, %195 : vector<2x8x8x128xf32>
    %cst_82 = arith.constant 9.99999974E-6 : f32
    %197 = vector.broadcast %cst_82 : f32 to vector<2x8x8x1xf32>
    %198 = arith.addf %194, %197 : vector<2x8x8x1xf32>
    %199 = math.rsqrt %198 : vector<2x8x8x1xf32>
    %200 = vector.broadcast %199 : vector<2x8x8x1xf32> to vector<2x8x8x128xf32>
    %201 = arith.mulf %196, %200 : vector<2x8x8x128xf32>
    %202 = vector.shape_cast %127 : vector<1x128xf32> to vector<1x1x1x128xf32>
    %203 = vector.broadcast %202 : vector<1x1x1x128xf32> to vector<2x8x8x128xf32>
    %204 = arith.mulf %201, %203 : vector<2x8x8x128xf32>
    %205 = vector.shape_cast %128 : vector<1x128xf32> to vector<1x1x1x128xf32>
    %206 = vector.broadcast %205 : vector<1x1x1x128xf32> to vector<2x8x8x128xf32>
    %207 = arith.addf %204, %206 : vector<2x8x8x128xf32>
    %cst_83 = arith.constant 0.000000e+00 : f32
    %208 = vector.broadcast %cst_83 : f32 to vector<2x8x8x128xf32>
    %209 = arith.maximumf %207, %208 : vector<2x8x8x128xf32>
    %210 = arith.mulf %19, %209 : vector<2x8x8x128xf32>
    %cst_84 = arith.constant dense<0.000000e+00> : vector<2x8x128xf32>
    %211 = vector.multi_reduction <add>, %210, %cst_84 [2] : vector<2x8x8x128xf32> to vector<2x8x128xf32>
    %212 = vector.shape_cast %211 : vector<2x8x128xf32> to vector<16x128xf32>
    %cst_85 = arith.constant dense<0.000000e+00> : vector<16x128xf32>
    %213 = tpu.matmul %212, %134, %cst_85 {dimension_numbers = #tpu.dot_dimension_numbers<[1], [0], [0], [1], [0, 0, 1, 1], [], []>} : vector<16x128xf32>, vector<128x128xf32>, vector<16x128xf32> -> vector<16x128xf32>
    %214 = arith.addf %167, %213 : vector<16x128xf32>
    %cst_86 = arith.constant dense<0.000000e+00> : vector<16xf32>
    %215 = vector.multi_reduction <add>, %214, %cst_86 [1] : vector<16x128xf32> to vector<16xf32>
    %216 = vector.shape_cast %215 : vector<16xf32> to vector<16x1xf32>
    %cst_87 = arith.constant 1.280000e+02 : f32
    %217 = vector.broadcast %cst_87 : f32 to vector<16x1xf32>
    %218 = arith.divf %216, %217 : vector<16x1xf32>
    %219 = arith.mulf %214, %214 : vector<16x128xf32>
    %cst_88 = arith.constant dense<0.000000e+00> : vector<16xf32>
    %220 = vector.multi_reduction <add>, %219, %cst_88 [1] : vector<16x128xf32> to vector<16xf32>
    %221 = vector.shape_cast %220 : vector<16xf32> to vector<16x1xf32>
    %cst_89 = arith.constant 1.280000e+02 : f32
    %222 = vector.broadcast %cst_89 : f32 to vector<16x1xf32>
    %223 = arith.divf %221, %222 : vector<16x1xf32>
    %224 = arith.mulf %218, %218 : vector<16x1xf32>
    %225 = arith.subf %223, %224 : vector<16x1xf32>
    %cst_90 = arith.constant 0.000000e+00 : f32
    %226 = vector.broadcast %cst_90 : f32 to vector<16x1xf32>
    %227 = arith.maximumf %225, %226 : vector<16x1xf32>
    %228 = vector.broadcast %218 : vector<16x1xf32> to vector<16x128xf32>
    %229 = arith.subf %214, %228 : vector<16x128xf32>
    %cst_91 = arith.constant 9.99999974E-6 : f32
    %230 = vector.broadcast %cst_91 : f32 to vector<16x1xf32>
    %231 = arith.addf %227, %230 : vector<16x1xf32>
    %232 = math.rsqrt %231 : vector<16x1xf32>
    %233 = vector.broadcast %232 : vector<16x1xf32> to vector<16x128xf32>
    %234 = arith.mulf %229, %233 : vector<16x128xf32>
    %235 = vector.broadcast %129 : vector<1x128xf32> to vector<16x128xf32>
    %236 = arith.mulf %234, %235 : vector<16x128xf32>
    %237 = vector.broadcast %130 : vector<1x128xf32> to vector<16x128xf32>
    %238 = arith.addf %236, %237 : vector<16x128xf32>
    %cst_92 = arith.constant 0.000000e+00 : f32
    %239 = vector.broadcast %cst_92 : f32 to vector<16x128xf32>
    %240 = arith.maximumf %238, %239 : vector<16x128xf32>
    %cst_93 = arith.constant dense<0.000000e+00> : vector<16x128xf32>
    %241 = tpu.matmul %240, %136, %cst_93 {dimension_numbers = #tpu.dot_dimension_numbers<[1], [0], [0], [1], [0, 0, 1, 1], [], []>} : vector<16x128xf32>, vector<128x128xf32>, vector<16x128xf32> -> vector<16x128xf32>
    %cst_94 = arith.constant dense<0.000000e+00> : vector<16xf32>
    %242 = vector.multi_reduction <add>, %241, %cst_94 [1] : vector<16x128xf32> to vector<16xf32>
    %243 = vector.shape_cast %242 : vector<16xf32> to vector<16x1xf32>
    %cst_95 = arith.constant 1.280000e+02 : f32
    %244 = vector.broadcast %cst_95 : f32 to vector<16x1xf32>
    %245 = arith.divf %243, %244 : vector<16x1xf32>
    %246 = arith.mulf %241, %241 : vector<16x128xf32>
    %cst_96 = arith.constant dense<0.000000e+00> : vector<16xf32>
    %247 = vector.multi_reduction <add>, %246, %cst_96 [1] : vector<16x128xf32> to vector<16xf32>
    %248 = vector.shape_cast %247 : vector<16xf32> to vector<16x1xf32>
    %cst_97 = arith.constant 1.280000e+02 : f32
    %249 = vector.broadcast %cst_97 : f32 to vector<16x1xf32>
    %250 = arith.divf %248, %249 : vector<16x1xf32>
    %251 = arith.mulf %245, %245 : vector<16x1xf32>
    %252 = arith.subf %250, %251 : vector<16x1xf32>
    %cst_98 = arith.constant 0.000000e+00 : f32
    %253 = vector.broadcast %cst_98 : f32 to vector<16x1xf32>
    %254 = arith.maximumf %252, %253 : vector<16x1xf32>
    %255 = vector.broadcast %245 : vector<16x1xf32> to vector<16x128xf32>
    %256 = arith.subf %241, %255 : vector<16x128xf32>
    %cst_99 = arith.constant 9.99999974E-6 : f32
    %257 = vector.broadcast %cst_99 : f32 to vector<16x1xf32>
    %258 = arith.addf %254, %257 : vector<16x1xf32>
    %259 = math.rsqrt %258 : vector<16x1xf32>
    %260 = vector.broadcast %259 : vector<16x1xf32> to vector<16x128xf32>
    %261 = arith.mulf %256, %260 : vector<16x128xf32>
    %262 = vector.broadcast %131 : vector<1x128xf32> to vector<16x128xf32>
    %263 = arith.mulf %261, %262 : vector<16x128xf32>
    %264 = vector.broadcast %132 : vector<1x128xf32> to vector<16x128xf32>
    %265 = arith.addf %263, %264 : vector<16x128xf32>
    %266 = arith.addf %265, %1 : vector<16x128xf32>
    %cst_100 = arith.constant 0.000000e+00 : f32
    %267 = vector.broadcast %cst_100 : f32 to vector<16x128xf32>
    %268 = arith.maximumf %266, %267 : vector<16x128xf32>
    %c1_101 = arith.constant 1 : index
    %c0_102 = arith.constant 0 : index
    %c0_103 = arith.constant 0 : index
    %269 = vector.load %arg10[%c1_101, %c0_102, %c0_103] : memref<2x11x128xf32, #tpu.memory_space<vmem>>, vector<1x11x128xf32>
    %270 = vector.shape_cast %269 : vector<1x11x128xf32> to vector<11x128xf32>
    %271 = vector.extract_strided_slice %270 {offsets = [3, 0], sizes = [1, 128], strides = [1, 1]} : vector<11x128xf32> to vector<1x128xf32>
    %272 = vector.extract_strided_slice %270 {offsets = [4, 0], sizes = [1, 128], strides = [1, 1]} : vector<11x128xf32> to vector<1x128xf32>
    %273 = vector.extract_strided_slice %270 {offsets = [5, 0], sizes = [1, 128], strides = [1, 1]} : vector<11x128xf32> to vector<1x128xf32>
    %274 = vector.extract_strided_slice %270 {offsets = [6, 0], sizes = [1, 128], strides = [1, 1]} : vector<11x128xf32> to vector<1x128xf32>
    %275 = vector.extract_strided_slice %270 {offsets = [7, 0], sizes = [1, 128], strides = [1, 1]} : vector<11x128xf32> to vector<1x128xf32>
    %276 = vector.extract_strided_slice %270 {offsets = [8, 0], sizes = [1, 128], strides = [1, 1]} : vector<11x128xf32> to vector<1x128xf32>
    %277 = vector.extract_strided_slice %270 {offsets = [9, 0], sizes = [1, 128], strides = [1, 1]} : vector<11x128xf32> to vector<1x128xf32>
    %278 = vector.extract_strided_slice %270 {offsets = [10, 0], sizes = [1, 128], strides = [1, 1]} : vector<11x128xf32> to vector<1x128xf32>
    %c1_104 = arith.constant 1 : index
    %c1_105 = arith.constant 1 : index
    %c0_106 = arith.constant 0 : index
    %c0_107 = arith.constant 0 : index
    %279 = vector.load %arg6[%c1_104, %c1_105, %c0_106, %c0_107] : memref<2x3x128x128xf32, #tpu.memory_space<vmem>>, vector<1x1x128x128xf32>
    %280 = vector.shape_cast %279 : vector<1x1x128x128xf32> to vector<128x128xf32>
    %c1_108 = arith.constant 1 : index
    %c2_109 = arith.constant 2 : index
    %c0_110 = arith.constant 0 : index
    %c0_111 = arith.constant 0 : index
    %281 = vector.load %arg6[%c1_108, %c2_109, %c0_110, %c0_111] : memref<2x3x128x128xf32, #tpu.memory_space<vmem>>, vector<1x1x128x128xf32>
    %282 = vector.shape_cast %281 : vector<1x1x128x128xf32> to vector<128x128xf32>
    %c1_112 = arith.constant 1 : index
    %c0_113 = arith.constant 0 : index
    %c0_114 = arith.constant 0 : index
    %283 = vector.load %arg7[%c1_112, %c0_113, %c0_114] : memref<2x128x256xf32, #tpu.memory_space<vmem>>, vector<1x128x256xf32>
    %284 = vector.shape_cast %283 : vector<1x128x256xf32> to vector<128x256xf32>
    %cst_115 = arith.constant dense<0.000000e+00> : vector<16x256xf32>
    %285 = tpu.matmul %268, %284, %cst_115 {dimension_numbers = #tpu.dot_dimension_numbers<[1], [0], [0], [1], [0, 0, 1, 1], [], []>} : vector<16x128xf32>, vector<128x256xf32>, vector<16x256xf32> -> vector<16x256xf32>
    %286 = vector.extract_strided_slice %285 {offsets = [0, 0], sizes = [16, 128], strides = [1, 1]} : vector<16x256xf32> to vector<16x128xf32>
    %cst_116 = arith.constant dense<0.000000e+00> : vector<16xf32>
    %287 = vector.multi_reduction <add>, %286, %cst_116 [1] : vector<16x128xf32> to vector<16xf32>
    %288 = vector.shape_cast %287 : vector<16xf32> to vector<16x1xf32>
    %cst_117 = arith.constant 1.280000e+02 : f32
    %289 = vector.broadcast %cst_117 : f32 to vector<16x1xf32>
    %290 = arith.divf %288, %289 : vector<16x1xf32>
    %291 = arith.mulf %286, %286 : vector<16x128xf32>
    %cst_118 = arith.constant dense<0.000000e+00> : vector<16xf32>
    %292 = vector.multi_reduction <add>, %291, %cst_118 [1] : vector<16x128xf32> to vector<16xf32>
    %293 = vector.shape_cast %292 : vector<16xf32> to vector<16x1xf32>
    %cst_119 = arith.constant 1.280000e+02 : f32
    %294 = vector.broadcast %cst_119 : f32 to vector<16x1xf32>
    %295 = arith.divf %293, %294 : vector<16x1xf32>
    %296 = arith.mulf %290, %290 : vector<16x1xf32>
    %297 = arith.subf %295, %296 : vector<16x1xf32>
    %cst_120 = arith.constant 0.000000e+00 : f32
    %298 = vector.broadcast %cst_120 : f32 to vector<16x1xf32>
    %299 = arith.maximumf %297, %298 : vector<16x1xf32>
    %300 = vector.broadcast %290 : vector<16x1xf32> to vector<16x128xf32>
    %301 = arith.subf %286, %300 : vector<16x128xf32>
    %cst_121 = arith.constant 9.99999974E-6 : f32
    %302 = vector.broadcast %cst_121 : f32 to vector<16x1xf32>
    %303 = arith.addf %299, %302 : vector<16x1xf32>
    %304 = math.rsqrt %303 : vector<16x1xf32>
    %305 = vector.broadcast %304 : vector<16x1xf32> to vector<16x128xf32>
    %306 = arith.mulf %301, %305 : vector<16x128xf32>
    %307 = vector.broadcast %271 : vector<1x128xf32> to vector<16x128xf32>
    %308 = arith.mulf %306, %307 : vector<16x128xf32>
    %309 = vector.broadcast %272 : vector<1x128xf32> to vector<16x128xf32>
    %310 = arith.addf %308, %309 : vector<16x128xf32>
    %cst_122 = arith.constant 0.000000e+00 : f32
    %311 = vector.broadcast %cst_122 : f32 to vector<16x128xf32>
    %312 = arith.maximumf %310, %311 : vector<16x128xf32>
    %313 = vector.extract_strided_slice %285 {offsets = [0, 128], sizes = [16, 128], strides = [1, 1]} : vector<16x256xf32> to vector<16x128xf32>
    %314 = tpu.concatenate %122, %312 in 0 : vector<128x128xf32>, vector<16x128xf32> -> vector<144x128xf32>
    %c1_123 = arith.constant 1 : index
    %c0_124 = arith.constant 0 : index
    %c0_125 = arith.constant 0 : index
    %315 = vector.load %arg8[%c1_123, %c0_124, %c0_125] : memref<2x128x256xf32, #tpu.memory_space<vmem>>, vector<1x128x256xf32>
    %316 = vector.shape_cast %315 : vector<1x128x256xf32> to vector<128x256xf32>
    %cst_126 = arith.constant dense<0.000000e+00> : vector<144x256xf32>
    %317 = tpu.matmul %314, %316, %cst_126 {dimension_numbers = #tpu.dot_dimension_numbers<[1], [0], [0], [1], [0, 0, 1, 1], [], []>} : vector<144x128xf32>, vector<128x256xf32>, vector<144x256xf32> -> vector<144x256xf32>
    %318 = vector.extract_strided_slice %317 {offsets = [0, 0], sizes = [128, 128], strides = [1, 1]} : vector<144x256xf32> to vector<128x128xf32>
    %319 = vector.shape_cast %318 : vector<128x128xf32> to vector<2x8x8x128xf32>
    %320 = vector.extract_strided_slice %317 {offsets = [128, 128], sizes = [16, 128], strides = [1, 1]} : vector<144x256xf32> to vector<16x128xf32>
    %321 = vector.shape_cast %320 : vector<16x128xf32> to vector<2x8x1x128xf32>
    %322 = vector.extract_strided_slice %28 {offsets = [0, 128], sizes = [16, 128], strides = [1, 1]} : vector<16x256xf32> to vector<16x128xf32>
    %323 = vector.shape_cast %322 : vector<16x128xf32> to vector<2x1x8x128xf32>
    %324 = vector.broadcast %321 : vector<2x8x1x128xf32> to vector<2x8x8x128xf32>
    %325 = arith.addf %319, %324 : vector<2x8x8x128xf32>
    %326 = vector.broadcast %323 : vector<2x1x8x128xf32> to vector<2x8x8x128xf32>
    %327 = arith.addf %325, %326 : vector<2x8x8x128xf32>
    %cst_127 = arith.constant dense<0.000000e+00> : vector<2x8x8xf32>
    %328 = vector.multi_reduction <add>, %327, %cst_127 [3] : vector<2x8x8x128xf32> to vector<2x8x8xf32>
    %329 = vector.shape_cast %328 : vector<2x8x8xf32> to vector<2x8x8x1xf32>
    %cst_128 = arith.constant 1.280000e+02 : f32
    %330 = vector.broadcast %cst_128 : f32 to vector<2x8x8x1xf32>
    %331 = arith.divf %329, %330 : vector<2x8x8x1xf32>
    %332 = arith.mulf %327, %327 : vector<2x8x8x128xf32>
    %cst_129 = arith.constant dense<0.000000e+00> : vector<2x8x8xf32>
    %333 = vector.multi_reduction <add>, %332, %cst_129 [3] : vector<2x8x8x128xf32> to vector<2x8x8xf32>
    %334 = vector.shape_cast %333 : vector<2x8x8xf32> to vector<2x8x8x1xf32>
    %cst_130 = arith.constant 1.280000e+02 : f32
    %335 = vector.broadcast %cst_130 : f32 to vector<2x8x8x1xf32>
    %336 = arith.divf %334, %335 : vector<2x8x8x1xf32>
    %337 = arith.mulf %331, %331 : vector<2x8x8x1xf32>
    %338 = arith.subf %336, %337 : vector<2x8x8x1xf32>
    %cst_131 = arith.constant 0.000000e+00 : f32
    %339 = vector.broadcast %cst_131 : f32 to vector<2x8x8x1xf32>
    %340 = arith.maximumf %338, %339 : vector<2x8x8x1xf32>
    %341 = vector.broadcast %331 : vector<2x8x8x1xf32> to vector<2x8x8x128xf32>
    %342 = arith.subf %327, %341 : vector<2x8x8x128xf32>
    %cst_132 = arith.constant 9.99999974E-6 : f32
    %343 = vector.broadcast %cst_132 : f32 to vector<2x8x8x1xf32>
    %344 = arith.addf %340, %343 : vector<2x8x8x1xf32>
    %345 = math.rsqrt %344 : vector<2x8x8x1xf32>
    %346 = vector.broadcast %345 : vector<2x8x8x1xf32> to vector<2x8x8x128xf32>
    %347 = arith.mulf %342, %346 : vector<2x8x8x128xf32>
    %348 = vector.shape_cast %273 : vector<1x128xf32> to vector<1x1x1x128xf32>
    %349 = vector.broadcast %348 : vector<1x1x1x128xf32> to vector<2x8x8x128xf32>
    %350 = arith.mulf %347, %349 : vector<2x8x8x128xf32>
    %351 = vector.shape_cast %274 : vector<1x128xf32> to vector<1x1x1x128xf32>
    %352 = vector.broadcast %351 : vector<1x1x1x128xf32> to vector<2x8x8x128xf32>
    %353 = arith.addf %350, %352 : vector<2x8x8x128xf32>
    %cst_133 = arith.constant 0.000000e+00 : f32
    %354 = vector.broadcast %cst_133 : f32 to vector<2x8x8x128xf32>
    %355 = arith.maximumf %353, %354 : vector<2x8x8x128xf32>
    %356 = arith.mulf %19, %355 : vector<2x8x8x128xf32>
    %cst_134 = arith.constant dense<0.000000e+00> : vector<2x8x128xf32>
    %357 = vector.multi_reduction <add>, %356, %cst_134 [2] : vector<2x8x8x128xf32> to vector<2x8x128xf32>
    %358 = vector.shape_cast %357 : vector<2x8x128xf32> to vector<16x128xf32>
    %cst_135 = arith.constant dense<0.000000e+00> : vector<16x128xf32>
    %359 = tpu.matmul %358, %280, %cst_135 {dimension_numbers = #tpu.dot_dimension_numbers<[1], [0], [0], [1], [0, 0, 1, 1], [], []>} : vector<16x128xf32>, vector<128x128xf32>, vector<16x128xf32> -> vector<16x128xf32>
    %360 = arith.addf %313, %359 : vector<16x128xf32>
    %cst_136 = arith.constant dense<0.000000e+00> : vector<16xf32>
    %361 = vector.multi_reduction <add>, %360, %cst_136 [1] : vector<16x128xf32> to vector<16xf32>
    %362 = vector.shape_cast %361 : vector<16xf32> to vector<16x1xf32>
    %cst_137 = arith.constant 1.280000e+02 : f32
    %363 = vector.broadcast %cst_137 : f32 to vector<16x1xf32>
    %364 = arith.divf %362, %363 : vector<16x1xf32>
    %365 = arith.mulf %360, %360 : vector<16x128xf32>
    %cst_138 = arith.constant dense<0.000000e+00> : vector<16xf32>
    %366 = vector.multi_reduction <add>, %365, %cst_138 [1] : vector<16x128xf32> to vector<16xf32>
    %367 = vector.shape_cast %366 : vector<16xf32> to vector<16x1xf32>
    %cst_139 = arith.constant 1.280000e+02 : f32
    %368 = vector.broadcast %cst_139 : f32 to vector<16x1xf32>
    %369 = arith.divf %367, %368 : vector<16x1xf32>
    %370 = arith.mulf %364, %364 : vector<16x1xf32>
    %371 = arith.subf %369, %370 : vector<16x1xf32>
    %cst_140 = arith.constant 0.000000e+00 : f32
    %372 = vector.broadcast %cst_140 : f32 to vector<16x1xf32>
    %373 = arith.maximumf %371, %372 : vector<16x1xf32>
    %374 = vector.broadcast %364 : vector<16x1xf32> to vector<16x128xf32>
    %375 = arith.subf %360, %374 : vector<16x128xf32>
    %cst_141 = arith.constant 9.99999974E-6 : f32
    %376 = vector.broadcast %cst_141 : f32 to vector<16x1xf32>
    %377 = arith.addf %373, %376 : vector<16x1xf32>
    %378 = math.rsqrt %377 : vector<16x1xf32>
    %379 = vector.broadcast %378 : vector<16x1xf32> to vector<16x128xf32>
    %380 = arith.mulf %375, %379 : vector<16x128xf32>
    %381 = vector.broadcast %275 : vector<1x128xf32> to vector<16x128xf32>
    %382 = arith.mulf %380, %381 : vector<16x128xf32>
    %383 = vector.broadcast %276 : vector<1x128xf32> to vector<16x128xf32>
    %384 = arith.addf %382, %383 : vector<16x128xf32>
    %cst_142 = arith.constant 0.000000e+00 : f32
    %385 = vector.broadcast %cst_142 : f32 to vector<16x128xf32>
    %386 = arith.maximumf %384, %385 : vector<16x128xf32>
    %cst_143 = arith.constant dense<0.000000e+00> : vector<16x128xf32>
    %387 = tpu.matmul %386, %282, %cst_143 {dimension_numbers = #tpu.dot_dimension_numbers<[1], [0], [0], [1], [0, 0, 1, 1], [], []>} : vector<16x128xf32>, vector<128x128xf32>, vector<16x128xf32> -> vector<16x128xf32>
    %cst_144 = arith.constant dense<0.000000e+00> : vector<16xf32>
    %388 = vector.multi_reduction <add>, %387, %cst_144 [1] : vector<16x128xf32> to vector<16xf32>
    %389 = vector.shape_cast %388 : vector<16xf32> to vector<16x1xf32>
    %cst_145 = arith.constant 1.280000e+02 : f32
    %390 = vector.broadcast %cst_145 : f32 to vector<16x1xf32>
    %391 = arith.divf %389, %390 : vector<16x1xf32>
    %392 = arith.mulf %387, %387 : vector<16x128xf32>
    %cst_146 = arith.constant dense<0.000000e+00> : vector<16xf32>
    %393 = vector.multi_reduction <add>, %392, %cst_146 [1] : vector<16x128xf32> to vector<16xf32>
    %394 = vector.shape_cast %393 : vector<16xf32> to vector<16x1xf32>
    %cst_147 = arith.constant 1.280000e+02 : f32
    %395 = vector.broadcast %cst_147 : f32 to vector<16x1xf32>
    %396 = arith.divf %394, %395 : vector<16x1xf32>
    %397 = arith.mulf %391, %391 : vector<16x1xf32>
    %398 = arith.subf %396, %397 : vector<16x1xf32>
    %cst_148 = arith.constant 0.000000e+00 : f32
    %399 = vector.broadcast %cst_148 : f32 to vector<16x1xf32>
    %400 = arith.maximumf %398, %399 : vector<16x1xf32>
    %401 = vector.broadcast %391 : vector<16x1xf32> to vector<16x128xf32>
    %402 = arith.subf %387, %401 : vector<16x128xf32>
    %cst_149 = arith.constant 9.99999974E-6 : f32
    %403 = vector.broadcast %cst_149 : f32 to vector<16x1xf32>
    %404 = arith.addf %400, %403 : vector<16x1xf32>
    %405 = math.rsqrt %404 : vector<16x1xf32>
    %406 = vector.broadcast %405 : vector<16x1xf32> to vector<16x128xf32>
    %407 = arith.mulf %402, %406 : vector<16x128xf32>
    %408 = vector.broadcast %277 : vector<1x128xf32> to vector<16x128xf32>
    %409 = arith.mulf %407, %408 : vector<16x128xf32>
    %410 = vector.broadcast %278 : vector<1x128xf32> to vector<16x128xf32>
    %411 = arith.addf %409, %410 : vector<16x128xf32>
    %412 = arith.addf %411, %268 : vector<16x128xf32>
    %cst_150 = arith.constant 0.000000e+00 : f32
    %413 = vector.broadcast %cst_150 : f32 to vector<16x128xf32>
    %414 = arith.maximumf %412, %413 : vector<16x128xf32>
    %415 = vector.shape_cast %414 : vector<16x128xf32> to vector<2x8x128xf32>
    %c0_151 = arith.constant 0 : index
    %c0_152 = arith.constant 0 : index
    %c0_153 = arith.constant 0 : index
    %416 = vector.load %arg11[%c0_151, %c0_152, %c0_153] : memref<2x8x128xf32, #tpu.memory_space<vmem>>, vector<2x8x128xf32>
    tpu.vector_store %arg11[%c0_151, %c0_152, %c0_153], %415 {strides = array<i32>} : memref<2x8x128xf32, #tpu.memory_space<vmem>>, vector<2x8x128xf32>,
    return
  }
  func.func @transform_0(%arg0: i32) -> (i32, i32, i32) {
    %c0_i32 = arith.constant 0 : i32
    %c0_i32_0 = arith.constant 0 : i32
    %c0_i32_1 = arith.constant 0 : i32
    return %arg0, %c0_i32, %c0_i32_0 : i32, i32, i32
  }
  func.func @transform_1(%arg0: i32) -> (i32, i32, i32) {
    %c0_i32 = arith.constant 0 : i32
    %c0_i32_0 = arith.constant 0 : i32
    %c0_i32_1 = arith.constant 0 : i32
    return %arg0, %c0_i32, %c0_i32_0 : i32, i32, i32
  }
  func.func @transform_2(%arg0: i32) -> (i32, i32, i32) {
    %c0_i32 = arith.constant 0 : i32
    %c0_i32_0 = arith.constant 0 : i32
    %c0_i32_1 = arith.constant 0 : i32
    return %arg0, %c0_i32, %c0_i32_0 : i32, i32, i32
  }
  func.func @transform_3(%arg0: i32) -> (i32, i32, i32) {
    %c0_i32 = arith.constant 0 : i32
    %c0_i32_0 = arith.constant 0 : i32
    %c0_i32_1 = arith.constant 0 : i32
    return %arg0, %c0_i32, %c0_i32_0 : i32, i32, i32
  }
  func.func @transform_4(%arg0: i32) -> (i32, i32, i32) {
    %c0_i32 = arith.constant 0 : i32
    %c0_i32_0 = arith.constant 0 : i32
    %c0_i32_1 = arith.constant 0 : i32
    %c0_i32_2 = arith.constant 0 : i32
    return %c0_i32, %c0_i32_0, %c0_i32_1 : i32, i32, i32
  }
  func.func @transform_5(%arg0: i32) -> (i32, i32, i32, i32) {
    %c0_i32 = arith.constant 0 : i32
    %c0_i32_0 = arith.constant 0 : i32
    %c0_i32_1 = arith.constant 0 : i32
    %c0_i32_2 = arith.constant 0 : i32
    %c0_i32_3 = arith.constant 0 : i32
    return %c0_i32, %c0_i32_0, %c0_i32_1, %c0_i32_2 : i32, i32, i32, i32
  }
  func.func @transform_6(%arg0: i32) -> (i32, i32, i32) {
    %c0_i32 = arith.constant 0 : i32
    %c0_i32_0 = arith.constant 0 : i32
    %c0_i32_1 = arith.constant 0 : i32
    %c0_i32_2 = arith.constant 0 : i32
    return %c0_i32, %c0_i32_0, %c0_i32_1 : i32, i32, i32
  }
  func.func @transform_7(%arg0: i32) -> (i32, i32, i32) {
    %c0_i32 = arith.constant 0 : i32
    %c0_i32_0 = arith.constant 0 : i32
    %c0_i32_1 = arith.constant 0 : i32
    %c0_i32_2 = arith.constant 0 : i32
    return %c0_i32, %c0_i32_0, %c0_i32_1 : i32, i32, i32
  }
  func.func @transform_8(%arg0: i32) -> (i32, i32) {
    %c0_i32 = arith.constant 0 : i32
    %c0_i32_0 = arith.constant 0 : i32
    %c0_i32_1 = arith.constant 0 : i32
    return %c0_i32, %c0_i32_0 : i32, i32
  }
  func.func @transform_9(%arg0: i32) -> (i32, i32, i32) {
    %c0_i32 = arith.constant 0 : i32
    %c0_i32_0 = arith.constant 0 : i32
    %c0_i32_1 = arith.constant 0 : i32
    %c0_i32_2 = arith.constant 0 : i32
    return %c0_i32, %c0_i32_0, %c0_i32_1 : i32, i32, i32
  }
  func.func @transform_10(%arg0: i32) -> (i32, i32, i32) {
    %c0_i32 = arith.constant 0 : i32
    %c0_i32_0 = arith.constant 0 : i32
    %c0_i32_1 = arith.constant 0 : i32
    return %arg0, %c0_i32, %c0_i32_0 : i32, i32, i32
  }
}

</mosaic_0001>

<bundles_post_ra>
// kernel: tpu_custom_call.1
= control target key start
LH: loop header
LB: loop body
LE: loop exit
PB: predicated region body
PF: predicated region fallthrough
CT: control target
= control target key end

     0   :  { %15 = vsyncpa [#allocation3], 0  ;;  %s6803_s0 = inlined_call_operand.vmem [shape: f32[2,8,128], index: 0, kind: input, shape index: {}]   ;;  %s6804_s1 = inlined_call_operand.vmem [shape: f32[2,8,2], index: 1, kind: input, shape index: {}]   ;;  %s6805_s2 = inlined_call_operand.vmem [shape: f32[2,8,128], index: 2, kind: input, shape index: {}]   ;;  %s6806_s3 = inlined_call_operand.vmem [shape: f32[2,8,2], index: 3, kind: input, shape index: {}]   ;;  %s6807_s4 = inlined_call_operand.vmem [shape: f32[2,2,128], index: 4, kind: input, shape index: {}]   ;;  %s6808_s5 = inlined_call_operand.hbm [shape: f32[2,3,128,128], index: 5, kind: input, shape index: {}]   ;;  %s6809_s6 = inlined_call_operand.hbm [shape: f32[2,128,256], index: 6, kind: input, shape index: {}]   ;;  %s6810_s7 = inlined_call_operand.hbm [shape: f32[2,128,256], index: 7, kind: input, shape index: {}]   ;;  %s6811_s8 = inlined_call_operand.hbm [shape: f32[128,256], index: 8, kind: input, shape index: {}]   ;;  %s6812_s9 = inlined_call_operand.vmem [shape: f32[2,11,128], index: 9, kind: input, shape index: {}]   ;;  %s6813_s10 = inlined_call_operand.hbm [shape: f32[2,8,128], index: 10, kind: output, shape index: {}]  }
   0x1   :  { %16 = vsyncpa [#allocation6], 0 }
   0x2   :  { %17 = vsyncpa [#allocation9], 0 }
   0x3   :  { %18 = vsyncpa [#allocation4], 0  ;;  %s4952_s13 = smov [#allocation5]  }
   0x4   :  { %s46_s14 = sshll.u32 %s4952_s13, 4  ;;  %s47_s14 = int_to_ptr.vmem [resolvable:$true] %s46_s14 }
   0x5   :  { %s4852_s15 = scalar_lea.vmem %s47_s14, 8192  ;;  %p4857_p1 = scmp.lt.s32.totalorder %s47_s14, %s47_s14 }
   0x6   :  { %p4853_p0 = scmp.ne.s32.totalorder %s47_s14, %s4852_s15  ;;  %p4858_p2 = scmp.lt.s32.totalorder %s4852_s15, %s4852_s15 }
   0x8   :  { %p4859_p3 = por %p4858_p2, %p4857_p1 }
   0xa   :  { %p4860_p4 = pnand %p4859_p3, %p4853_p0 }
   0xc   :  { %4863 = shalt.err (!%p4860_p4)
}
   0xd   :  { %s4953_s16 = smov 256   ;;  %s4954_s17 = smov 16  }
   0xe   :  { %52 = dma.hbm_to_vmem [thread:$0]  %s6809_s6, 8192, %s47_s14, [#allocation6], %s4953_s16, %s4953_s16, %s4954_s17  }
   0xf   :  { %s4955_s20 = smov [#allocation2]  }
  0x10   :  { %s34_s21 = sshll.u32 %s4955_s20, 4  ;;  %s35_s21 = int_to_ptr.vmem [resolvable:$true] %s34_s21 }
  0x11   :  { %s4872_s22 = scalar_lea.vmem %s35_s21, 12288  ;;  %p4877_p6 = scmp.lt.s32.totalorder %s35_s21, %s35_s21 }
  0x12   :  { %p4873_p5 = scmp.ne.s32.totalorder %s35_s21, %s4872_s22  ;;  %p4878_p7 = scmp.lt.s32.totalorder %s4872_s22, %s4872_s22 }
  0x14   :  { %p4879_p8 = por %p4878_p7, %p4877_p6 }
  0x16   :  { %p4880_p9 = pnand %p4879_p8, %p4873_p5 }
  0x18   :  { %4883 = shalt.err (!%p4880_p9)
}
  0x19   :  { %s4956_s23 = smov 128   ;;  %s4957_s24 = smov 8  }
  0x1a   :  { %40 = dma.hbm_to_vmem [thread:$0]  %s6808_s5, 12288, %s35_s21, [#allocation3], %s4956_s23, %s4956_s23, %s4957_s24  }
  0x1b   :  { %s4958_s6 = smov [#allocation7]   ;;  %s4959_s28 = smov [#allocation8]  }
  0x1c   :  { %s58_s27 = sshll.u32 %s4958_s6, 4  ;;  %s70_s29 = sshll.u32 %s4959_s28, 4  ;;  %s59_s27 = int_to_ptr.vmem [resolvable:$true] %s58_s27  ;;  %s71_s29 = int_to_ptr.vmem [resolvable:$true] %s70_s29 }
  0x1d   :  { %s4892_s30 = scalar_lea.vmem %s59_s27, 8192  ;;  %p4897_p11 = scmp.lt.s32.totalorder %s59_s27, %s59_s27 }
  0x1e   :  { %p4893_p10 = scmp.ne.s32.totalorder %s59_s27, %s4892_s30  ;;  %p4898_p12 = scmp.lt.s32.totalorder %s4892_s30, %s4892_s30 }
  0x20   :  { %p4899_p13 = por %p4898_p12, %p4897_p11 }
  0x22   :  { %p4900_p0 = pnand %p4899_p13, %p4893_p10 }
  0x24   :  { %4903 = shalt.err (!%p4900_p0)
}
  0x25   :  { %64 = dma.hbm_to_vmem [thread:$0]  %s6810_s7, 8192, %s59_s27, [#allocation6], %s4953_s16, %s4953_s16, %s4954_s17  }
  0x26   :  { %s4912_s5 = scalar_lea.vmem %s71_s29, 4096  ;;  %p4917_p2 = scmp.lt.s32.totalorder %s71_s29, %s71_s29 }
  0x27   :  { %p4913_p1 = scmp.ne.s32.totalorder %s71_s29, %s4912_s5  ;;  %p4918_p3 = scmp.lt.s32.totalorder %s4912_s5, %s4912_s5 }
  0x29   :  { %p4919_p4 = por %p4918_p3, %p4917_p2 }
  0x2b   :  { %p4920_p5 = pnand %p4919_p4, %p4913_p1 }
  0x2d   :  { %4923 = shalt.err (!%p4920_p5)
}
  0x2e   :  { %76 = dma.hbm_to_vmem [thread:$0]  %s6811_s8, 4096, %s71_s29, [#allocation9], %s4953_s16, %s4953_s16, %s4954_s17  }
  0x2f   :  { %4944 = dma.done.wait [#allocation3], 12288  }
  0x30   :  { %4945 = vsyncadd [#allocation3], 4294955008 }
  0x31   :  { %4946 = dma.done.wait [#allocation6], 16384  }
  0x32   :  { %4947 = vsyncadd [#allocation6], 4294950912 }
  0x33   :  { %4948 = dma.done.wait [#allocation9], 4096  }
  0x34   :  { %4949 = vsyncadd [#allocation9], 4294963200  ;;  %v105_v0 = vlaneseq  ;;  %v4960_v1 = vmov 0   ;;  %v4961_v2 = vmov 1966171168   ;;  %v6814_v5 = vmov 0.0  }
  0x35   :  { %4679 = vset.pattern.permute.xlu0 %v4960_v1  ;;  %v103_v3 = vunpack.c.l.s4 %v4961_v2  ;;  %4681 = vset.pattern.permute.xlu1 %v4960_v1  ;;  %v95_v8 = vld [vmem:[%s6804_s1] sm:$0xff]  ;;  %v583_v11 = vld [vmem:[#allocation8 + $0xf8] sm:$0xff]  ;;  %v582_v12 = vld [vmem:[#allocation8 + $0xf0] sm:$0xff]  ;;  %v4963_v36 = vmov 1   ;;  %vm311_vm0 = vcmask 15360   ;;  %vm2729_vm7 = vcmask 1041409  }
  0x36   :  { %v5046_v4 = vshrl.u32 %v105_v0, 7  ;;  %648 = vmatprep.mubr.f32.mxu0 %v6814_v5  ;;  %584 = vmatprep.subr.mxu0 %v583_v11  ;;  %v581_v13 = vld [vmem:[#allocation8 + $0xe8] sm:$0xff]  ;;  %v580_v14 = vld [vmem:[#allocation8 + $0xe0] sm:$0xff]  ;;  %v579_v17 = vld [vmem:[#allocation8 + $0xd8] sm:$0xff]  ;;  %v101_v22 = vcombine.high %v95_v8, %v95_v8 }
  0x37   :  { %v104_v6 = vunpack.c.0.s8 %v103_v3  ;;  %585 = vmatpush1.msra.mxu0 %v582_v12  ;;  %v5063_v18 = vld [vmem:[%s6806_s3] sm:$0xff]  ;;  %v578_v19 = vld [vmem:[#allocation8 + $0xd0] sm:$0xff]  ;;  %v577_v23 = vld [vmem:[#allocation8 + $0xc8] sm:$0xff] }
  0x38   :  { %v5057_v10 = vsub.s32 0, %v5046_v4  ;;  %586 = vmatprep.subr.mxu0 %v581_v13  ;;  %v576_v27 = vld [vmem:[#allocation8 + $0xc0] sm:$0xff]  ;;  %v575_v30 = vld [vmem:[#allocation8 + $0xb8] sm:$0xff]  ;;  %v574_v33 = vld [vmem:[#allocation8 + $0xb0] sm:$0xff] }
  0x39   :  { %v5050_v7 = vsub.s32 %v104_v6, %v5046_v4  ;;  %587 = vmatpush1.msra.mxu0 %v580_v14  ;;  %v573_v34 = vld [vmem:[#allocation8 + $0xa8] sm:$0xff]  ;;  %v572_v35 = vld [vmem:[#allocation8 + $0xa0] sm:$0xff]  ;;  %v571_v38 = vld [vmem:[#allocation8 + $0x98] sm:$0xff] }
  0x3a   :  { %588 = vmatprep.subr.mxu0 %v579_v17  ;;  %v570_v42 = vld [vmem:[#allocation8 + $0x90] sm:$0xff]  ;;  %v771_v43 = vld [vmem:[#allocation2 + $0x78] sm:$0xff]  ;;  %v569_v44 = vld [vmem:[#allocation8 + $0x88] sm:$0xff] }
  0x3b   :  { %6847 = vst [vmem:[#allocation15_spill] sm:$0xff] %v5050_v7  ;;  %v108_v9 = vrot.slane %v95_v8, %v5050_v7  ;;  %589 = vmatpush1.msra.mxu0 %v578_v19  ;;  %v115_v29 = vrot.slane %v101_v22, %v5050_v7  ;;  %v568_v45 = vld [vmem:[#allocation8 + $0x80] sm:$0xff]  ;;  %v567_v46 = vld [vmem:[#allocation8 + $0x78] sm:$0xff]  ;;  %4414 = vmatprep.subr.mxu1 %v771_v43  ;;  %v566_v50 = vld [vmem:[#allocation8 + $0x70] sm:$0xff] }
  0x3c   :  { %590 = vmatprep.subr.mxu0 %v577_v23  ;;  %v565_v51 = vld [vmem:[#allocation8 + $0x68] sm:$0xff]  ;;  %4415 = vmatpush3.msra.mxu1 %v771_v43  ;;  %v564_v52 = vld [vmem:[#allocation8 + $0x60] sm:$0xff]  ;;  %v770_v53 = vld [vmem:[#allocation2 + $0x70] sm:$0xff] }
  0x3d   :  { %v124_v15 = vrot.slane %v108_v9, %v5050_v7  ;;  %v116_v16 = vcombine.high %v108_v9, %v108_v9  ;;  %591 = vmatpush1.msra.mxu0 %v576_v27  ;;  %v131_v37 = vrot.slane %v115_v29, %v5050_v7  ;;  %v117_v41 = vcombine.high %v115_v29, %v115_v29  ;;  %v563_v54 = vld [vmem:[#allocation8 + $0x58] sm:$0xff]  ;;  %v5101_v58 = vld [vmem:[%s6804_s1 + $0x8] sm:$0xff]  ;;  %v562_v59 = vld [vmem:[#allocation8 + $0x50] sm:$0xff] }
  0x3e   :  { %592 = vmatprep.subr.mxu0 %v575_v30  ;;  %v561_v60 = vld [vmem:[#allocation8 + $0x48] sm:$0xff]  ;;  %4416 = vmatprep.subr.mxu1 %v770_v53  ;;  %v560_v61 = vld [vmem:[#allocation8 + $0x40] sm:$0xff]  ;;  %v157_v63 = vrot.slane %v5101_v58, %v5050_v7  ;;  %v559_v0 = vld [vmem:[#allocation8 + $0x38] sm:$0xff] }
  0x3f   :  { %v202_v20 = vrot.slane %v124_v15, %v5057_v10  ;;  %v138_v21 = vrot.slane %v116_v16, %v5050_v7  ;;  %v146_v24 = vcombine.high %v124_v15, %v124_v15  ;;  %593 = vmatpush1.msra.mxu0 %v574_v33  ;;  %v218_v48 = vrot.slane %v131_v37, %v5057_v10  ;;  %v769_v62 = vld [vmem:[#allocation2 + $0x68] sm:$0xff]  ;;  %v558_v6 = vld [vmem:[#allocation8 + $0x30] sm:$0xff]  ;;  %v556_v9 = vld [vmem:[#allocation8 + $0x20] sm:$0xff] }
  0x40   :  { %594 = vmatprep.subr.mxu0 %v573_v34  ;;  %v145_v49 = vrot.slane %v117_v41, %v5050_v7  ;;  %v147_v57 = vcombine.high %v131_v37, %v131_v37  ;;  %4417 = vmatpush3.msra.mxu1 %v770_v53  ;;  %v557_v8 = vld [vmem:[#allocation8 + $0x28] sm:$0xff]  ;;  %v768_v11 = vld [vmem:[#allocation2 + $0x60] sm:$0xff]  ;;  %v173_v12 = vrot.slane %v157_v63, %v5050_v7  ;;  %v555_v13 = vld [vmem:[#allocation8 + $0x18] sm:$0xff] }
  0x41   :  { %v5068_v25 = vsub.f32 %v202_v20, %v5063_v18  ;;  %v206_v26 = vrot.slane %v138_v21, %v5057_v10  ;;  %v210_v31 = vrot.slane %v146_v24, %v5057_v10  ;;  %v148_v32 = vcombine.high %v138_v21, %v138_v21  ;;  %595 = vmatpush1.msra.mxu0 %v572_v35  ;;  %v554_v17 = vld [vmem:[#allocation8 + $0x10] sm:$0xff]  ;;  %v553_v19 = vld [vmem:[#allocation8 + $0x8] sm:$0xff]  ;;  %v552_v20 = vld [vmem:[#allocation8] sm:$0xff] }
  0x42   :  { %596 = vmatprep.subr.mxu0 %v571_v38  ;;  %v5095_v55 = vsub.f32 %v218_v48, %v5063_v18  ;;  %v222_v56 = vrot.slane %v145_v49, %v5057_v10  ;;  %v226_v2 = vrot.slane %v147_v57, %v5057_v10  ;;  %v149_v3 = vcombine.high %v145_v49, %v145_v49  ;;  %v767_v21 = vld [vmem:[#allocation2 + $0x58] sm:$0xff]  ;;  %v93_v23 = vld [vmem:[%s6805_s2] sm:$0xff]  ;;  %v5131_v29 = vld [vmem:[%s6806_s3 + $0x8] sm:$0xff] }
  0x43   :  { %410 = vperm.xlu0 %4679, %v5068_v25   ;;  %v5073_v28 = vsub.f32 %v206_v26, %v5063_v18  ;;  %v5081_v39 = vsub.f32 %v210_v31, %v5063_v18  ;;  %v214_v40 = vrot.slane %v148_v32, %v5057_v10  ;;  %597 = vmatpush1.msra.mxu0 %v570_v42  ;;  %v1311_v22 = vld [vmem:[#allocation2 + $0x1f8] sm:$0xff]  ;;  %v1310_v30 = vld [vmem:[#allocation2 + $0x1f0] sm:$0xff]  ;;  %v1309_v31 = vld [vmem:[#allocation2 + $0x1e8] sm:$0xff] }
  0x44   :  { %598 = vmatprep.subr.mxu0 %v569_v44  ;;  %4418 = vmatprep.subr.mxu1 %v769_v62  ;;  %v5115_v14 = vsub.f32 %v226_v2, %v5063_v18  ;;  %v230_v15 = vrot.slane %v149_v3, %v5057_v10  ;;  %v165_v16 = vcombine.high %v157_v63, %v157_v63  ;;  %v766_v32 = vld [vmem:[#allocation2 + $0x50] sm:$0xff]  ;;  %v1307_v38 = vld [vmem:[#allocation2 + $0x1d8] sm:$0xff]  ;;  %v764_v48 = vld [vmem:[#allocation2 + $0x40] sm:$0xff] }
  0x45   :  { %415 = vperm.xlu1 %4681, %v5073_v28   ;;  %v5087_v47 = vsub.f32 %v214_v40, %v5063_v18  ;;  %599 = vmatpush1.msra.mxu0 %v568_v45  ;;  %v234_v26 = vrot.slane %v173_v12, %v5057_v10  ;;  %v195_v35 = vcombine.high %v173_v12, %v173_v12  ;;  %v765_v40 = vld [vmem:[#allocation2 + $0x48] sm:$0xff]  ;;  %v1306_v44 = vld [vmem:[#allocation2 + $0x1d0] sm:$0xff]  ;;  %v763_v53 = vld [vmem:[#allocation2 + $0x38] sm:$0xff] }
  0x46   :  { %600 = vmatprep.subr.mxu0 %v567_v46  ;;  %4419 = vmatpush3.msra.mxu1 %v769_v62  ;;  %v5124_v24 = vsub.f32 %v230_v15, %v5063_v18  ;;  %v187_v27 = vrot.slane %v165_v16, %v5050_v7  ;;  %v1305_v46 = vld [vmem:[#allocation2 + $0x1c8] sm:$0xff]  ;;  %v760_v3 = vld [vmem:[#allocation2 + $0x20] sm:$0xff]  ;;  %v759_v12 = vld [vmem:[#allocation2 + $0x18] sm:$0xff] }
  0x47   :  { %4680 = vset.pattern.permute.xlu0 %v4963_v36  ;;  %601 = vmatpush1.msra.mxu0 %v566_v50  ;;  %v5138_v33 = vsub.f32 %v234_v26, %v5131_v29  ;;  %v242_v42 = vrot.slane %v195_v35, %v5057_v10  ;;  %v1301_v2 = vld [vmem:[#allocation2 + $0x1a8] sm:$0xff]  ;;  %v756_v26 = vld [vmem:[#allocation2] sm:$0xff] }
  0x48   :  { %489 = vperm.xlu0 %4680, %v5068_v25   ;;  %602 = vmatprep.subr.mxu0 %v565_v51  ;;  %v238_v34 = vrot.slane %v187_v27, %v5057_v10  ;;  %v197_v43 = vcombine.high %v187_v27, %v187_v27  ;;  %v1296_v27 = vld [vmem:[#allocation2 + $0x180] sm:$0xff] }
  0x49   :  { %4682 = vset.pattern.permute.xlu1 %v4963_v36  ;;  %603 = vmatpush1.msra.mxu0 %v564_v52  ;;  %v1308_v36 = vld [vmem:[#allocation2 + $0x1e0] sm:$0xff]  ;;  %v5152_v49 = vsub.f32 %v242_v42, %v5131_v29 }
  0x4a   :  { %493 = vperm.xlu1 %4682, %v5073_v28   ;;  %604 = vmatprep.subr.mxu0 %v563_v54  ;;  %v5145_v41 = vsub.f32 %v238_v34, %v5131_v29  ;;  %v246_v50 = vrot.slane %v197_v43, %v5057_v10  ;;  %v1304_v52 = vld [vmem:[#allocation2 + $0x1c0] sm:$0xff]  ;;  %v1303_v54 = vld [vmem:[#allocation2 + $0x1b8] sm:$0xff] }
  0x4b   :  { %605 = vmatpush1.msra.mxu0 %v562_v59  ;;  %4420 = vmatprep.subr.mxu1 %v768_v11  ;;  %v762_v59 = vld [vmem:[#allocation2 + $0x30] sm:$0xff]  ;;  %v5219_v42 = vld [vmem:[%s6812_s9] sm:$0xff] }
  0x4c   :  { %497 = vperm.xlu0 %4680, %v5081_v39   ;;  %606 = vmatprep.subr.mxu0 %v561_v60  ;;  %v1302_v60 = vld [vmem:[#allocation2 + $0x1b0] sm:$0xff] }
  0x4d   :  { %607 = vmatpush1.msra.mxu0 %v560_v61  ;;  %4421 = vmatpush3.msra.mxu1 %v768_v11 }
  0x4e   :  { %4683 = vset.pattern.permute.xlu1 %v4960_v1  ;;  %v5108_v1 = vsub.f32 %v222_v56, %v5063_v18  ;;  %608 = vmatprep.subr.mxu0 %v559_v0  ;;  %v150_v18 = vcombine.high %v5101_v58, %v5101_v58  ;;  %v5158_v56 = vsub.f32 %v246_v50, %v5131_v29  ;;  %v761_v0 = vld [vmem:[#allocation2 + $0x28] sm:$0xff] }
  0x4f   :  { %420 = vperm.xlu1 %4683, %v5081_v39   ;;  %609 = vmatpush1.msra.mxu0 %v558_v6  ;;  %v1300_v6 = vld [vmem:[#allocation2 + $0x1a0] sm:$0xff] }
  0x50   :  { %501 = vperm.xlu0 %4680, %v5087_v47   ;;  %610 = vmatprep.subr.mxu0 %v557_v8  ;;  %v164_v37 = vrot.slane %v150_v18, %v5050_v7  ;;  %v661_v18 = vld [vmem:[%s6807_s4] sm:$0x3] }
  0x51   :  { %611 = vmatpush1.msra.mxu0 %v556_v9  ;;  %4422 = vmatprep.subr.mxu1 %v767_v21  ;;  %v5202_v34 = vrot.slane %v661_v18, %v5057_v10 }
  0x52   :  { %612 = vmatprep.subr.mxu0 %v555_v13  ;;  %4423 = vmatpush3.msra.mxu1 %v767_v21  ;;  %v180_v45 = vrot.slane %v164_v37, %v5050_v7  ;;  %v166_v51 = vcombine.high %v164_v37, %v164_v37  ;;  %v1299_v13 = vld [vmem:[#allocation2 + $0x198] sm:$0xff] }
  0x53   :  { %425 = vperm.xlu1 %4683, %v5087_v47   ;;  %613 = vmatpush1.msra.mxu0 %v554_v17  ;;  %v758_v17 = vld [vmem:[#allocation2 + $0x10] sm:$0xff] }
  0x54   :  { %505 = vperm.xlu0 %4680, %v5095_v55   ;;  %614 = vmatprep.subr.mxu0 %v553_v19  ;;  %v250_v57 = vrot.slane %v180_v45, %v5057_v10  ;;  %v194_v58 = vrot.slane %v166_v51, %v5050_v7  ;;  %v196_v63 = vcombine.high %v180_v45, %v180_v45  ;;  %v1298_v19 = vld [vmem:[#allocation2 + $0x190] sm:$0xff] }
  0x55   :  { %615 = vmatpush1.msra.mxu0 %v552_v20  ;;  %4424 = vmatprep.subr.mxu1 %v766_v32  ;;  %v757_v20 = vld [vmem:[#allocation2 + $0x8] sm:$0xff] }
  0x56   :  { %4470 = vmatprep.subr.mxu0 %v1311_v22  ;;  %649 = vmatmul.mubr.f32.vlgmr.msra.gmra.mxu0 %v93_v23  ;;  %v5165_v61 = vsub.f32 %v250_v57, %v5131_v29  ;;  %v254_v62 = vrot.slane %v194_v58, %v5057_v10  ;;  %v258_v9 = vrot.slane %v196_v63, %v5057_v10  ;;  %v1297_v23 = vld [vmem:[#allocation2 + $0x188] sm:$0xff] }
  0x57   :  { %430 = vperm.xlu1 %4683, %v5095_v55   ;;  %4471 = vmatpush3.msra.mxu0 %v1311_v22  ;;  %v198_v11 = vcombine.high %v194_v58, %v194_v58  ;;  %v94_v22 = vld [vmem:[%s6805_s2 + $0x8] sm:$0xff] }
  0x58   :  { %509 = vperm.xlu0 %4680, %v5108_v1   ;;  %4472 = vmatprep.subr.mxu0 %v1310_v30  ;;  %v5171_v8 = vsub.f32 %v254_v62, %v5131_v29  ;;  %v5177_v15 = vsub.f32 %v258_v9, %v5131_v29 }
  0x59   :  { %4473 = vmatpush3.msra.mxu0 %v1310_v30  ;;  %4425 = vmatpush3.msra.mxu1 %v766_v32  ;;  %v262_v16 = vrot.slane %v198_v11, %v5057_v10  ;;  %v5193_v30 = vsub.s32 1, %v5046_v4 }
  0x5a   :  { %4474 = vmatprep.subr.mxu0 %v1309_v31  ;;  %4426 = vmatprep.subr.mxu1 %v765_v40 }
  0x5b   :  { %435 = vperm.xlu1 %4683, %v5108_v1   ;;  %4475 = vmatpush3.msra.mxu0 %v1309_v31  ;;  %v5183_v21 = vsub.f32 %v262_v16, %v5131_v29  ;;  %v1802_v29 = vld [vmem:[#allocation5 + $0xf8] sm:$0xff]  ;;  %6848 = vst [vmem:[#allocation16_spill] sm:$0xff] %v5193_v30  ;;  %v4275_v31 = vld [vmem:[%s6807_s4 + $0x2] sm:$0x3]  ;;  %v5208_v37 = vrot.slane %v661_v18, %v5193_v30 }
  0x5c   :  { %513 = vperm.xlu0 %4680, %v5115_v14   ;;  %4476 = vmatprep.subr.mxu0 %v1308_v36  ;;  %v5205_v35 = vrot.slane %v4275_v31, %v5057_v10 }
  0x5d   :  { %4477 = vmatpush3.msra.mxu0 %v1308_v36  ;;  %4427 = vmatpush3.msra.mxu1 %v765_v40  ;;  %v4276_v40 = vld [vmem:[%s6812_s9 + $0x10] sm:$0xff] }
  0x5e   :  { %4478 = vmatprep.subr.mxu0 %v1307_v38  ;;  %4428 = vmatprep.subr.mxu1 %v764_v48 }
  0x5f   :  { %440 = vperm.xlu1 %4683, %v5115_v14   ;;  %4479 = vmatpush3.msra.mxu0 %v1307_v38  ;;  %v5211_v38 = vrot.slane %v4275_v31, %v5193_v30  ;;  %v1800_v31 = vld [vmem:[#allocation5 + $0xe8] sm:$0xff] }
  0x60   :  { %517 = vperm.xlu0 %4680, %v5124_v24   ;;  %4480 = vmatprep.subr.mxu0 %v1306_v44 }
  0x61   :  { %4481 = vmatpush3.msra.mxu0 %v1306_v44  ;;  %4429 = vmatpush3.msra.mxu1 %v764_v48 }
  0x62   :  { %4482 = vmatprep.subr.mxu0 %v1305_v46  ;;  %4430 = vmatprep.subr.mxu1 %v763_v53 }
  0x63   :  { %445 = vperm.xlu1 %4683, %v5124_v24   ;;  %4483 = vmatpush3.msra.mxu0 %v1305_v46 }
  0x64   :  { %521 = vperm.xlu0 %4680, %v5138_v33   ;;  %4484 = vmatprep.subr.mxu0 %v1304_v52 }
  0x65   :  { %4485 = vmatpush3.msra.mxu0 %v1304_v52  ;;  %4431 = vmatpush3.msra.mxu1 %v763_v53  ;;  %v5228_v52 = vrot.slane %v4276_v40, %v5057_v10 }
  0x66   :  { %4486 = vmatprep.subr.mxu0 %v1303_v54  ;;  %4432 = vmatprep.subr.mxu1 %v762_v59 }
  0x67   :  { %450 = vperm.xlu1 %4683, %v5138_v33   ;;  %4487 = vmatpush3.msra.mxu0 %v1303_v54  ;;  %v5232_v54 = vrot.slane %v5219_v42, %v5057_v10 }
  0x68   :  { %525 = vperm.xlu0 %4680, %v5145_v41   ;;  %4488 = vmatprep.subr.mxu0 %v1302_v60 }
  0x69   :  { %4433 = vmatpush3.msra.mxu1 %v762_v59  ;;  %4489 = vmatpush3.msra.mxu0 %v1302_v60 }
  0x6a   :  { %4434 = vmatprep.subr.mxu1 %v761_v0  ;;  %4490 = vmatprep.subr.mxu0 %v1301_v2 }
  0x6b   :  { %455 = vperm.xlu1 %4683, %v5145_v41   ;;  %4435 = vmatpush3.msra.mxu1 %v761_v0 }
  0x6c   :  { %529 = vperm.xlu0 %4680, %v5152_v49   ;;  %4491 = vmatpush3.msra.mxu0 %v1301_v2 }
  0x6d   :  { %4436 = vmatprep.subr.mxu1 %v760_v3  ;;  %4492 = vmatprep.subr.mxu0 %v1300_v6 }
  0x6e   :  { %4437 = vmatpush3.msra.mxu1 %v760_v3  ;;  %4493 = vmatpush3.msra.mxu0 %v1300_v6 }
  0x6f   :  { %460 = vperm.xlu1 %4683, %v5152_v49   ;;  %4438 = vmatprep.subr.mxu1 %v759_v12 }
  0x70   :  { %533 = vperm.xlu0 %4680, %v5158_v56   ;;  %4494 = vmatprep.subr.mxu0 %v1299_v13 }
  0x71   :  { %4439 = vmatpush3.msra.mxu1 %v759_v12  ;;  %4495 = vmatpush3.msra.mxu0 %v1299_v13 }
  0x72   :  { %4440 = vmatprep.subr.mxu1 %v758_v17  ;;  %4496 = vmatprep.subr.mxu0 %v1298_v19 }
  0x73   :  { %465 = vperm.xlu1 %4683, %v5158_v56   ;;  %654 = vmatprep.mubr.f32.mxu0 %v6814_v5 }
  0x74   :  { %537 = vperm.xlu0 %4680, %v5165_v61   ;;  %4441 = vmatpush3.msra.mxu1 %v758_v17 }
  0x75   :  { %4497 = vmatpush3.msra.mxu0 %v1298_v19  ;;  %4442 = vmatprep.subr.mxu1 %v757_v20 }
  0x76   :  { %655 = vmatmul.mubr.f32.gmra.mxu0 %v94_v22  ;;  %4498 = vmatprep.subr.mxu0 %v1297_v23 }
  0x77   :  { %470 = vperm.xlu1 %4683, %v5165_v61   ;;  %4443 = vmatpush3.msra.mxu1 %v757_v20 }
  0x78   :  { %541 = vperm.xlu0 %4680, %v5171_v8   ;;  %4499 = vmatpush3.msra.mxu0 %v1297_v23 }
  0x79   :  { %4444 = vmatprep.subr.mxu1 %v756_v26  ;;  %4500 = vmatprep.subr.mxu0 %v1296_v27 }
  0x7a   :  { %4445 = vmatpush3.msra.mxu1 %v756_v26  ;;  %4501 = vmatpush3.msra.mxu0 %v1296_v27  ;;  %v1801_v27 = vld [vmem:[#allocation5 + $0xf0] sm:$0xff] }
  0x7b   :  { %475 = vperm.xlu1 %4683, %v5171_v8   ;;  %1803 = vmatprep.subr.mxu1 %v1802_v29 }
  0x7c   :  { %545 = vperm.xlu0 %4680, %v5177_v15  }
  0x7f   :  { %480 = vperm.xlu1 %4683, %v5177_v15  }
  0x80   :  { %549 = vperm.xlu0 %4680, %v5183_v21  }
  0x83   :  { %485 = vperm.xlu1 %4683, %v5183_v21  }
  0xbe   :  { %v411_v32 = vpop.permute.xlu0 %410 }
  0xbf   :  { %v668_v44 = vmul.f32 %v5202_v34, %v411_v32  ;;  %v1207_v45 = vmul.f32 %v5205_v35, %v411_v32 }
  0xc0   :  { %v416_v36 = vpop.permute.xlu1 %415 }
  0xc1   :  { %v669_v50 = vmul.f32 %v5202_v34, %v416_v36  ;;  %v1208_v51 = vmul.f32 %v5205_v35, %v416_v36 }
  0xc3   :  { %v490_v43 = vpop.permute.xlu0 %489 }
  0xc4   :  { %v688_v46 = vmul.f32 %v5208_v37, %v490_v43  ;;  %v1227_v48 = vmul.f32 %v5211_v38, %v490_v43  ;;  %v1799_v43 = vld [vmem:[#allocation5 + $0xe0] sm:$0xff] }
  0xc5   :  { %v494_v53 = vpop.permute.xlu1 %493 }
  0xc6   :  { %v1243_v57 = vadd.f32 %v1227_v48, %v1207_v45  ;;  %v689_v58 = vmul.f32 %v5208_v37, %v494_v53  ;;  %v1228_v59 = vmul.f32 %v5211_v38, %v494_v53  ;;  %v704_v60 = vadd.f32 %v688_v46, %v668_v44 }
  0xc7   :  { %v498_v62 = vpop.permute.xlu0 %497 }
  0xc8   :  { %v705_v63 = vadd.f32 %v689_v58, %v669_v50  ;;  %v1244_v0 = vadd.f32 %v1228_v59, %v1208_v51  ;;  %v724_v2 = vadd.f32 %v5232_v54, %v704_v60  ;;  %v1263_v3 = vadd.f32 %v5228_v52, %v1243_v57  ;;  %v1798_v51 = vld [vmem:[#allocation5 + $0xd8] sm:$0xff]  ;;  %v1797_v60 = vld [vmem:[#allocation5 + $0xd0] sm:$0xff] }
  0xc9   :  { %v690_v9 = vmul.f32 %v5208_v37, %v498_v62  ;;  %v1229_v11 = vmul.f32 %v5211_v38, %v498_v62 }
  0xca   :  { %v1264_v6 = vadd.f32 %v5228_v52, %v1244_v0  ;;  %v421_v12 = vpop.permute.xlu1 %420  ;;  %v725_v13 = vadd.f32 %v5232_v54, %v705_v63  ;;  %v740_v20 = vmax.f32 %v724_v2, 0.0  ;;  %v1279_v22 = vmax.f32 %v1263_v3, 0.0  ;;  %v1796_v2 = vld [vmem:[#allocation5 + $0xc8] sm:$0xff] }
  0xcb   :  { %v670_v16 = vmul.f32 %v5202_v34, %v421_v12  ;;  %v1209_v17 = vmul.f32 %v5205_v35, %v421_v12  ;;  %v502_v19 = vpop.permute.xlu0 %501  ;;  %v1795_v12 = vld [vmem:[#allocation5 + $0xc0] sm:$0xff] }
  0xcc   :  { %v1280_v23 = vmax.f32 %v1264_v6, 0.0  ;;  %v741_v26 = vmax.f32 %v725_v13, 0.0  ;;  %4446 = vmatprep.mubr.f32.mxu1 %v740_v20  ;;  %4502 = vmatprep.mubr.f32.mxu0 %v1279_v22  ;;  %v691_v32 = vmul.f32 %v5208_v37, %v502_v19  ;;  %v1230_v36 = vmul.f32 %v5211_v38, %v502_v19  ;;  %v1794_v20 = vld [vmem:[#allocation5 + $0xb8] sm:$0xff] }
  0xcd   :  { %v706_v29 = vadd.f32 %v690_v9, %v670_v16  ;;  %v1245_v18 = vadd.f32 %v1229_v11, %v1209_v17 }
  0xce   :  { %4447 = vmatmul.mubr.f32.vlgmr.msra.gmra.mxu1 %v741_v26  ;;  %v426_v40 = vpop.permute.xlu1 %425  ;;  %4503 = vmatmul.mubr.f32.vlgmr.msra.gmra.mxu0 %v1280_v23 }
  0xcf   :  { %v671_v44 = vmul.f32 %v5202_v34, %v426_v40  ;;  %v1210_v45 = vmul.f32 %v5205_v35, %v426_v40  ;;  %v506_v46 = vpop.permute.xlu0 %505  ;;  %v726_v48 = vadd.f32 %v5232_v54, %v706_v29  ;;  %v1265_v50 = vadd.f32 %v5228_v52, %v1245_v18  ;;  %1804 = vmatpush1.msra.mxu1 %v1801_v27  ;;  %v1793_v29 = vld [vmem:[#allocation5 + $0xb0] sm:$0xff] }
  0xd0   :  { %1805 = vmatprep.subr.mxu1 %v1800_v31  ;;  %v692_v62 = vmul.f32 %v5208_v37, %v506_v46  ;;  %v1231_v63 = vmul.f32 %v5211_v38, %v506_v46 }
  0xd1   :  { %v707_v53 = vadd.f32 %v691_v32, %v671_v44  ;;  %v1246_v57 = vadd.f32 %v1230_v36, %v1210_v45  ;;  %v742_v58 = vmax.f32 %v726_v48, 0.0  ;;  %v1281_v59 = vmax.f32 %v1265_v50, 0.0  ;;  %1806 = vmatpush1.msra.mxu1 %v1799_v43  ;;  %v1792_v43 = vld [vmem:[#allocation5 + $0xa8] sm:$0xff]  ;;  %v1791_v50 = vld [vmem:[#allocation5 + $0xa0] sm:$0xff] }
  0xd2   :  { %v431_v0 = vpop.permute.xlu1 %430  ;;  %1807 = vmatprep.subr.mxu1 %v1798_v51 }
  0xd3   :  { %v672_v3 = vmul.f32 %v5202_v34, %v431_v0  ;;  %v1211_v6 = vmul.f32 %v5205_v35, %v431_v0  ;;  %4449 = vmatprep.mubr.f32.mxu1 %v742_v58  ;;  %v510_v9 = vpop.permute.xlu0 %509  ;;  %4505 = vmatprep.mubr.f32.mxu0 %v1281_v59  ;;  %v727_v11 = vadd.f32 %v5232_v54, %v707_v53  ;;  %v1790_v58 = vld [vmem:[#allocation5 + $0x98] sm:$0xff]  ;;  %v1789_v0 = vld [vmem:[#allocation5 + $0x90] sm:$0xff] }
  0xd4   :  { %v1266_v13 = vadd.f32 %v5228_v52, %v1246_v57  ;;  %1808 = vmatpush1.msra.mxu1 %v1797_v60  ;;  %v693_v22 = vmul.f32 %v5208_v37, %v510_v9  ;;  %v1232_v23 = vmul.f32 %v5211_v38, %v510_v9 }
  0xd5   :  { %v708_v16 = vadd.f32 %v692_v62, %v672_v3  ;;  %v1247_v17 = vadd.f32 %v1231_v63, %v1211_v6  ;;  %v743_v19 = vmax.f32 %v727_v11, 0.0  ;;  %1809 = vmatprep.subr.mxu1 %v1796_v2  ;;  %v1788_v11 = vld [vmem:[#allocation5 + $0x88] sm:$0xff] }
  0xd6   :  { %v436_v26 = vpop.permute.xlu1 %435  ;;  %v1282_v27 = vmax.f32 %v1266_v13, 0.0  ;;  %1810 = vmatpush1.msra.mxu1 %v1795_v12 }
  0xd7   :  { %v673_v18 = vmul.f32 %v5202_v34, %v436_v26  ;;  %v1212_v31 = vmul.f32 %v5205_v35, %v436_v26  ;;  %4450 = vmatmul.mubr.f32.gmra.mxu1 %v743_v19  ;;  %v514_v32 = vpop.permute.xlu0 %513  ;;  %v728_v36 = vadd.f32 %v5232_v54, %v708_v16  ;;  %v1267_v40 = vadd.f32 %v5228_v52, %v1247_v17  ;;  %v1787_v19 = vld [vmem:[#allocation5 + $0x80] sm:$0xff] }
  0xd8   :  { %4506 = vmatmul.mubr.f32.gmra.mxu0 %v1282_v27  ;;  %1811 = vmatprep.subr.mxu1 %v1794_v20  ;;  %v694_v51 = vmul.f32 %v5208_v37, %v514_v32  ;;  %v1233_v53 = vmul.f32 %v5211_v38, %v514_v32 }
  0xd9   :  { %v709_v44 = vadd.f32 %v693_v22, %v673_v18  ;;  %v1248_v45 = vadd.f32 %v1232_v23, %v1212_v31  ;;  %v744_v46 = vmax.f32 %v728_v36, 0.0  ;;  %v1283_v48 = vmax.f32 %v1267_v40, 0.0  ;;  %1812 = vmatpush1.msra.mxu1 %v1793_v29  ;;  %v1786_v29 = vld [vmem:[#allocation5 + $0x78] sm:$0xff]  ;;  %v1785_v40 = vld [vmem:[#allocation5 + $0x70] sm:$0xff] }
  0xda   :  { %v441_v57 = vpop.permute.xlu1 %440  ;;  %1813 = vmatprep.subr.mxu1 %v1792_v43 }
  0xdb   :  { %v674_v59 = vmul.f32 %v5202_v34, %v441_v57  ;;  %v1213_v60 = vmul.f32 %v5205_v35, %v441_v57  ;;  %4452 = vmatprep.mubr.f32.mxu1 %v744_v46  ;;  %v518_v62 = vpop.permute.xlu0 %517  ;;  %4508 = vmatprep.mubr.f32.mxu0 %v1283_v48  ;;  %v729_v63 = vadd.f32 %v5232_v54, %v709_v44  ;;  %v1784_v46 = vld [vmem:[#allocation5 + $0x68] sm:$0xff]  ;;  %v1783_v57 = vld [vmem:[#allocation5 + $0x60] sm:$0xff] }
  0xdc   :  { %v1268_v2 = vadd.f32 %v5228_v52, %v1248_v45  ;;  %1814 = vmatpush1.msra.mxu1 %v1791_v50  ;;  %v695_v12 = vmul.f32 %v5208_v37, %v518_v62  ;;  %v1234_v13 = vmul.f32 %v5211_v38, %v518_v62 }
  0xdd   :  { %v710_v3 = vadd.f32 %v694_v51, %v674_v59  ;;  %v1249_v6 = vadd.f32 %v1233_v53, %v1213_v60  ;;  %v745_v9 = vmax.f32 %v729_v63, 0.0  ;;  %1815 = vmatprep.subr.mxu1 %v1790_v58  ;;  %v1782_v63 = vld [vmem:[#allocation5 + $0x58] sm:$0xff] }
  0xde   :  { %v446_v16 = vpop.permute.xlu1 %445  ;;  %v1284_v17 = vmax.f32 %v1268_v2, 0.0  ;;  %1816 = vmatpush1.msra.mxu1 %v1789_v0 }
  0xdf   :  { %v675_v20 = vmul.f32 %v5202_v34, %v446_v16  ;;  %v1214_v22 = vmul.f32 %v5205_v35, %v446_v16  ;;  %4453 = vmatmul.mubr.f32.gmra.mxu1 %v745_v9  ;;  %v522_v23 = vpop.permute.xlu0 %521  ;;  %v730_v26 = vadd.f32 %v5232_v54, %v710_v3  ;;  %v1269_v27 = vadd.f32 %v5228_v52, %v1249_v6  ;;  %v1781_v9 = vld [vmem:[#allocation5 + $0x50] sm:$0xff] }
  0xe0   :  { %4509 = vmatmul.mubr.f32.gmra.mxu0 %v1284_v17  ;;  %1817 = vmatprep.subr.mxu1 %v1788_v11  ;;  %v696_v43 = vmul.f32 %v5208_v37, %v522_v23  ;;  %v1235_v44 = vmul.f32 %v5211_v38, %v522_v23 }
  0xe1   :  { %v711_v18 = vadd.f32 %v695_v12, %v675_v20  ;;  %v1250_v31 = vadd.f32 %v1234_v13, %v1214_v22  ;;  %v746_v32 = vmax.f32 %v730_v26, 0.0  ;;  %v1285_v36 = vmax.f32 %v1269_v27, 0.0  ;;  %1818 = vmatpush1.msra.mxu1 %v1787_v19  ;;  %v1780_v19 = vld [vmem:[#allocation5 + $0x48] sm:$0xff]  ;;  %v1779_v27 = vld [vmem:[#allocation5 + $0x40] sm:$0xff] }
  0xe2   :  { %v451_v45 = vpop.permute.xlu1 %450  ;;  %1819 = vmatprep.subr.mxu1 %v1786_v29 }
  0xe3   :  { %v676_v48 = vmul.f32 %v5202_v34, %v451_v45  ;;  %v1215_v50 = vmul.f32 %v5205_v35, %v451_v45  ;;  %4455 = vmatprep.mubr.f32.mxu1 %v746_v32  ;;  %v526_v51 = vpop.permute.xlu0 %525  ;;  %4511 = vmatprep.mubr.f32.mxu0 %v1285_v36  ;;  %v731_v53 = vadd.f32 %v5232_v54, %v711_v18  ;;  %v1778_v32 = vld [vmem:[#allocation5 + $0x38] sm:$0xff]  ;;  %v1777_v45 = vld [vmem:[#allocation5 + $0x30] sm:$0xff] }
  0xe4   :  { %v1270_v58 = vadd.f32 %v5228_v52, %v1250_v31  ;;  %1820 = vmatpush1.msra.mxu1 %v1785_v40  ;;  %v697_v0 = vmul.f32 %v5208_v37, %v526_v51  ;;  %v1236_v2 = vmul.f32 %v5211_v38, %v526_v51 }
  0xe5   :  { %v712_v59 = vadd.f32 %v696_v43, %v676_v48  ;;  %v1251_v60 = vadd.f32 %v1235_v44, %v1215_v50  ;;  %v747_v62 = vmax.f32 %v731_v53, 0.0  ;;  %1821 = vmatprep.subr.mxu1 %v1784_v46  ;;  %v1776_v53 = vld [vmem:[#allocation5 + $0x28] sm:$0xff] }
  0xe6   :  { %v456_v3 = vpop.permute.xlu1 %455  ;;  %v1286_v6 = vmax.f32 %v1270_v58, 0.0  ;;  %1822 = vmatpush1.msra.mxu1 %v1783_v57 }
  0xe7   :  { %v677_v11 = vmul.f32 %v5202_v34, %v456_v3  ;;  %v1216_v12 = vmul.f32 %v5205_v35, %v456_v3  ;;  %v530_v13 = vpop.permute.xlu0 %529  ;;  %4456 = vmatmul.mubr.f32.gmra.mxu1 %v747_v62  ;;  %v732_v16 = vadd.f32 %v5232_v54, %v712_v59  ;;  %v1271_v17 = vadd.f32 %v5228_v52, %v1251_v60  ;;  %v1775_v62 = vld [vmem:[#allocation5 + $0x20] sm:$0xff] }
  0xe8   :  { %4512 = vmatmul.mubr.f32.gmra.mxu0 %v1286_v6  ;;  %1823 = vmatprep.subr.mxu1 %v1782_v63  ;;  %v698_v29 = vmul.f32 %v5208_v37, %v530_v13  ;;  %v1237_v18 = vmul.f32 %v5211_v38, %v530_v13 }
  0xe9   :  { %v713_v20 = vadd.f32 %v697_v0, %v677_v11  ;;  %v1252_v22 = vadd.f32 %v1236_v2, %v1216_v12  ;;  %v748_v23 = vmax.f32 %v732_v16, 0.0  ;;  %v1287_v26 = vmax.f32 %v1271_v17, 0.0  ;;  %1824 = vmatpush1.msra.mxu1 %v1781_v9  ;;  %v1774_v9 = vld [vmem:[#allocation5 + $0x18] sm:$0xff]  ;;  %v1773_v17 = vld [vmem:[#allocation5 + $0x10] sm:$0xff] }
  0xea   :  { %v461_v31 = vpop.permute.xlu1 %460  ;;  %1825 = vmatprep.subr.mxu1 %v1780_v19 }
  0xeb   :  { %v678_v36 = vmul.f32 %v5202_v34, %v461_v31  ;;  %v1217_v40 = vmul.f32 %v5205_v35, %v461_v31  ;;  %v534_v43 = vpop.permute.xlu0 %533  ;;  %4458 = vmatprep.mubr.f32.mxu1 %v748_v23  ;;  %4514 = vmatprep.mubr.f32.mxu0 %v1287_v26  ;;  %v733_v44 = vadd.f32 %v5232_v54, %v713_v20  ;;  %v1772_v23 = vld [vmem:[#allocation5 + $0x8] sm:$0xff]  ;;  %v1771_v31 = vld [vmem:[#allocation5] sm:$0xff] }
  0xec   :  { %v1272_v46 = vadd.f32 %v5228_v52, %v1252_v22  ;;  %1826 = vmatpush1.msra.mxu1 %v1779_v27  ;;  %v699_v57 = vmul.f32 %v5208_v37, %v534_v43  ;;  %v1238_v58 = vmul.f32 %v5211_v38, %v534_v43 }
  0xed   :  { %v714_v48 = vadd.f32 %v698_v29, %v678_v36  ;;  %v1253_v50 = vadd.f32 %v1237_v18, %v1217_v40  ;;  %v749_v51 = vmax.f32 %v733_v44, 0.0  ;;  %1827 = vmatprep.subr.mxu1 %v1778_v32 }
  0xee   :  { %v466_v59 = vpop.permute.xlu1 %465  ;;  %v1288_v60 = vmax.f32 %v1272_v46, 0.0  ;;  %1828 = vmatpush1.msra.mxu1 %v1777_v45 }
  0xef   :  { %v679_v63 = vmul.f32 %v5202_v34, %v466_v59  ;;  %v1218_v0 = vmul.f32 %v5205_v35, %v466_v59  ;;  %v538_v2 = vpop.permute.xlu0 %537  ;;  %4459 = vmatmul.mubr.f32.gmra.mxu1 %v749_v51  ;;  %v734_v3 = vadd.f32 %v5232_v54, %v714_v48  ;;  %v1273_v6 = vadd.f32 %v5228_v52, %v1253_v50 }
  0xf0   :  { %4515 = vmatmul.mubr.f32.gmra.mxu0 %v1288_v60  ;;  %1829 = vmatprep.subr.mxu1 %v1776_v53  ;;  %v700_v19 = vmul.f32 %v5208_v37, %v538_v2  ;;  %v1239_v20 = vmul.f32 %v5211_v38, %v538_v2 }
  0xf1   :  { %v715_v11 = vadd.f32 %v699_v57, %v679_v63  ;;  %v1254_v12 = vadd.f32 %v1238_v58, %v1218_v0  ;;  %v750_v13 = vmax.f32 %v734_v3, 0.0  ;;  %v1289_v16 = vmax.f32 %v1273_v6, 0.0  ;;  %1830 = vmatpush1.msra.mxu1 %v1775_v62 }
  0xf2   :  { %v471_v22 = vpop.permute.xlu1 %470  ;;  %1831 = vmatprep.subr.mxu1 %v1774_v9 }
  0xf3   :  { %v680_v26 = vmul.f32 %v5202_v34, %v471_v22  ;;  %v1219_v27 = vmul.f32 %v5205_v35, %v471_v22  ;;  %v542_v29 = vpop.permute.xlu0 %541  ;;  %4461 = vmatprep.mubr.f32.mxu1 %v750_v13  ;;  %4517 = vmatprep.mubr.f32.mxu0 %v1289_v16  ;;  %v735_v18 = vadd.f32 %v5232_v54, %v715_v11 }
  0xf4   :  { %v1274_v32 = vadd.f32 %v5228_v52, %v1254_v12  ;;  %1832 = vmatpush1.msra.mxu1 %v1773_v17  ;;  %v701_v44 = vmul.f32 %v5208_v37, %v542_v29  ;;  %v1240_v45 = vmul.f32 %v5211_v38, %v542_v29 }
  0xf5   :  { %v716_v36 = vadd.f32 %v700_v19, %v680_v26  ;;  %v1255_v40 = vadd.f32 %v1239_v20, %v1219_v27  ;;  %v751_v43 = vmax.f32 %v735_v18, 0.0  ;;  %1833 = vmatprep.subr.mxu1 %v1772_v23 }
  0xf6   :  { %v476_v46 = vpop.permute.xlu1 %475  ;;  %v1290_v48 = vmax.f32 %v1274_v32, 0.0  ;;  %1834 = vmatpush1.msra.mxu1 %v1771_v31 }
  0xf7   :  { %v681_v50 = vmul.f32 %v5202_v34, %v476_v46  ;;  %v1220_v51 = vmul.f32 %v5205_v35, %v476_v46  ;;  %v546_v53 = vpop.permute.xlu0 %545  ;;  %4462 = vmatmul.mubr.f32.gmra.mxu1 %v751_v43  ;;  %v736_v57 = vadd.f32 %v5232_v54, %v716_v36  ;;  %v1275_v58 = vadd.f32 %v5228_v52, %v1255_v40 }
  0xf8   :  { %4518 = vmatmul.mubr.f32.gmra.mxu0 %v1290_v48  ;;  %v702_v0 = vmul.f32 %v5208_v37, %v546_v53  ;;  %v1241_v2 = vmul.f32 %v5211_v38, %v546_v53 }
  0xf9   :  { %v717_v59 = vadd.f32 %v701_v44, %v681_v50  ;;  %v1256_v60 = vadd.f32 %v1240_v45, %v1220_v51  ;;  %v752_v62 = vmax.f32 %v736_v57, 0.0  ;;  %v1291_v63 = vmax.f32 %v1275_v58, 0.0  ;;  %v1953_v57 = vld [vmem:[#allocation7 + $0xf8] sm:$0xff]  ;;  %v1952_v58 = vld [vmem:[#allocation7 + $0xf0] sm:$0xff] }
  0xfa   :  { %v481_v3 = vpop.permute.xlu1 %480  ;;  %1954 = vmatprep.subr.mxu0 %v1953_v57  ;;  %v1927_v57 = vld [vmem:[#allocation7 + $0x28] sm:$0xff] }
  0xfb   :  { %v682_v6 = vmul.f32 %v5202_v34, %v481_v3  ;;  %v1221_v9 = vmul.f32 %v5205_v35, %v481_v3  ;;  %v550_v11 = vpop.permute.xlu0 %549  ;;  %4464 = vmatprep.mubr.f32.mxu1 %v752_v62  ;;  %4520 = vmatprep.mubr.f32.mxu0 %v1291_v63  ;;  %v737_v12 = vadd.f32 %v5232_v54, %v717_v59  ;;  %v1951_v59 = vld [vmem:[#allocation7 + $0xe8] sm:$0xff]  ;;  %v1950_v62 = vld [vmem:[#allocation7 + $0xe0] sm:$0xff] }
  0xfc   :  { %v1276_v13 = vadd.f32 %v5228_v52, %v1256_v60  ;;  %v703_v20 = vmul.f32 %v5208_v37, %v550_v11  ;;  %v1242_v22 = vmul.f32 %v5211_v38, %v550_v11  ;;  %1955 = vmatpush1.msra.mxu0 %v1952_v58  ;;  %v1946_v11 = vld [vmem:[#allocation7 + $0xc0] sm:$0xff] }
  0xfd   :  { %v718_v16 = vadd.f32 %v702_v0, %v682_v6  ;;  %v1257_v17 = vadd.f32 %v1241_v2, %v1221_v9  ;;  %v753_v19 = vmax.f32 %v737_v12, 0.0  ;;  %1956 = vmatprep.subr.mxu0 %v1951_v59  ;;  %v1949_v0 = vld [vmem:[#allocation7 + $0xd8] sm:$0xff]  ;;  %v1948_v2 = vld [vmem:[#allocation7 + $0xd0] sm:$0xff]  ;;  %v1947_v6 = vld [vmem:[#allocation7 + $0xc8] sm:$0xff] }
  0xfe   :  { %v486_v23 = vpop.permute.xlu1 %485  ;;  %v1292_v26 = vmax.f32 %v1276_v13, 0.0  ;;  %1957 = vmatpush1.msra.mxu0 %v1950_v62  ;;  %v1945_v12 = vld [vmem:[#allocation7 + $0xb8] sm:$0xff]  ;;  %v1944_v13 = vld [vmem:[#allocation7 + $0xb0] sm:$0xff]  ;;  %v1926_v59 = vld [vmem:[#allocation7 + $0x20] sm:$0xff] }
  0xff   :  { %v683_v27 = vmul.f32 %v5202_v34, %v486_v23  ;;  %v1222_v29 = vmul.f32 %v5205_v35, %v486_v23  ;;  %4465 = vmatmul.mubr.f32.gmra.mxu1 %v753_v19  ;;  %v738_v18 = vadd.f32 %v5232_v54, %v718_v16  ;;  %v1277_v31 = vadd.f32 %v5228_v52, %v1257_v17  ;;  %v91_v35 = vld [vmem:[%s6803_s0] sm:$0xff]  ;;  %v1943_v16 = vld [vmem:[#allocation7 + $0xa8] sm:$0xff]  ;;  %v1940_v23 = vld [vmem:[#allocation7 + $0x90] sm:$0xff] }
 0x100   :  { %4521 = vmatmul.mubr.f32.gmra.mxu0 %v1292_v26  ;;  %1958 = vmatprep.subr.mxu0 %v1949_v0  ;;  %v1942_v19 = vld [vmem:[#allocation7 + $0xa0] sm:$0xff]  ;;  %v1925_v62 = vld [vmem:[#allocation7 + $0x18] sm:$0xff]  ;;  %v1924_v0 = vld [vmem:[#allocation7 + $0x10] sm:$0xff] }
 0x101   :  { %v719_v32 = vadd.f32 %v703_v20, %v683_v27  ;;  %v1258_v36 = vadd.f32 %v1242_v22, %v1222_v29  ;;  %v754_v40 = vmax.f32 %v738_v18, 0.0  ;;  %v1293_v43 = vmax.f32 %v1277_v31, 0.0  ;;  %1959 = vmatpush1.msra.mxu0 %v1948_v2  ;;  %v1941_v22 = vld [vmem:[#allocation7 + $0x98] sm:$0xff]  ;;  %v1939_v27 = vld [vmem:[#allocation7 + $0x88] sm:$0xff]  ;;  %v1938_v18 = vld [vmem:[#allocation7 + $0x80] sm:$0xff] }
 0x102   :  { %1960 = vmatprep.subr.mxu0 %v1947_v6  ;;  %v1937_v31 = vld [vmem:[#allocation7 + $0x78] sm:$0xff]  ;;  %v1923_v6 = vld [vmem:[#allocation7 + $0x8] sm:$0xff] }
 0x103   :  { %4467 = vmatprep.mubr.f32.mxu1 %v754_v40  ;;  %4523 = vmatprep.mubr.f32.mxu0 %v1293_v43  ;;  %v739_v37 = vadd.f32 %v5232_v54, %v719_v32  ;;  %v1278_v38 = vadd.f32 %v5228_v52, %v1258_v36  ;;  %v92_v54 = vld [vmem:[%s6803_s0 + $0x8] sm:$0xff]  ;;  %v1936_v32 = vld [vmem:[#allocation7 + $0x70] sm:$0xff]  ;;  %v1934_v43 = vld [vmem:[#allocation7 + $0x60] sm:$0xff] }
 0x104   :  { %1961 = vmatpush1.msra.mxu0 %v1946_v11  ;;  %v1935_v36 = vld [vmem:[#allocation7 + $0x68] sm:$0xff]  ;;  %v1922_v11 = vld [vmem:[#allocation7] sm:$0xff] }
 0x105   :  { %v755_v44 = vmax.f32 %v739_v37, 0.0  ;;  %v1294_v34 = vmax.f32 %v1278_v38, 0.0  ;;  %1962 = vmatprep.subr.mxu0 %v1945_v12  ;;  %v1933_v38 = vld [vmem:[#allocation7 + $0x58] sm:$0xff] }
 0x106   :  { %1963 = vmatpush1.msra.mxu0 %v1944_v13 }
 0x107   :  { %4468 = vmatmul.mubr.f32.gmra.mxu1 %v755_v44  ;;  %4524 = vmatmul.mubr.f32.gmra.mxu0 %v1294_v34  ;;  %v1932_v44 = vld [vmem:[#allocation7 + $0x50] sm:$0xff] }
 0x108   :  { %1867 = vmatprep.mubr.f32.mxu1 %v6814_v5  ;;  %2018 = vmatprep.mubr.f32.mxu0 %v6814_v5 }
 0x109   :  { %1964 = vmatprep.subr.mxu0 %v1943_v16 }
 0x10a   :  { %1965 = vmatpush1.msra.mxu0 %v1942_v19 }
 0x10b   :  { %1868 = vmatmul.mubr.f32.vlgmr.msra.gmra.mxu1 %v91_v35  ;;  %1966 = vmatprep.subr.mxu0 %v1941_v22  ;;  %v1931_v35 = vld [vmem:[#allocation7 + $0x48] sm:$0xff] }
 0x10c   :  { %1873 = vmatprep.mubr.f32.mxu1 %v6814_v5  ;;  %1967 = vmatpush1.msra.mxu0 %v1940_v23 }
 0x10d   :  { %1968 = vmatprep.subr.mxu0 %v1939_v27 }
 0x10e   :  { %1969 = vmatpush1.msra.mxu0 %v1938_v18 }
 0x10f   :  { %1874 = vmatmul.mubr.f32.gmra.mxu1 %v92_v54  ;;  %1970 = vmatprep.subr.mxu0 %v1937_v31 }
 0x110   :  { %1971 = vmatpush1.msra.mxu0 %v1936_v32 }
 0x111   :  { %1972 = vmatprep.subr.mxu0 %v1935_v36 }
 0x112   :  { %1973 = vmatpush1.msra.mxu0 %v1934_v43 }
 0x113   :  { %1974 = vmatprep.subr.mxu0 %v1933_v38 }
 0x114   :  { %1975 = vmatpush1.msra.mxu0 %v1932_v44 }
 0x115   :  { %1976 = vmatprep.subr.mxu0 %v1931_v35 }
 0x18e   :  { %v5333_v52 = vpop.f32.mrf.mxu1 }
 0x18f   :  { %v967_v48 = vmul.f32 %v5333_v52, %v5333_v52 }
 0x190   :  { %v5335_v45 = vpop.f32.mrf.mxu1 }
 0x191   :  { %917 = vadd.xlane.f32.xlu1 %v5335_v45  ;;  %v966_v46 = vmul.f32 %v5335_v45, %v5335_v45 }
 0x193   :  { %982 = vadd.xlane.f32.xlu0 %v966_v46  ;;  %v1930_v46 = vld [vmem:[#allocation7 + $0x40] sm:$0xff] }
 0x194   :  { %1977 = vmatpush1.msra.mxu0 %v1930_v46 }
 0x195   :  { %984 = vadd.xlane.f32.xlu1 %v967_v48  ;;  %v1929_v48 = vld [vmem:[#allocation7 + $0x38] sm:$0xff] }
 0x196   :  { %1978 = vmatprep.subr.mxu0 %v1929_v48 }
 0x197   :  { %v5342_v50 = vpop.f32.mrf.mxu1  ;;  %919 = vadd.xlane.f32.xlu0 %v5333_v52 }
 0x198   :  { %v969_v60 = vmul.f32 %v5342_v50, %v5342_v50 }
 0x199   :  { %v5345_v51 = vpop.f32.mrf.mxu1 }
 0x19a   :  { %v968_v53 = vmul.f32 %v5345_v51, %v5345_v51 }
 0x19b   :  { %921 = vadd.xlane.f32.xlu0 %v5345_v51 }
 0x19c   :  { %986 = vadd.xlane.f32.xlu1 %v968_v53  ;;  %v1928_v53 = vld [vmem:[#allocation7 + $0x30] sm:$0xff] }
 0x19d   :  { %1979 = vmatpush1.msra.mxu0 %v1928_v53 }
 0x19e   :  { %1980 = vmatprep.subr.mxu0 %v1927_v57 }
 0x19f   :  { %v5352_v63 = vpop.f32.mrf.mxu1  ;;  %923 = vadd.xlane.f32.xlu0 %v5342_v50  ;;  %1981 = vmatpush1.msra.mxu0 %v1926_v59 }
 0x1a0   :  { %988 = vadd.xlane.f32.xlu1 %v969_v60  ;;  %v971_v17 = vmul.f32 %v5352_v63, %v5352_v63  ;;  %1982 = vmatprep.subr.mxu0 %v1925_v62 }
 0x1a1   :  { %v5355_v3 = vpop.f32.mrf.mxu1  ;;  %1983 = vmatpush1.msra.mxu0 %v1924_v0 }
 0x1a2   :  { %v970_v9 = vmul.f32 %v5355_v3, %v5355_v3  ;;  %1984 = vmatprep.subr.mxu0 %v1923_v6 }
 0x1a3   :  { %925 = vadd.xlane.f32.xlu0 %v5355_v3  ;;  %1985 = vmatpush1.msra.mxu0 %v1922_v11 }
 0x1a4   :  { %990 = vadd.xlane.f32.xlu1 %v970_v9 }
 0x1a7   :  { %927 = vadd.xlane.f32.xlu0 %v5352_v63  ;;  %v5363_v20 = vpop.f32.mrf.mxu1 }
 0x1a8   :  { %992 = vadd.xlane.f32.xlu1 %v971_v17  ;;  %v973_v40 = vmul.f32 %v5363_v20, %v5363_v20 }
 0x1a9   :  { %v5365_v26 = vpop.f32.mrf.mxu1 }
 0x1aa   :  { %v972_v29 = vmul.f32 %v5365_v26, %v5365_v26 }
 0x1ab   :  { %929 = vadd.xlane.f32.xlu0 %v5365_v26 }
 0x1ac   :  { %994 = vadd.xlane.f32.xlu1 %v972_v29 }
 0x1af   :  { %931 = vadd.xlane.f32.xlu0 %v5363_v20  ;;  %v5373_v37 = vpop.f32.mrf.mxu1 }
 0x1b0   :  { %996 = vadd.xlane.f32.xlu1 %v973_v40  ;;  %v975_v58 = vmul.f32 %v5373_v37, %v5373_v37 }
 0x1b1   :  { %v5375_v34 = vpop.f32.mrf.mxu1 }
 0x1b2   :  { %v974_v54 = vmul.f32 %v5375_v34, %v5375_v34 }
 0x1b3   :  { %933 = vadd.xlane.f32.xlu0 %v5375_v34 }
 0x1b4   :  { %998 = vadd.xlane.f32.xlu1 %v974_v54 }
 0x1b7   :  { %935 = vadd.xlane.f32.xlu0 %v5373_v37  ;;  %v5383_v60 = vpop.f32.mrf.mxu1 }
 0x1b8   :  { %1000 = vadd.xlane.f32.xlu1 %v975_v58  ;;  %v977_v12 = vmul.f32 %v5383_v60, %v5383_v60 }
 0x1b9   :  { %v5385_v2 = vpop.f32.mrf.mxu1 }
 0x1ba   :  { %v976_v9 = vmul.f32 %v5385_v2, %v5385_v2 }
 0x1bb   :  { %937 = vadd.xlane.f32.xlu0 %v5385_v2 }
 0x1bc   :  { %1002 = vadd.xlane.f32.xlu1 %v976_v9 }
 0x1bf   :  { %939 = vadd.xlane.f32.xlu0 %v5383_v60  ;;  %v5393_v13 = vpop.f32.mrf.mxu1 }
 0x1c0   :  { %1004 = vadd.xlane.f32.xlu1 %v977_v12  ;;  %v979_v19 = vmul.f32 %v5393_v13, %v5393_v13 }
 0x1c1   :  { %v5395_v16 = vpop.f32.mrf.mxu1 }
 0x1c2   :  { %v978_v17 = vmul.f32 %v5395_v16, %v5395_v16 }
 0x1c3   :  { %941 = vadd.xlane.f32.xlu0 %v5395_v16 }
 0x1c4   :  { %1006 = vadd.xlane.f32.xlu1 %v978_v17 }
 0x1c7   :  { %943 = vadd.xlane.f32.xlu0 %v5393_v13  ;;  %v5403_v22 = vpop.f32.mrf.mxu1 }
 0x1c8   :  { %1008 = vadd.xlane.f32.xlu1 %v979_v19  ;;  %v981_v18 = vmul.f32 %v5403_v22, %v5403_v22 }
 0x1c9   :  { %v5405_v23 = vpop.f32.mrf.mxu1 }
 0x1ca   :  { %v980_v27 = vmul.f32 %v5405_v23, %v5405_v23 }
 0x1cb   :  { %945 = vadd.xlane.f32.xlu0 %v5405_v23  ;;  %v5410_v29 = vpop.f32.mrf.mxu1 }
 0x1cc   :  { %1010 = vadd.xlane.f32.xlu1 %v980_v27  ;;  %v1886_v32 = vmul.f32 %v5410_v29, %v5410_v29 }
 0x1cd   :  { %v5415_v31 = vpop.f32.mrf.mxu1 }
 0x1cf   :  { %947 = vadd.xlane.f32.xlu0 %v5403_v22  ;;  %v5419_v36 = vpop.f32.mrf.mxu1 }
 0x1d0   :  { %1012 = vadd.xlane.f32.xlu1 %v981_v18  ;;  %v1887_v40 = vmul.f32 %v5419_v36, %v5419_v36 }
 0x1d3   :  { %1880 = vadd.xlane.f32.xlu0 %v5410_v29 }
 0x1d4   :  { %1888 = vadd.xlane.f32.xlu1 %v1886_v32 }
 0x1d7   :  { %1882 = vadd.xlane.f32.xlu0 %v5419_v36 }
 0x1d8   :  { %1890 = vadd.xlane.f32.xlu1 %v1887_v40 }
 0x21a   :  { %v918_v43 = vpop.xlane.xlu1 %917 }
 0x21b   :  { %v950_v38 = vmul.f32 0.0078125, %v918_v43 }
 0x21c   :  { %v983_v44 = vpop.xlane.xlu0 %982 }
 0x21d   :  { %v1030_v35 = vmul.f32 %v950_v38, %v950_v38  ;;  %v1014_v54 = vmul.f32 0.0078125, %v983_v44 }
 0x21e   :  { %v985_v48 = vpop.xlane.xlu1 %984 }
 0x21f   :  { %v1046_v46 = vsub.f32 %v1014_v54, %v1030_v35  ;;  %v1015_v62 = vmul.f32 0.0078125, %v985_v48 }
 0x220   :  { %v920_v53 = vpop.xlane.xlu0 %919 }
 0x221   :  { %v1062_v57 = vmax.f32 %v1046_v46, 0.0  ;;  %v951_v58 = vmul.f32 0.0078125, %v920_v53 }
 0x223   :  { %v1094_v59 = vadd.f32 1e-05, %v1062_v57  ;;  %v1031_v0 = vmul.f32 %v951_v58, %v951_v58 }
 0x224   :  { %v922_v6 = vpop.xlane.xlu0 %921 }
 0x225   :  { %4686 = vrsqrt.f32 %v1094_v59  ;;  %v1047_v9 = vsub.f32 %v1015_v62, %v1031_v0  ;;  %v5425_v11 = vmul.f32 0.0078125, %v922_v6  ;;  %v987_v12 = vpop.xlane.xlu1 %986 }
 0x226   :  { %v1016_v17 = vmul.f32 0.0078125, %v987_v12 }
 0x227   :  { %v1063_v19 = vmax.f32 %v1047_v9, 0.0  ;;  %v1032_v27 = vmul.f32 %v5425_v11, %v5425_v11 }
 0x228   :  { %v924_v18 = vpop.xlane.xlu0 %923 }
 0x229   :  { %v1095_v32 = vadd.f32 1e-05, %v1063_v19  ;;  %v1048_v40 = vsub.f32 %v1016_v17, %v1032_v27  ;;  %v5429_v43 = vmul.f32 0.0078125, %v924_v18  ;;  %v989_v44 = vpop.xlane.xlu1 %988  ;;  %v5438_v17 = vsub.s32 2, %v5046_v4 }
 0x22a   :  { %v1017_v35 = vmul.f32 0.0078125, %v989_v44  ;;  %v1078_v44 = vsub.f32 %v5335_v45, %v950_v38 }
 0x22b   :  { %4688 = vrsqrt.f32 %v1095_v32  ;;  %v1064_v54 = vmax.f32 %v1048_v40, 0.0  ;;  %v1033_v46 = vmul.f32 %v5429_v43, %v5429_v43  ;;  %6849 = vst [vmem:[#allocation17_spill] sm:$0xff] %v5438_v17 }
 0x22c   :  { %v926_v48 = vpop.xlane.xlu0 %925 }
 0x22d   :  { %v1096_v53 = vadd.f32 1e-05, %v1064_v54  ;;  %v1049_v57 = vsub.f32 %v1017_v35, %v1033_v46  ;;  %v5433_v59 = vmul.f32 0.0078125, %v926_v48  ;;  %v991_v62 = vpop.xlane.xlu1 %990  ;;  %v5445_v54 = vrot.slane %v5219_v42, %v5193_v30 }
 0x22e   :  { %v1018_v0 = vmul.f32 0.0078125, %v991_v62  ;;  %v5451_v62 = vrot.slane %v5219_v42, %v5438_v17 }
 0x22f   :  { %4690 = vrsqrt.f32 %v1096_v53  ;;  %v1065_v6 = vmax.f32 %v1049_v57, 0.0  ;;  %v1034_v9 = vmul.f32 %v5433_v59, %v5433_v59 }
 0x230   :  { %v928_v12 = vpop.xlane.xlu0 %927 }
 0x231   :  { %v1097_v19 = vadd.f32 1e-05, %v1065_v6  ;;  %v1050_v27 = vsub.f32 %v1018_v0, %v1034_v9  ;;  %v5440_v18 = vmul.f32 0.0078125, %v928_v12  ;;  %v993_v32 = vpop.xlane.xlu1 %992 }
 0x232   :  { %v4687_v40 = vpop.eup %4686  ;;  %v1019_v35 = vmul.f32 0.0078125, %v993_v32 }
 0x233   :  { %4692 = vrsqrt.f32 %v1097_v19  ;;  %v1066_v46 = vmax.f32 %v1050_v27, 0.0  ;;  %v1035_v48 = vmul.f32 %v5440_v18, %v5440_v18  ;;  %v1126_v57 = vmul.f32 %v4687_v40, %v1078_v44 }
 0x234   :  { %v930_v53 = vpop.xlane.xlu0 %929  ;;  %v1079_v19 = vsub.f32 %v5333_v52, %v951_v58  ;;  %v1080_v52 = vsub.f32 %v5345_v51, %v5425_v11  ;;  %v1081_v11 = vsub.f32 %v5342_v50, %v5429_v43  ;;  %v1082_v43 = vsub.f32 %v5355_v3, %v5433_v59 }
 0x235   :  { %v1098_v0 = vadd.f32 1e-05, %v1066_v46  ;;  %v1051_v6 = vsub.f32 %v1019_v35, %v1035_v48  ;;  %v5453_v9 = vmul.f32 0.0078125, %v930_v53  ;;  %v995_v45 = vpop.xlane.xlu1 %994  ;;  %v1146_v12 = vmul.f32 %v5445_v54, %v1126_v57 }
 0x236   :  { %v1020_v38 = vmul.f32 0.0078125, %v995_v45  ;;  %v1083_v59 = vsub.f32 %v5352_v63, %v5440_v18 }
 0x237   :  { %4694 = vrsqrt.f32 %v1098_v0  ;;  %v1067_v27 = vmax.f32 %v1051_v6, 0.0  ;;  %v1036_v32 = vmul.f32 %v5453_v9, %v5453_v9  ;;  %v1166_v42 = vadd.f32 %v5451_v62, %v1146_v12 }
 0x238   :  { %v4689_v40 = vpop.eup %4688  ;;  %v932_v44 = vpop.xlane.xlu0 %931  ;;  %v1084_v18 = vsub.f32 %v5365_v26, %v5453_v9 }
 0x239   :  { %v1127_v5 = vmul.f32 %v4689_v40, %v1079_v19  ;;  %v1099_v46 = vadd.f32 1e-05, %v1067_v27  ;;  %v1052_v35 = vsub.f32 %v1020_v38, %v1036_v32  ;;  %v5460_v48 = vmul.f32 0.0078125, %v932_v44  ;;  %v997_v53 = vpop.xlane.xlu1 %996 }
 0x23a   :  { %v1021_v45 = vmul.f32 0.0078125, %v997_v53  ;;  %v1182_v17 = vmax.f32 %v1166_v42, 0.0  ;;  %v6850_v40 = vmov 0.0  }
 0x23b   :  { %4696 = vrsqrt.f32 %v1099_v46  ;;  %v1068_v58 = vmax.f32 %v1052_v35, 0.0  ;;  %v1037_v57 = vmul.f32 %v5460_v48, %v5460_v48  ;;  %v1147_v12 = vmul.f32 %v5445_v54, %v1127_v5 }
 0x23c   :  { %v4691_v0 = vpop.eup %4690  ;;  %2019 = vmatmul.mubr.f32.vlgmr.msra.gmra.mxu0 %v1182_v17  ;;  %v934_v6 = vpop.xlane.xlu0 %933  ;;  %v1085_v9 = vsub.f32 %v5363_v20, %v5460_v48 }
 0x23d   :  { %v1100_v19 = vadd.f32 1e-05, %v1068_v58  ;;  %v1053_v38 = vsub.f32 %v1021_v45, %v1037_v57  ;;  %v5467_v27 = vmul.f32 0.0078125, %v934_v6  ;;  %v999_v32 = vpop.xlane.xlu1 %998  ;;  %2023 = vmatprep.mubr.f32.mxu0 %v6850_v40  ;;  %v1128_v44 = vmul.f32 %v4691_v0, %v1080_v52 }
 0x23e   :  { %v1022_v42 = vmul.f32 0.0078125, %v999_v32  ;;  %v1167_v51 = vadd.f32 %v5451_v62, %v1147_v12 }
 0x23f   :  { %4698 = vrsqrt.f32 %v1100_v19  ;;  %v1069_v46 = vmax.f32 %v1053_v38, 0.0  ;;  %v1038_v17 = vmul.f32 %v5467_v27, %v5467_v27  ;;  %v1148_v45 = vmul.f32 %v5445_v54, %v1128_v44 }
 0x240   :  { %v4693_v5 = vpop.eup %4692  ;;  %v936_v35 = vpop.xlane.xlu0 %935  ;;  %v1183_v53 = vmax.f32 %v1167_v51, 0.0  ;;  %v1086_v48 = vsub.f32 %v5375_v34, %v5467_v27 }
 0x241   :  { %v1101_v58 = vadd.f32 1e-05, %v1069_v46  ;;  %v1054_v57 = vsub.f32 %v1022_v42, %v1038_v17  ;;  %v5476_v6 = vmul.f32 0.0078125, %v936_v35  ;;  %v1001_v52 = vpop.xlane.xlu1 %1000  ;;  %v1129_v0 = vmul.f32 %v4693_v5, %v1081_v11 }
 0x242   :  { %v1023_v12 = vmul.f32 0.0078125, %v1001_v52  ;;  %2024 = vmatmul.mubr.f32.gmra.mxu0 %v1183_v53  ;;  %v1168_v50 = vadd.f32 %v5451_v62, %v1148_v45 }
 0x243   :  { %4700 = vrsqrt.f32 %v1101_v58  ;;  %v1070_v19 = vmax.f32 %v1054_v57, 0.0  ;;  %v1039_v38 = vmul.f32 %v5476_v6, %v5476_v6  ;;  %2028 = vmatprep.mubr.f32.mxu0 %v6850_v40  ;;  %v1149_v51 = vmul.f32 %v5445_v54, %v1129_v0 }
 0x244   :  { %v4695_v32 = vpop.eup %4694  ;;  %v938_v44 = vpop.xlane.xlu0 %937  ;;  %v1184_v42 = vmax.f32 %v1168_v50, 0.0  ;;  %v1087_v27 = vsub.f32 %v5373_v37, %v5476_v6 }
 0x245   :  { %v1102_v11 = vadd.f32 1e-05, %v1070_v19  ;;  %v1055_v46 = vsub.f32 %v1023_v12, %v1039_v38  ;;  %v5485_v17 = vmul.f32 0.0078125, %v938_v44  ;;  %v1003_v5 = vpop.xlane.xlu1 %1002  ;;  %v1130_v35 = vmul.f32 %v4695_v32, %v1082_v43 }
 0x246   :  { %v1024_v53 = vmul.f32 0.0078125, %v1003_v5  ;;  %2029 = vmatmul.mubr.f32.gmra.mxu0 %v1184_v42  ;;  %v1169_v3 = vadd.f32 %v5451_v62, %v1149_v51 }
 0x247   :  { %4702 = vrsqrt.f32 %v1102_v11  ;;  %v1071_v45 = vmax.f32 %v1055_v46, 0.0  ;;  %v1040_v58 = vmul.f32 %v5485_v17, %v5485_v17  ;;  %2033 = vmatprep.mubr.f32.mxu0 %v6850_v40  ;;  %v1150_v12 = vmul.f32 %v5445_v54, %v1130_v35 }
 0x248   :  { %v4697_v57 = vpop.eup %4696  ;;  %v940_v52 = vpop.xlane.xlu0 %939  ;;  %v1185_v0 = vmax.f32 %v1169_v3, 0.0  ;;  %v1088_v6 = vsub.f32 %v5385_v2, %v5485_v17 }
 0x249   :  { %v1103_v50 = vadd.f32 1e-05, %v1071_v45  ;;  %v1056_v43 = vsub.f32 %v1024_v53, %v1040_v58  ;;  %v5494_v19 = vmul.f32 0.0078125, %v940_v52  ;;  %v1005_v38 = vpop.xlane.xlu1 %1004  ;;  %v1131_v32 = vmul.f32 %v4697_v57, %v1083_v59 }
 0x24a   :  { %v1025_v44 = vmul.f32 0.0078125, %v1005_v38  ;;  %2034 = vmatmul.mubr.f32.gmra.mxu0 %v1185_v0  ;;  %v1170_v63 = vadd.f32 %v5451_v62, %v1150_v12 }
 0x24b   :  { %4704 = vrsqrt.f32 %v1103_v50  ;;  %v1072_v42 = vmax.f32 %v1056_v43, 0.0  ;;  %v1041_v51 = vmul.f32 %v5494_v19, %v5494_v19  ;;  %2038 = vmatprep.mubr.f32.mxu0 %v6850_v40  ;;  %v1151_v35 = vmul.f32 %v5445_v54, %v1131_v32 }
 0x24c   :  { %v4699_v11 = vpop.eup %4698  ;;  %v942_v46 = vpop.xlane.xlu0 %941  ;;  %v1186_v5 = vmax.f32 %v1170_v63, 0.0 }
 0x24d   :  { %v1104_v53 = vadd.f32 1e-05, %v1072_v42  ;;  %v1057_v3 = vsub.f32 %v1025_v44, %v1041_v51  ;;  %v5503_v59 = vmul.f32 0.0078125, %v942_v46  ;;  %v1007_v45 = vpop.xlane.xlu1 %1006  ;;  %v1132_v58 = vmul.f32 %v4699_v11, %v1084_v18 }
 0x24e   :  { %v1026_v57 = vmul.f32 0.0078125, %v1007_v45  ;;  %2039 = vmatmul.mubr.f32.gmra.mxu0 %v1186_v5  ;;  %v1171_v26 = vadd.f32 %v5451_v62, %v1151_v35 }
 0x24f   :  { %4706 = vrsqrt.f32 %v1104_v53  ;;  %v1073_v52 = vmax.f32 %v1057_v3, 0.0  ;;  %v1042_v0 = vmul.f32 %v5503_v59, %v5503_v59  ;;  %2043 = vmatprep.mubr.f32.mxu0 %v6850_v40  ;;  %v1152_v38 = vmul.f32 %v5445_v54, %v1132_v58 }
 0x250   :  { %v4701_v12 = vpop.eup %4700  ;;  %v944_v50 = vpop.xlane.xlu0 %943  ;;  %v1187_v43 = vmax.f32 %v1171_v26, 0.0 }
 0x251   :  { %v1105_v32 = vadd.f32 1e-05, %v1073_v52  ;;  %v1058_v44 = vsub.f32 %v1026_v57, %v1042_v0  ;;  %v5512_v63 = vmul.f32 0.0078125, %v944_v50  ;;  %v1009_v18 = vpop.xlane.xlu1 %1008  ;;  %v1133_v42 = vmul.f32 %v4701_v12, %v1085_v9 }
 0x252   :  { %v1027_v51 = vmul.f32 0.0078125, %v1009_v18  ;;  %2044 = vmatmul.mubr.f32.gmra.mxu0 %v1187_v43  ;;  %v1172_v20 = vadd.f32 %v5451_v62, %v1152_v38 }
 0x253   :  { %4708 = vrsqrt.f32 %v1105_v32  ;;  %v1074_v11 = vmax.f32 %v1058_v44, 0.0  ;;  %v1043_v46 = vmul.f32 %v5512_v63, %v5512_v63  ;;  %2048 = vmatprep.mubr.f32.mxu0 %v6850_v40  ;;  %v1153_v3 = vmul.f32 %v5445_v54, %v1133_v42 }
 0x254   :  { %v4703_v5 = vpop.eup %4702  ;;  %v946_v35 = vpop.xlane.xlu0 %945  ;;  %v1188_v53 = vmax.f32 %v1172_v20, 0.0 }
 0x255   :  { %v1106_v45 = vadd.f32 1e-05, %v1074_v11  ;;  %v1059_v58 = vsub.f32 %v1027_v51, %v1043_v46  ;;  %v5521_v57 = vmul.f32 0.0078125, %v946_v35  ;;  %v1011_v26 = vpop.xlane.xlu1 %1010  ;;  %v1134_v9 = vmul.f32 %v4703_v5, %v1086_v48 }
 0x256   :  { %v1028_v52 = vmul.f32 0.0078125, %v1011_v26  ;;  %2049 = vmatmul.mubr.f32.gmra.mxu0 %v1188_v53  ;;  %v1173_v34 = vadd.f32 %v5451_v62, %v1153_v3 }
 0x257   :  { %4710 = vrsqrt.f32 %v1106_v45  ;;  %v1075_v0 = vmax.f32 %v1059_v58, 0.0  ;;  %v1044_v12 = vmul.f32 %v5521_v57, %v5521_v57  ;;  %2053 = vmatprep.mubr.f32.mxu0 %v6850_v40  ;;  %v1154_v32 = vmul.f32 %v5445_v54, %v1134_v9 }
 0x258   :  { %v4705_v50 = vpop.eup %4704  ;;  %v948_v43 = vpop.xlane.xlu0 %947  ;;  %v1189_v38 = vmax.f32 %v1173_v34, 0.0  ;;  %v1089_v34 = vsub.f32 %v5383_v60, %v5494_v19 }
 0x259   :  { %v1107_v44 = vadd.f32 1e-05, %v1075_v0  ;;  %v1060_v18 = vsub.f32 %v1028_v52, %v1044_v12  ;;  %v5530_v42 = vmul.f32 0.0078125, %v948_v43  ;;  %v1013_v51 = vpop.xlane.xlu1 %1012  ;;  %v1135_v20 = vmul.f32 %v4705_v50, %v1087_v27 }
 0x25a   :  { %v1029_v48 = vmul.f32 0.0078125, %v1013_v51  ;;  %2054 = vmatmul.mubr.f32.gmra.mxu0 %v1189_v38  ;;  %v1174_v37 = vadd.f32 %v5451_v62, %v1154_v32 }
 0x25b   :  { %4712 = vrsqrt.f32 %v1107_v44  ;;  %v1076_v11 = vmax.f32 %v1060_v18, 0.0  ;;  %v1045_v46 = vmul.f32 %v5530_v42, %v5530_v42  ;;  %2058 = vmatprep.mubr.f32.mxu0 %v6850_v40  ;;  %v1155_v3 = vmul.f32 %v5445_v54, %v1135_v20 }
 0x25c   :  { %v4707_v5 = vpop.eup %4706  ;;  %v1881_v35 = vpop.xlane.xlu0 %1880  ;;  %v1190_v53 = vmax.f32 %v1174_v37, 0.0 }
 0x25d   :  { %v1108_v45 = vadd.f32 1e-05, %v1076_v11  ;;  %v1061_v58 = vsub.f32 %v1029_v48, %v1045_v46  ;;  %v5539_v26 = vmul.f32 0.0078125, %v1881_v35  ;;  %v1889_v9 = vpop.xlane.xlu1 %1888  ;;  %v1136_v52 = vmul.f32 %v4707_v5, %v1088_v6 }
 0x25e   :  { %2059 = vmatmul.mubr.f32.gmra.mxu0 %v1190_v53  ;;  %v1892_v2 = vmul.f32 0.0078125, %v1889_v9  ;;  %v1175_v17 = vadd.f32 %v5451_v62, %v1155_v3  ;;  %v1090_v48 = vsub.f32 %v5395_v16, %v5503_v59  ;;  %v1091_v16 = vsub.f32 %v5393_v13, %v5512_v63 }
 0x25f   :  { %4714 = vrsqrt.f32 %v1108_v45  ;;  %v1077_v27 = vmax.f32 %v1061_v58, 0.0  ;;  %v1894_v0 = vmul.f32 %v5539_v26, %v5539_v26  ;;  %2063 = vmatprep.mubr.f32.mxu0 %v6850_v40  ;;  %v1156_v38 = vmul.f32 %v5445_v54, %v1136_v52 }
 0x260   :  { %v4709_v12 = vpop.eup %4708  ;;  %v1883_v50 = vpop.xlane.xlu0 %1882  ;;  %v1191_v43 = vmax.f32 %v1175_v17, 0.0 }
 0x261   :  { %v1109_v32 = vadd.f32 1e-05, %v1077_v27  ;;  %v1896_v44 = vsub.f32 %v1892_v2, %v1894_v0  ;;  %v5548_v18 = vmul.f32 0.0078125, %v1883_v50  ;;  %v1891_v51 = vpop.xlane.xlu1 %1890  ;;  %v1137_v20 = vmul.f32 %v4709_v12, %v1089_v34 }
 0x262   :  { %2064 = vmatmul.mubr.f32.gmra.mxu0 %v1191_v43  ;;  %v1893_v60 = vmul.f32 0.0078125, %v1891_v51  ;;  %v1176_v19 = vadd.f32 %v5451_v62, %v1156_v38  ;;  %v1092_v27 = vsub.f32 %v5405_v23, %v5521_v57  ;;  %v1093_v43 = vsub.f32 %v5403_v22, %v5530_v42 }
 0x263   :  { %4716 = vrsqrt.f32 %v1109_v32  ;;  %v1898_v37 = vmax.f32 %v1896_v44, 0.0  ;;  %v1895_v6 = vmul.f32 %v5548_v18, %v5548_v18  ;;  %2068 = vmatprep.mubr.f32.mxu0 %v6850_v40  ;;  %v1157_v5 = vmul.f32 %v5445_v54, %v1137_v20 }
 0x264   :  { %v4711_v11 = vpop.eup %4710  ;;  %v1192_v46 = vmax.f32 %v1176_v19, 0.0  ;;  %v6819_v23 = vsub.s32 3, %v5046_v4  ;;  %v6818_v20 = vsub.s32 4, %v5046_v4  ;;  %v5582_v19 = vld [vmem:[%s6812_s9] sm:$0xff] }
 0x265   :  { %v1902_v35 = vadd.f32 1e-05, %v1898_v37  ;;  %v1897_v53 = vsub.f32 %v1893_v60, %v1895_v6  ;;  %v1138_v3 = vmul.f32 %v4711_v11, %v1090_v48  ;;  %v1177_v45 = vadd.f32 %v5451_v62, %v1157_v5 }
 0x266   :  { %2069 = vmatmul.mubr.f32.gmra.mxu0 %v1192_v46  ;;  %v1900_v60 = vsub.f32 %v5410_v29, %v5539_v26  ;;  %v1911_v48 = vrot.slane %v5582_v19, %v6819_v23  ;;  %v1917_v29 = vrot.slane %v5582_v19, %v6818_v20 }
 0x267   :  { %4718 = vrsqrt.f32 %v1902_v35  ;;  %v1899_v59 = vmax.f32 %v1897_v53, 0.0  ;;  %2073 = vmatprep.mubr.f32.mxu0 %v6850_v40  ;;  %v1158_v58 = vmul.f32 %v5445_v54, %v1138_v3  ;;  %v1193_v52 = vmax.f32 %v1177_v45, 0.0 }
 0x268   :  { %v4713_v9 = vpop.eup %4712 }
 0x269   :  { %v1903_v2 = vadd.f32 1e-05, %v1899_v59  ;;  %v1178_v17 = vadd.f32 %v5451_v62, %v1158_v58  ;;  %v1139_v34 = vmul.f32 %v4713_v9, %v1091_v16  ;;  %v295_v58 = vmul.f32 %v5068_v25, %v5068_v25 }
 0x26a   :  { %2074 = vmatmul.mubr.f32.gmra.mxu0 %v1193_v52 }
 0x26b   :  { %4720 = vrsqrt.f32 %v1903_v2  ;;  %2078 = vmatprep.mubr.f32.mxu0 %v6850_v40  ;;  %v1194_v13 = vmax.f32 %v1178_v17, 0.0  ;;  %v1159_v63 = vmul.f32 %v5445_v54, %v1139_v34  ;;  %v312_v52 = vsel %vm311_vm0, %v295_v58, 0.0 }
 0x26c   :  { %v4715_v0 = vpop.eup %4714  ;;  %v296_v2 = vmul.f32 %v5073_v28, %v5073_v28  ;;  %313 = vadd.xlane.f32.xlu0 %v312_v52 }
 0x26d   :  { %v1179_v12 = vadd.f32 %v5451_v62, %v1159_v63  ;;  %v1140_v50 = vmul.f32 %v4715_v0, %v1092_v27 }
 0x26e   :  { %2079 = vmatmul.mubr.f32.gmra.mxu0 %v1194_v13  ;;  %v315_v17 = vsel %vm311_vm0, %v296_v2, 0.0 }
 0x26f   :  { %2083 = vmatprep.mubr.f32.mxu0 %v6850_v40  ;;  %v1195_v38 = vmax.f32 %v1179_v12, 0.0  ;;  %v1160_v32 = vmul.f32 %v5445_v54, %v1140_v50  ;;  %316 = vadd.xlane.f32.xlu1 %v315_v17 }
 0x270   :  { %v4717_v57 = vpop.eup %4716 }
 0x271   :  { %v1180_v44 = vadd.f32 %v5451_v62, %v1160_v32  ;;  %v1141_v51 = vmul.f32 %v4717_v57, %v1093_v43 }
 0x272   :  { %2084 = vmatmul.mubr.f32.gmra.mxu0 %v1195_v38 }
 0x273   :  { %2088 = vmatprep.mubr.f32.mxu0 %v6850_v40  ;;  %v1196_v22 = vmax.f32 %v1180_v44, 0.0  ;;  %v1161_v42 = vmul.f32 %v5445_v54, %v1141_v51  ;;  %v1901_v54 = vsub.f32 %v5419_v36, %v5548_v18  ;;  %v5597_v36 = vpop.f32.mrf.mxu0 }
 0x274   :  { %v4719_v37 = vpop.eup %4718 }
 0x275   :  { %v1181_v6 = vadd.f32 %v5451_v62, %v1161_v42  ;;  %v1906_v11 = vmul.f32 %v4719_v37, %v1900_v60  ;;  %v5599_v18 = vpop.f32.mrf.mxu0 }
 0x276   :  { %2089 = vmatmul.mubr.f32.gmra.mxu0 %v1196_v22  ;;  %6851 = vst [vmem:[#allocation18_spill] sm:$0xff] %v5599_v18 }
 0x277   :  { %2093 = vmatprep.mubr.f32.mxu0 %v6850_v40  ;;  %v1197_v26 = vmax.f32 %v1181_v6, 0.0  ;;  %v1912_v46 = vmul.f32 %v1911_v48, %v1906_v11  ;;  %v5601_v59 = vpop.f32.mrf.mxu0 }
 0x278   :  { %v4721_v5 = vpop.eup %4720 }
 0x279   :  { %v1918_v35 = vadd.f32 %v1917_v29, %v1912_v46  ;;  %v1907_v53 = vmul.f32 %v4721_v5, %v1901_v54  ;;  %v5605_v9 = vpop.f32.mrf.mxu0 }
 0x27a   :  { %2094 = vmatmul.mubr.f32.gmra.mxu0 %v1197_v26  ;;  %6852 = vst [vmem:[#allocation19_spill] sm:$0xff] %v5605_v9 }
 0x27b   :  { %2098 = vmatprep.mubr.f32.mxu0 %v6850_v40  ;;  %v1920_v62 = vmax.f32 %v1918_v35, 0.0  ;;  %v1913_v3 = vmul.f32 %v1911_v48, %v1907_v53  ;;  %v5611_v34 = vpop.f32.mrf.mxu0 }
 0x27d   :  { %v1919_v45 = vadd.f32 %v1917_v29, %v1913_v3  ;;  %v5613_v27 = vpop.f32.mrf.mxu0 }
 0x27e   :  { %2099 = vmatmul.mubr.f32.gmra.mxu0 %v1920_v62 }
 0x27f   :  { %2103 = vmatprep.mubr.f32.mxu0 %v6850_v40  ;;  %v1921_v16 = vmax.f32 %v1919_v45, 0.0  ;;  %v5615_v13 = vpop.f32.mrf.mxu0 }
 0x281   :  { %v5617_v63 = vpop.f32.mrf.mxu0 }
 0x282   :  { %2104 = vmatmul.mubr.f32.gmra.mxu0 %v1921_v16 }
 0x283   :  { %3273 = vmatprep.mubr.f32.mxu0 %v6850_v40  ;;  %v5619_v25 = vpop.f32.mrf.mxu0 }
 0x285   :  { %v5621_v0 = vpop.f32.mrf.mxu0 }
 0x287   :  { %v5623_v12 = vpop.f32.mrf.mxu0 }
 0x289   :  { %v5625_v50 = vpop.f32.mrf.mxu0 }
 0x28b   :  { %v5627_v28 = vpop.f32.mrf.mxu0 }
 0x28c   :  { %6853 = vst [vmem:[#allocation20_spill] sm:$0xff] %v5627_v28 }
 0x28d   :  { %v5629_v43 = vpop.f32.mrf.mxu0 }
 0x28f   :  { %v5631_v38 = vpop.f32.mrf.mxu0 }
 0x290   :  { %6854 = vst [vmem:[#allocation21_spill] sm:$0xff] %v5631_v38 }
 0x291   :  { %v5633_v32 = vpop.f32.mrf.mxu0 }
 0x292   :  { %6855 = vst [vmem:[#allocation22_spill] sm:$0xff] %v5633_v32 }
 0x293   :  { %v5635_v57 = vpop.f32.mrf.mxu0 }
 0x294   :  { %6856 = vst [vmem:[#allocation23_spill] sm:$0xff] %v5635_v57 }
 0x295   :  { %v5637_v44 = vpop.f32.mrf.mxu0 }
 0x296   :  { %6857 = vst [vmem:[#allocation24_spill] sm:$0xff] %v5637_v44 }
 0x297   :  { %v5639_v51 = vpop.f32.mrf.mxu0 }
 0x298   :  { %6858 = vst [vmem:[#allocation25_spill] sm:$0xff] %v5639_v51 }
 0x299   :  { %v5641_v60 = vpop.f32.mrf.mxu0 }
 0x29a   :  { %6859 = vst [vmem:[#allocation26_spill] sm:$0xff] %v5641_v60 }
 0x2fc   :  { %v2020_v22 = vpop.f32.mrf.mxu0 }
 0x2fe   :  { %v2022_v42 = vpop.f32.mrf.mxu0 }
 0x302   :  { %v2025_v48 = vpop.f32.mrf.mxu0 }
 0x304   :  { %v2027_v37 = vpop.f32.mrf.mxu0 }
 0x306   :  { %v2030_v6 = vpop.f32.mrf.mxu0 }
 0x308   :  { %v2032_v11 = vpop.f32.mrf.mxu0 }
 0x30a   :  { %v5643_v29 = vpop.f32.mrf.mxu0 }
 0x30c   :  { %v2037_v54 = vpop.f32.mrf.mxu0 }
 0x30e   :  { %v2040_v26 = vpop.f32.mrf.mxu0 }
 0x310   :  { %v2042_v46 = vpop.f32.mrf.mxu0 }
 0x312   :  { %v5645_v5 = vpop.f32.mrf.mxu0 }
 0x314   :  { %v2047_v35 = vpop.f32.mrf.mxu0 }
 0x316   :  { %v5647_v53 = vpop.f32.mrf.mxu0 }
 0x318   :  { %v2052_v62 = vpop.f32.mrf.mxu0 }
 0x31a   :  { %v5649_v3 = vpop.f32.mrf.mxu0 }
 0x31c   :  { %v2057_v45 = vpop.f32.mrf.mxu0 }
 0x31e   :  { %v2060_v16 = vpop.f32.mrf.mxu0 }
 0x320   :  { %v2062_v58 = vpop.f32.mrf.mxu0 }
 0x322   :  { %v5651_v52 = vpop.f32.mrf.mxu0 }
 0x324   :  { %v2067_v2 = vpop.f32.mrf.mxu0 }
 0x326   :  { %v5653_v17 = vpop.f32.mrf.mxu0 }
 0x328   :  { %v2072_v42 = vpop.f32.mrf.mxu0 }
 0x32a   :  { %v5655_v37 = vpop.f32.mrf.mxu0 }
 0x32c   :  { %v2077_v11 = vpop.f32.mrf.mxu0 }
 0x32e   :  { %v5657_v54 = vpop.f32.mrf.mxu0 }
 0x330   :  { %v2082_v46 = vpop.f32.mrf.mxu0 }
 0x332   :  { %v5659_v35 = vpop.f32.mrf.mxu0 }
 0x334   :  { %v2087_v62 = vpop.f32.mrf.mxu0 }
 0x336   :  { %v5661_v20 = vpop.f32.mrf.mxu0 }
 0x338   :  { %v2092_v45 = vpop.f32.mrf.mxu0 }
 0x33a   :  { %v5663_v23 = vpop.f32.mrf.mxu0 }
 0x33c   :  { %v2097_v58 = vpop.f32.mrf.mxu0 }
 0x33e   :  { %v2100_v9 = vpop.f32.mrf.mxu0 }
 0x340   :  { %v2101_v2 = vpop.f32.mrf.mxu0 }
 0x341   :  { %v2111_v18 = vcombine.high %v2101_v2, %v2101_v2  ;;  %v2118_v42 = vrot.slane %v2101_v2, %v5050_v7 }
 0x342   :  { %v2105_v30 = vpop.f32.mrf.mxu0 }
 0x343   :  { %v2125_v11 = vrot.slane %v2111_v18, %v5050_v7  ;;  %v2126_v51 = vcombine.high %v2118_v42, %v2118_v42  ;;  %v2134_v46 = vrot.slane %v2118_v42, %v5050_v7 }
 0x344   :  { %v2106_v60 = vpop.f32.mrf.mxu0 }
 0x345   :  { %v2148_v62 = vrot.slane %v2126_v51, %v5050_v7  ;;  %v2156_v57 = vcombine.high %v2134_v46, %v2134_v46  ;;  %v2127_v44 = vcombine.high %v2125_v11, %v2125_v11  ;;  %v2212_v45 = vrot.slane %v2134_v46, %v5057_v10 }
 0x346   :  { %v2167_v58 = vrot.slane %v2106_v60, %v5050_v7  ;;  %v2141_v9 = vrot.slane %v2125_v11, %v5050_v7 }
 0x347   :  { %v2216_v38 = vrot.slane %v2148_v62, %v5057_v10  ;;  %v2220_v30 = vrot.slane %v2156_v57, %v5057_v10  ;;  %v2289_v2 = vadd.f32 %v2212_v45, %v2020_v22  ;;  %v5675_v32 = vrot.slane %v2127_v44, %v5050_v7 }
 0x348   :  { %v2183_v42 = vrot.slane %v2167_v58, %v5050_v7  ;;  %v2228_v51 = vrot.slane %v2141_v9, %v5057_v10  ;;  %v2157_v57 = vcombine.high %v2141_v9, %v2141_v9  ;;  %v2160_v22 = vcombine.high %v2106_v60, %v2106_v60 }
 0x349   :  { %v2290_v18 = vadd.f32 %v2216_v38, %v2025_v48  ;;  %v5680_v28 = vadd.f32 %v2289_v2, %v5597_v36  ;;  %v2291_v11 = vadd.f32 %v2220_v30, %v2030_v6  ;;  %v2158_v38 = vcombine.high %v2148_v62, %v2148_v62 }
 0x34a   :  { %v2244_v44 = vrot.slane %v2183_v42, %v5057_v10  ;;  %v2293_v2 = vadd.f32 %v2228_v51, %v2040_v26  ;;  %v2174_v6 = vrot.slane %v2160_v22, %v5050_v7  ;;  %v2175_v9 = vcombine.high %v2167_v58, %v2167_v58 }
 0x34b   :  { %v5683_v46 = vadd.f32 %v2290_v18, %v5597_v36  ;;  %2321 = vadd.xlane.f32.xlu0 %v5680_v28  ;;  %v5689_v48 = vadd.f32 %v2291_v11, %v5597_v36  ;;  %v2369_v45 = vmul.f32 %v5680_v28, %v5680_v28  ;;  %v2232_v18 = vrot.slane %v5675_v32, %v5057_v10 }
 0x34c   :  { %v2297_v62 = vadd.f32 %v2244_v44, %v2060_v16  ;;  %v5700_v30 = vadd.f32 %v2293_v2, %v5597_v36  ;;  %v2236_v26 = vrot.slane %v2157_v57, %v5057_v10  ;;  %v2224_v51 = vrot.slane %v2158_v38, %v5057_v10 }
 0x34d   :  { %2323 = vadd.xlane.f32.xlu1 %v5683_v46  ;;  %v2370_v60 = vmul.f32 %v5683_v46, %v5683_v46  ;;  %v2294_v11 = vadd.f32 %v2232_v18, %v5645_v5  ;;  %v2197_v58 = vrot.slane %v2175_v9, %v5050_v7  ;;  %v2205_v57 = vcombine.high %v2183_v42, %v2183_v42 }
 0x34e   :  { %v5712_v16 = vadd.f32 %v2297_v62, %v5601_v59  ;;  %v2295_v44 = vadd.f32 %v2236_v26, %v5647_v53  ;;  %v2292_v5 = vadd.f32 %v2224_v51, %v5643_v29  ;;  %v2373_v53 = vmul.f32 %v5700_v30, %v5700_v30 }
 0x34f   :  { %2325 = vadd.xlane.f32.xlu0 %v5689_v48  ;;  %v5709_v22 = vadd.f32 %v2294_v11, %v5597_v36  ;;  %v2248_v38 = vrot.slane %v2197_v58, %v5057_v10  ;;  %v2252_v29 = vrot.slane %v2205_v57, %v5057_v10  ;;  %v2371_v42 = vmul.f32 %v5689_v48, %v5689_v48 }
 0x350   :  { %v5721_v18 = vadd.f32 %v2295_v44, %v5597_v36  ;;  %v5724_v9 = vadd.f32 %v2292_v5, %v5597_v36  ;;  %v2176_v11 = vcombine.high %v2174_v6, %v2174_v6 }
 0x351   :  { %2385 = vadd.xlane.f32.xlu1 %v2369_v45  ;;  %v2190_v45 = vrot.slane %v2174_v6, %v5050_v7  ;;  %v2299_v44 = vadd.f32 %v2252_v29, %v5653_v17  ;;  %v2377_v17 = vmul.f32 %v5712_v16, %v5712_v16  ;;  %v2207_v29 = vcombine.high %v2197_v58, %v2197_v58 }
 0x352   :  { %v2375_v6 = vmul.f32 %v5721_v18, %v5721_v18 }
 0x353   :  { %2387 = vadd.xlane.f32.xlu0 %v2370_v60  ;;  %v2260_v2 = vrot.slane %v2190_v45, %v5057_v10  ;;  %v2298_v60 = vadd.f32 %v2248_v38, %v5651_v52  ;;  %v2159_v52 = vcombine.high %v5675_v32, %v5675_v32  ;;  %v5748_v5 = vadd.f32 %v2299_v44, %v5601_v59 }
 0x354   :  { %v2206_v57 = vcombine.high %v2190_v45, %v2190_v45 }
 0x355   :  { %2329 = vadd.xlane.f32.xlu1 %v5700_v30  ;;  %v2301_v62 = vadd.f32 %v2260_v2, %v5657_v54  ;;  %v5736_v26 = vadd.f32 %v2298_v60, %v5601_v59  ;;  %v2204_v54 = vrot.slane %v2176_v11, %v5050_v7  ;;  %v2240_v32 = vrot.slane %v2159_v52, %v5057_v10 }
 0x357   :  { %2331 = vadd.xlane.f32.xlu0 %v5709_v22  ;;  %v5739_v51 = vadd.f32 %v2301_v62, %v5601_v59  ;;  %v2378_v38 = vmul.f32 %v5736_v26, %v5736_v26  ;;  %v2264_v2 = vrot.slane %v2204_v54, %v5057_v10  ;;  %v2296_v45 = vadd.f32 %v2240_v32, %v5649_v3 }
 0x358   :  { %v2268_v62 = vrot.slane %v2206_v57, %v5057_v10  ;;  %v2208_v11 = vcombine.high %v2204_v54, %v2204_v54  ;;  %v2374_v3 = vmul.f32 %v5709_v22, %v5709_v22 }
 0x359   :  { %2337 = vadd.xlane.f32.xlu1 %v5712_v16  ;;  %v2302_v60 = vadd.f32 %v2264_v2, %v5659_v35  ;;  %v5767_v44 = vadd.f32 %v2296_v45, %v5597_v36  ;;  %v2381_v57 = vmul.f32 %v5739_v51, %v5739_v51 }
 0x35a   :  { %v2303_v52 = vadd.f32 %v2268_v62, %v5661_v20  ;;  %v2272_v54 = vrot.slane %v2208_v11, %v5057_v10  ;;  %v305_v11 = vmul.f32 %v5152_v49, %v5152_v49 }
 0x35b   :  { %2333 = vadd.xlane.f32.xlu0 %v5721_v18  ;;  %v5770_v58 = vadd.f32 %v2302_v60, %v5601_v59  ;;  %v304_v60 = vmul.f32 %v5145_v41, %v5145_v41 }
 0x35c   :  { %v5779_v35 = vadd.f32 %v2303_v52, %v5601_v59  ;;  %v299_v52 = vmul.f32 %v5095_v55, %v5095_v55  ;;  %v307_v55 = vmul.f32 %v5165_v61, %v5165_v61 }
 0x35d   :  { %2327 = vadd.xlane.f32.xlu1 %v5724_v9  ;;  %v2382_v32 = vmul.f32 %v5770_v58, %v5770_v58 }
 0x35e   :  { %v324_v41 = vsel %vm311_vm0, %v299_v52, 0.0  ;;  %v1739_v52 = vld [vmem:[#allocation2 + $0x88] sm:$0xff] }
 0x35f   :  { %2393 = vadd.xlane.f32.xlu0 %v2373_v53  ;;  %v2372_v53 = vmul.f32 %v5724_v9, %v5724_v9 }
 0x361   :  { %2389 = vadd.xlane.f32.xlu1 %v2371_v42  ;;  %v2379_v42 = vmul.f32 %v5748_v5, %v5748_v5 }
 0x363   :  { %2339 = vadd.xlane.f32.xlu0 %v5736_v26 }
 0x365   :  { %2345 = vadd.xlane.f32.xlu1 %v5739_v51 }
 0x367   :  { %2341 = vadd.xlane.f32.xlu0 %v5748_v5 }
 0x369   :  { %2397 = vadd.xlane.f32.xlu1 %v2375_v6  ;;  %v2256_v6 = vrot.slane %v2207_v29, %v5057_v10  ;;  %v2383_v29 = vmul.f32 %v5779_v35, %v5779_v35 }
 0x36b   :  { %2401 = vadd.xlane.f32.xlu0 %v2377_v17  ;;  %v2300_v36 = vadd.f32 %v2256_v6, %v5655_v37  ;;  %v2304_v17 = vadd.f32 %v2272_v54, %v5663_v23  ;;  %v2376_v37 = vmul.f32 %v5767_v44, %v5767_v44  ;;  %v297_v23 = vmul.f32 %v5081_v39, %v5081_v39 }
 0x36c   :  { %v298_v39 = vmul.f32 %v5087_v47, %v5087_v47  ;;  %v342_v6 = vsel %vm311_vm0, %v305_v11, 0.0  ;;  %v306_v47 = vmul.f32 %v5158_v56, %v5158_v56  ;;  %v301_v54 = vmul.f32 %v5115_v14, %v5115_v14  ;;  %v1740_v11 = vld [vmem:[#allocation2 + $0x90] sm:$0xff] }
 0x36d   :  { %2403 = vadd.xlane.f32.xlu1 %v2378_v38  ;;  %v5785_v20 = vadd.f32 %v2300_v36, %v5601_v59  ;;  %v5792_v38 = vadd.f32 %v2304_v17, %v5601_v59  ;;  %v303_v59 = vmul.f32 %v5138_v33, %v5138_v33  ;;  %v339_v33 = vsel %vm311_vm0, %v304_v60, 0.0  ;;  %v1744_v60 = vld [vmem:[#allocation2 + $0xb0] sm:$0xff] }
 0x36e   :  { %v321_v62 = vsel %vm311_vm0, %v298_v39, 0.0  ;;  %v345_v36 = vsel %vm311_vm0, %v306_v47, 0.0  ;;  %v330_v56 = vsel %vm311_vm0, %v301_v54, 0.0  ;;  %v302_v17 = vmul.f32 %v5124_v24, %v5124_v24  ;;  %v1753_v24 = vld [vmem:[#allocation2 + $0xf8] sm:$0xff]  ;;  %v1743_v39 = vld [vmem:[#allocation2 + $0xa8] sm:$0xff]  ;;  %v5849_v47 = vpop.xlane.xlu1 %316 }
 0x36f   :  { %2391 = vadd.xlane.f32.xlu0 %v2372_v53  ;;  %v2380_v2 = vmul.f32 %v5785_v20, %v5785_v20  ;;  %v2384_v53 = vmul.f32 %v5792_v38, %v5792_v38  ;;  %v336_v45 = vsel %vm311_vm0, %v303_v59, 0.0  ;;  %v309_v14 = vmul.f32 %v5177_v15, %v5177_v15  ;;  %4526 = vmatprep.subr.mxu1 %v1753_v24  ;;  %v1751_v59 = vld [vmem:[#allocation2 + $0xe8] sm:$0xff]  ;;  %v1750_v15 = vld [vmem:[#allocation2 + $0xe0] sm:$0xff] }
 0x370   :  { %v333_v61 = vsel %vm311_vm0, %v302_v17, 0.0  ;;  %4527 = vmatpush3.msra.mxu1 %v1753_v24  ;;  %vm361_vm2 = vcmp.le.f32.partialorder %v5849_v47, 36.0 }
 0x371   :  { %2405 = vadd.xlane.f32.xlu1 %v2379_v42  ;;  %v318_v42 = vsel %vm311_vm0, %v297_v23, 0.0  ;;  %v1752_v23 = vld [vmem:[#allocation2 + $0xf0] sm:$0xff] }
 0x372   :  { %4528 = vmatprep.subr.mxu1 %v1752_v23 }
 0x373   :  { %2335 = vadd.xlane.f32.xlu0 %v5767_v44  ;;  %4529 = vmatpush3.msra.mxu1 %v1752_v23 }
 0x374   :  { %4530 = vmatprep.subr.mxu1 %v1751_v59 }
 0x375   :  { %2347 = vadd.xlane.f32.xlu1 %v5770_v58  ;;  %4531 = vmatpush3.msra.mxu1 %v1751_v59 }
 0x376   :  { %4532 = vmatprep.subr.mxu1 %v1750_v15 }
 0x377   :  { %2395 = vadd.xlane.f32.xlu0 %v2374_v3  ;;  %v300_v3 = vmul.f32 %v5108_v1, %v5108_v1  ;;  %v308_v1 = vmul.f32 %v5171_v8, %v5171_v8  ;;  %4533 = vmatpush3.msra.mxu1 %v1750_v15 }
 0x379   :  { %2349 = vadd.xlane.f32.xlu1 %v5779_v35  ;;  %v327_v49 = vsel %vm311_vm0, %v300_v3, 0.0 }
 0x37b   :  { %2343 = vadd.xlane.f32.xlu0 %v5785_v20 }
 0x37d   :  { %2409 = vadd.xlane.f32.xlu1 %v2381_v57  ;;  %v348_v57 = vsel %vm311_vm0, %v307_v55, 0.0 }
 0x37f   :  { %2351 = vadd.xlane.f32.xlu0 %v5792_v38 }
 0x381   :  { %2399 = vadd.xlane.f32.xlu1 %v2376_v37  ;;  %v351_v37 = vsel %vm311_vm0, %v308_v1, 0.0 }
 0x383   :  { %2411 = vadd.xlane.f32.xlu0 %v2382_v32  ;;  %v310_v32 = vmul.f32 %v5183_v21, %v5183_v21  ;;  %v1749_v21 = vld [vmem:[#allocation2 + $0xd8] sm:$0xff] }
 0x384   :  { %4534 = vmatprep.subr.mxu1 %v1749_v21 }
 0x385   :  { %2407 = vadd.xlane.f32.xlu1 %v2380_v2  ;;  %v354_v2 = vsel %vm311_vm0, %v309_v14, 0.0  ;;  %v357_v8 = vsel %vm311_vm0, %v310_v32, 0.0  ;;  %4535 = vmatpush3.msra.mxu1 %v1749_v21  ;;  %vm2731_vm0 = vcmask 1042434  }
 0x387   :  { %2413 = vadd.xlane.f32.xlu0 %v2383_v29  ;;  %v1748_v29 = vld [vmem:[#allocation2 + $0xd0] sm:$0xff] }
 0x388   :  { %4536 = vmatprep.subr.mxu1 %v1748_v29 }
 0x389   :  { %2415 = vadd.xlane.f32.xlu1 %v2384_v53  ;;  %4537 = vmatpush3.msra.mxu1 %v1748_v29  ;;  %v1747_v53 = vld [vmem:[#allocation2 + $0xc8] sm:$0xff] }
 0x38a   :  { %4538 = vmatprep.subr.mxu1 %v1747_v53 }
 0x38b   :  { %319 = vadd.xlane.f32.xlu0 %v318_v42  ;;  %4539 = vmatpush3.msra.mxu1 %v1747_v53  ;;  %v1746_v42 = vld [vmem:[#allocation2 + $0xc0] sm:$0xff] }
 0x38c   :  { %4540 = vmatprep.subr.mxu1 %v1746_v42 }
 0x38d   :  { %337 = vadd.xlane.f32.xlu1 %v336_v45  ;;  %4541 = vmatpush3.msra.mxu1 %v1746_v42  ;;  %v1745_v45 = vld [vmem:[#allocation2 + $0xb8] sm:$0xff] }
 0x38e   :  { %4542 = vmatprep.subr.mxu1 %v1745_v45 }
 0x38f   :  { %340 = vadd.xlane.f32.xlu0 %v339_v33  ;;  %4543 = vmatpush3.msra.mxu1 %v1745_v45  ;;  %v1742_v33 = vld [vmem:[#allocation2 + $0xa0] sm:$0xff] }
 0x390   :  { %4544 = vmatprep.subr.mxu1 %v1744_v60 }
 0x391   :  { %322 = vadd.xlane.f32.xlu1 %v321_v62  ;;  %4545 = vmatpush3.msra.mxu1 %v1744_v60  ;;  %v1741_v62 = vld [vmem:[#allocation2 + $0x98] sm:$0xff]  ;;  %v6832_v60 = vsub.s32 5, %v5046_v4 }
 0x392   :  { %4546 = vmatprep.subr.mxu1 %v1743_v39 }
 0x393   :  { %343 = vadd.xlane.f32.xlu0 %v342_v6  ;;  %4547 = vmatpush3.msra.mxu1 %v1743_v39  ;;  %v1738_v6 = vld [vmem:[#allocation2 + $0x80] sm:$0xff] }
 0x394   :  { %4548 = vmatprep.subr.mxu1 %v1742_v33 }
 0x395   :  { %325 = vadd.xlane.f32.xlu1 %v324_v41  ;;  %4549 = vmatpush3.msra.mxu1 %v1742_v33  ;;  %v5847_v41 = vpop.xlane.xlu0 %313 }
 0x396   :  { %4550 = vmatprep.subr.mxu1 %v1741_v62  ;;  %vm360_vm1 = vcmp.le.f32.partialorder %v5847_v41, 36.0 }
 0x397   :  { %346 = vadd.xlane.f32.xlu0 %v345_v36  ;;  %4551 = vmatpush3.msra.mxu1 %v1741_v62 }
 0x398   :  { %4552 = vmatprep.subr.mxu1 %v1740_v11 }
 0x399   :  { %328 = vadd.xlane.f32.xlu1 %v327_v49  ;;  %4553 = vmatpush3.msra.mxu1 %v1740_v11 }
 0x39a   :  { %4554 = vmatprep.subr.mxu1 %v1739_v52 }
 0x39b   :  { %349 = vadd.xlane.f32.xlu0 %v348_v57  ;;  %4555 = vmatpush3.msra.mxu1 %v1739_v52 }
 0x39c   :  { %4556 = vmatprep.subr.mxu1 %v1738_v6 }
 0x39d   :  { %331 = vadd.xlane.f32.xlu1 %v330_v56  ;;  %4557 = vmatpush3.msra.mxu1 %v1738_v6 }
 0x39f   :  { %352 = vadd.xlane.f32.xlu0 %v351_v37 }
 0x3a1   :  { %334 = vadd.xlane.f32.xlu1 %v333_v61 }
 0x3a3   :  { %355 = vadd.xlane.f32.xlu0 %v354_v2 }
 0x3a5   :  { %358 = vadd.xlane.f32.xlu1 %v357_v8 }
 0x3d4   :  { %v2322_v3 = vpop.xlane.xlu0 %2321 }
 0x3d5   :  { %v2353_v49 = vmul.f32 0.0078125, %v2322_v3  ;;  %v6831_v3 = vsub.s32 6, %v5046_v4 }
 0x3d6   :  { %v2324_v36 = vpop.xlane.xlu1 %2323 }
 0x3d7   :  { %v2433_v57 = vmul.f32 %v2353_v49, %v2353_v49  ;;  %v2354_v56 = vmul.f32 0.0078125, %v2324_v36 }
 0x3d8   :  { %v2326_v55 = vpop.xlane.xlu0 %2325 }
 0x3d9   :  { %v2434_v14 = vmul.f32 %v2354_v56, %v2354_v56  ;;  %v5853_v42 = vmul.f32 0.0078125, %v2326_v55 }
 0x3da   :  { %v2386_v54 = vpop.xlane.xlu1 %2385 }
 0x3db   :  { %v2417_v1 = vmul.f32 0.0078125, %v2386_v54  ;;  %v2435_v62 = vmul.f32 %v5853_v42, %v5853_v42 }
 0x3dc   :  { %v2388_v37 = vpop.xlane.xlu0 %2387 }
 0x3dd   :  { %v2449_v17 = vsub.f32 %v2417_v1, %v2433_v57  ;;  %v2418_v2 = vmul.f32 0.0078125, %v2388_v37  ;;  %v2481_v1 = vsub.f32 %v5680_v28, %v2353_v49  ;;  %v2482_v49 = vsub.f32 %v5683_v46, %v2354_v56 }
 0x3de   :  { %v2330_v61 = vpop.xlane.xlu1 %2329 }
 0x3df   :  { %v2465_v32 = vmax.f32 %v2449_v17, 0.0  ;;  %v2450_v24 = vsub.f32 %v2418_v2, %v2434_v14  ;;  %v5855_v45 = vmul.f32 0.0078125, %v2330_v61  ;;  %v5869_v17 = vrot.slane %v5582_v19, %v6832_v60 }
 0x3e0   :  { %v5851_v23 = vpop.xlane.xlu0 %2331 }
 0x3e1   :  { %v2497_v8 = vadd.f32 1e-05, %v2465_v32  ;;  %v2466_v15 = vmax.f32 %v2450_v24, 0.0  ;;  %v2437_v11 = vmul.f32 %v5855_v45, %v5855_v45  ;;  %v5874_v32 = vrot.slane %v5582_v19, %v6831_v3 }
 0x3e2   :  { %v2338_v59 = vpop.xlane.xlu1 %2337 }
 0x3e3   :  { %4722 = vrsqrt.f32 %v2497_v8  ;;  %v2498_v21 = vadd.f32 1e-05, %v2466_v15  ;;  %v5876_v8 = vmul.f32 0.0078125, %v2338_v59 }
 0x3e4   :  { %v2334_v29 = vpop.xlane.xlu0 %2333 }
 0x3e5   :  { %4724 = vrsqrt.f32 %v2498_v21  ;;  %v2441_v59 = vmul.f32 %v5876_v8, %v5876_v8 }
 0x3e6   :  { %v2328_v53 = vpop.xlane.xlu1 %2327 }
 0x3e8   :  { %v2394_v39 = vpop.xlane.xlu0 %2393 }
 0x3e9   :  { %v2421_v52 = vmul.f32 0.0078125, %v2394_v39 }
 0x3ea   :  { %v2390_v33 = vpop.xlane.xlu1 %2389 }
 0x3eb   :  { %v2419_v6 = vmul.f32 0.0078125, %v2390_v33  ;;  %v2453_v36 = vsub.f32 %v2421_v52, %v2437_v11  ;;  %v5886_v52 = vmul.f32 0.0078125, %v2334_v29 }
 0x3ec   :  { %v2340_v54 = vpop.xlane.xlu0 %2339 }
 0x3ed   :  { %v2451_v55 = vsub.f32 %v2419_v6, %v2435_v62  ;;  %v2469_v37 = vmax.f32 %v2453_v36, 0.0  ;;  %v5878_v24 = vmul.f32 0.0078125, %v2340_v54  ;;  %v5888_v6 = vmul.f32 0.0078125, %v2328_v53 }
 0x3ee   :  { %v5863_v57 = vpop.xlane.xlu1 %2345  ;;  %v5898_v53 = vsel %vm360_vm1, 1.0, %v6850_v40  ;;  %vm2733_vm1 = vcmask 1043459  }
 0x3ef   :  { %v2467_v14 = vmax.f32 %v2451_v55, 0.0  ;;  %v2501_v39 = vadd.f32 1e-05, %v2469_v37  ;;  %v2442_v46 = vmul.f32 %v5878_v24, %v5878_v24  ;;  %6860 = vst [vmem:[#allocation27_spill] sm:$0xff] %v5898_v53 }
 0x3f0   :  { %v4723_v61 = vpop.eup %4722  ;;  %v2342_v15 = vpop.xlane.xlu0 %2341 }
 0x3f1   :  { %v2529_v2 = vmul.f32 %v4723_v61, %v2481_v1  ;;  %v2499_v62 = vadd.f32 1e-05, %v2467_v14  ;;  %4726 = vrsqrt.f32 %v2501_v39  ;;  %v5893_v61 = vmul.f32 0.0078125, %v2342_v15 }
 0x3f2   :  { %v2398_v28 = vpop.xlane.xlu1 %2397  ;;  %v4725_v33 = vpop.eup %4724 }
 0x3f3   :  { %v2549_v21 = vmul.f32 %v5869_v17, %v2529_v2  ;;  %v2530_v19 = vmul.f32 %v4725_v33, %v2482_v49  ;;  %4728 = vrsqrt.f32 %v2499_v62  ;;  %v2423_v14 = vmul.f32 0.0078125, %v2398_v28 }
 0x3f4   :  { %v2402_v56 = vpop.xlane.xlu0 %2401  ;;  %v2439_v49 = vmul.f32 %v5886_v52, %v5886_v52  ;;  %v2443_v41 = vmul.f32 %v5893_v61, %v5893_v61 }
 0x3f5   :  { %v2569_v11 = vadd.f32 %v5874_v32, %v2549_v21  ;;  %v2425_v54 = vmul.f32 0.0078125, %v2402_v56  ;;  %v2550_v37 = vmul.f32 %v5869_v17, %v2530_v19  ;;  %v2436_v21 = vmul.f32 %v5888_v6, %v5888_v6 }
 0x3f6   :  { %v2404_v36 = vpop.xlane.xlu1 %2403 }
 0x3f7   :  { %v2585_v55 = vmax.f32 %v2569_v11, 0.0  ;;  %v2426_v1 = vmul.f32 0.0078125, %v2404_v36  ;;  %v2457_v2 = vsub.f32 %v2425_v54, %v2441_v59  ;;  %v2570_v19 = vadd.f32 %v5874_v32, %v2550_v37 }
 0x3f8   :  { %v2392_v39 = vpop.xlane.xlu0 %2391 }
 0x3f9   :  { %v2458_v29 = vsub.f32 %v2426_v1, %v2442_v46  ;;  %v2473_v11 = vmax.f32 %v2457_v2, 0.0  ;;  %v2420_v15 = vmul.f32 0.0078125, %v2392_v39  ;;  %v2601_v28 = vmul.f32 %v5898_v53, %v2585_v55 }
 0x3fa   :  { %v2406_v33 = vpop.xlane.xlu1 %2405  ;;  %v2455_v46 = vsub.f32 %v2423_v14, %v2439_v49  ;;  %v5909_v1 = vmul.f32 0.0078125, %v5851_v23  ;;  %v2586_v37 = vmax.f32 %v2570_v19, 0.0  ;;  %v5913_v14 = vsel %vm361_vm2, 1.0, %v6850_v40 }
 0x3fb   :  { %v2474_v62 = vmax.f32 %v2458_v29, 0.0  ;;  %v2427_v59 = vmul.f32 0.0078125, %v2406_v33  ;;  %v2505_v56 = vadd.f32 1e-05, %v2473_v11  ;;  %v2452_v54 = vsub.f32 %v2420_v15, %v2436_v21  ;;  %6861 = vst [vmem:[#allocation28_spill] sm:$0xff] %v5913_v14 }
 0x3fc   :  { %v2336_v60 = vpop.xlane.xlu0 %2335  ;;  %v2617_v29 = vrot.slane %v2601_v28, 4  ;;  %v2471_v53 = vmax.f32 %v2455_v46, 0.0  ;;  %v2438_v23 = vmul.f32 %v5909_v1, %v5909_v1  ;;  %v2485_v46 = vsub.f32 %v5700_v30, %v5855_v45 }
 0x3fd   :  { %v2506_v36 = vadd.f32 1e-05, %v2474_v62  ;;  %v2459_v3 = vsub.f32 %v2427_v59, %v2443_v41  ;;  %4730 = vrsqrt.f32 %v2505_v56  ;;  %v2468_v55 = vmax.f32 %v2452_v54, 0.0 }
 0x3fe   :  { %v2348_v2 = vpop.xlane.xlu1 %2347  ;;  %v5918_v62 = vmul.f32 0.0078125, %v5863_v57  ;;  %v2618_v15 = vadd.f32 %v2617_v29, %v2601_v28  ;;  %v4727_v19 = vpop.eup %4726  ;;  %v2483_v59 = vsub.f32 %v5689_v48, %v5853_v42  ;;  %v2503_v56 = vadd.f32 1e-05, %v2471_v53 }
 0x3ff   :  { %4732 = vrsqrt.f32 %v2506_v36  ;;  %v2475_v39 = vmax.f32 %v2459_v3, 0.0  ;;  %v2500_v33 = vadd.f32 1e-05, %v2468_v55  ;;  %v2602_v3 = vmul.f32 %v5913_v14, %v2586_v37 }
 0x400   :  { %v2396_v21 = vpop.xlane.xlu0 %2395  ;;  %v4729_v41 = vpop.eup %4728  ;;  %v2489_v54 = vsub.f32 %v5712_v16, %v5876_v8  ;;  %v2484_v55 = vsub.f32 %v5724_v9, %v5888_v6  ;;  %v2445_v48 = vmul.f32 %v5918_v62, %v5918_v62  ;;  %v2619_v45 = vrot.slane %v2618_v15, 2 }
 0x401   :  { %v2507_v49 = vadd.f32 1e-05, %v2475_v39  ;;  %4734 = vrsqrt.f32 %v2500_v33  ;;  %v2422_v47 = vmul.f32 0.0078125, %v2396_v21  ;;  %v5935_v53 = vmul.f32 0.0078125, %v2336_v60 }
 0x402   :  { %v2350_v11 = vpop.xlane.xlu1 %2349  ;;  %v2531_v39 = vmul.f32 %v4729_v41, %v2483_v59  ;;  %v2533_v33 = vmul.f32 %v4727_v19, %v2485_v46  ;;  %v5937_v16 = vmul.f32 0.0078125, %v2348_v2  ;;  %v2490_v9 = vsub.f32 %v5736_v26, %v5878_v24 }
 0x403   :  { %4736 = vrsqrt.f32 %v2507_v49  ;;  %v2454_v36 = vsub.f32 %v2422_v47, %v2438_v23  ;;  %v2623_v23 = vrot.slane %v2602_v3, 4  ;;  %v2491_v21 = vsub.f32 %v5748_v5, %v5893_v61 }
 0x404   :  { %v2344_v29 = vpop.xlane.xlu0 %2343  ;;  %4738 = vrsqrt.f32 %v2503_v56  ;;  %v5945_v47 = vmul.f32 0.0078125, %v2350_v11  ;;  %v2620_v59 = vadd.f32 %v2619_v45, %v2618_v15  ;;  %v2440_v56 = vmul.f32 %v5935_v53, %v5935_v53 }
 0x405   :  { %v2470_v30 = vmax.f32 %v2454_v36, 0.0  ;;  %v5947_v19 = vmul.f32 0.0078125, %v2344_v29  ;;  %v2551_v26 = vmul.f32 %v5869_v17, %v2531_v39  ;;  %v2553_v24 = vmul.f32 %v5869_v17, %v2533_v33 }
 0x406   :  { %v2410_v37 = vpop.xlane.xlu1 %2409  ;;  %v2624_v36 = vadd.f32 %v2623_v23, %v2602_v3  ;;  %v2446_v61 = vmul.f32 %v5937_v16, %v5937_v16  ;;  %v5961_v29 = vmul.f32 %v5945_v47, %v5945_v47 }
 0x407   :  { %v2429_v42 = vmul.f32 0.0078125, %v2410_v37  ;;  %v2502_v8 = vadd.f32 1e-05, %v2470_v30  ;;  %v2444_v39 = vmul.f32 %v5947_v19, %v5947_v19  ;;  %v2571_v5 = vadd.f32 %v5874_v32, %v2551_v26 }
 0x408   :  { %v2352_v60 = vpop.xlane.xlu0 %2351  ;;  %v5968_v11 = vadd.f32 %v5874_v32, %v2553_v24  ;;  %v2625_v6 = vrot.slane %v2624_v36, 2 }
 0x409   :  { %v2461_v49 = vsub.f32 %v2429_v42, %v2445_v48  ;;  %4740 = vrsqrt.f32 %v2502_v8  ;;  %v2621_v8 = vrot.slane %v2620_v59, 1  ;;  %v5970_v57 = vmul.f32 0.0078125, %v2352_v60 }
 0x40a   :  { %v2400_v41 = vpop.xlane.xlu1 %2399  ;;  %v4731_v46 = vpop.eup %4730 }
 0x40b   :  { %v2477_v2 = vmax.f32 %v2461_v49, 0.0  ;;  %v2424_v48 = vmul.f32 0.0078125, %v2400_v41  ;;  %v2537_v45 = vmul.f32 %v4731_v46, %v2489_v54  ;;  %v5976_v7 = vadd.f32 %v2621_v8, %v2620_v59 }
 0x40c   :  { %v4733_v37 = vpop.eup %4732  ;;  %v2412_v30 = vpop.xlane.xlu0 %2411 }
 0x40d   :  { %v2509_v15 = vadd.f32 1e-05, %v2477_v2  ;;  %v2538_v3 = vmul.f32 %v4733_v37, %v2490_v9  ;;  %v2430_v33 = vmul.f32 0.0078125, %v2412_v30  ;;  %v2557_v2 = vmul.f32 %v5869_v17, %v2537_v45 }
 0x40e   :  { %v2408_v42 = vpop.xlane.xlu1 %2407  ;;  %v4735_v49 = vpop.eup %4734  ;;  %v2456_v46 = vsub.f32 %v2424_v48, %v2440_v56  ;;  %v2448_v56 = vmul.f32 %v5970_v57, %v5970_v57 }
 0x40f   :  { %v2428_v23 = vmul.f32 0.0078125, %v2408_v42  ;;  %4742 = vrsqrt.f32 %v2509_v15  ;;  %v2532_v9 = vmul.f32 %v4735_v49, %v2484_v55  ;;  %v2462_v37 = vsub.f32 %v2430_v33, %v2446_v61 }
 0x410   :  { %v4737_v41 = vpop.eup %4736  ;;  %v2414_v30 = vpop.xlane.xlu0 %2413  ;;  %v2577_v28 = vadd.f32 %v5874_v32, %v2557_v2  ;;  %v2558_v26 = vmul.f32 %v5869_v17, %v2538_v3  ;;  %v2587_v15 = vmax.f32 %v2571_v5, 0.0  ;;  %v2589_v55 = vmax.f32 %v5968_v11, 0.0 }
 0x411   :  { %v2460_v54 = vsub.f32 %v2428_v23, %v2444_v39  ;;  %v2431_v14 = vmul.f32 0.0078125, %v2414_v30  ;;  %v2552_v60 = vmul.f32 %v5869_v17, %v2532_v9  ;;  %v2539_v39 = vmul.f32 %v4737_v41, %v2491_v21  ;;  %v4739_v3 = vpop.eup %4738 }
 0x412   :  { %v2416_v42 = vpop.xlane.xlu1 %2415  ;;  %v5982_v33 = vadd.f32 %v2625_v6, %v2624_v36  ;;  %v2472_v23 = vmax.f32 %v2456_v46, 0.0  ;;  %v2478_v49 = vmax.f32 %v2462_v37, 0.0  ;;  %v2578_v5 = vadd.f32 %v5874_v32, %v2558_v26 }
 0x413   :  { %v2476_v24 = vmax.f32 %v2460_v54, 0.0  ;;  %v2432_v48 = vmul.f32 0.0078125, %v2416_v42  ;;  %v2593_v54 = vmax.f32 %v2577_v28, 0.0  ;;  %v2463_v8 = vsub.f32 %v2431_v14, %v5961_v29 }
 0x414   :  { %v320_v2 = vpop.xlane.xlu0 %319  ;;  %v2572_v21 = vadd.f32 %v5874_v32, %v2552_v60  ;;  %v2559_v36 = vmul.f32 %v5869_v17, %v2539_v39  ;;  %v6862_v14 = vsub.f32 %v5721_v18, %v5886_v52  ;;  %v2504_v30 = vadd.f32 1e-05, %v2472_v23 }
 0x415   :  { %v2508_v61 = vadd.f32 1e-05, %v2476_v24  ;;  %vm362_vm3 = vcmp.le.f32.partialorder %v320_v2, 36.0  ;;  %v2464_v28 = vsub.f32 %v2432_v48, %v2448_v56  ;;  %v2510_v42 = vadd.f32 1e-05, %v2478_v49 }
 0x416   :  { %v338_v59 = vpop.xlane.xlu1 %337  ;;  %v4741_v41 = vpop.eup %4740  ;;  %v5988_v9 = vsel %vm362_vm3, 1.0, %v6850_v40  ;;  %v2535_v29 = vmul.f32 %v4739_v3, %v6862_v14  ;;  %v2594_v24 = vmax.f32 %v2578_v5, 0.0  ;;  %v2588_v56 = vmax.f32 %v2572_v21, 0.0 }
 0x417   :  { %vm368_vm4 = vcmp.le.f32.partialorder %v338_v59, 36.0  ;;  %4744 = vrsqrt.f32 %v2508_v61  ;;  %v2603_v46 = vmul.f32 %v5988_v9, %v2587_v15  ;;  %v6863_v61 = vsub.f32 %v5709_v22, %v5909_v1 }
 0x418   :  { %v5991_v6 = vsel %vm368_vm4, 1.0, %v6850_v40  ;;  %v341_v26 = vpop.xlane.xlu0 %340  ;;  %v2479_v59 = vmax.f32 %v2463_v8, 0.0  ;;  %v2579_v18 = vadd.f32 %v5874_v32, %v2559_v36  ;;  %v2480_v52 = vmax.f32 %v2464_v28, 0.0 }
 0x419   :  { %v2609_v37 = vmul.f32 %v5991_v6, %v2593_v54  ;;  %v2534_v2 = vmul.f32 %v4741_v41, %v6863_v61  ;;  %v2629_v39 = vrot.slane %v2603_v46, 4  ;;  %vm369_vm5 = vcmp.le.f32.partialorder %v341_v26, 36.0 }
 0x41a   :  { %v323_v60 = vpop.xlane.xlu1 %322  ;;  %v6003_v48 = vsel %vm369_vm5, 1.0, %v6850_v40  ;;  %4746 = vrsqrt.f32 %v2504_v30  ;;  %v2627_v21 = vrot.slane %v5982_v33, 1  ;;  %v2511_v41 = vadd.f32 1e-05, %v2479_v59 }
 0x41b   :  { %v2665_v15 = vrot.slane %v2609_v37, 4  ;;  %vm363_vm6 = vcmp.le.f32.partialorder %v323_v60, 36.0  ;;  %v2630_v3 = vadd.f32 %v2629_v39, %v2603_v46  ;;  %v2610_v23 = vmul.f32 %v6003_v48, %v2594_v24 }
 0x41c   :  { %v6008_v49 = vsel %vm363_vm6, 1.0, %v6850_v40  ;;  %v4743_v22 = vpop.eup %4742  ;;  %v344_v54 = vpop.xlane.xlu0 %343  ;;  %v2554_v8 = vmul.f32 %v5869_v17, %v2534_v2  ;;  %4748 = vrsqrt.f32 %v2510_v42  ;;  %v2595_v14 = vmax.f32 %v2579_v18, 0.0 }
 0x41d   :  { %v2604_v1 = vmul.f32 %v6008_v49, %v2588_v56  ;;  %v2671_v36 = vrot.slane %v2610_v23, 4  ;;  %vm370_vm8 = vcmp.le.f32.partialorder %v344_v54, 36.0  ;;  %v2666_v28 = vadd.f32 %v2665_v15, %v2609_v37 }
 0x41e   :  { %v326_v5 = vpop.xlane.xlu1 %325  ;;  %v6014_v46 = vsel %vm370_vm8, 1.0, %v6850_v40  ;;  %v2512_v26 = vadd.f32 1e-05, %v2480_v52  ;;  %v2631_v30 = vrot.slane %v2630_v3, 2  ;;  %v6865_v60 = vsub.f32 %v5739_v51, %v5918_v62 }
 0x41f   :  { %6864 = vst [vmem:[#allocation29_spill] sm:$0xff] %v6014_v46  ;;  %vm364_vm9 = vcmp.le.f32.partialorder %v326_v5, 36.0  ;;  %v2635_v24 = vrot.slane %v2604_v1, 4  ;;  %v2672_v2 = vadd.f32 %v2671_v36, %v2610_v23  ;;  %v2611_v39 = vmul.f32 %v6014_v46, %v2595_v14 }
 0x420   :  { %v2541_v61 = vmul.f32 %v4743_v22, %v6865_v60  ;;  %v6021_v42 = vsel %vm364_vm9, 1.0, %v6850_v40  ;;  %v347_v59 = vpop.xlane.xlu0 %346  ;;  %v2574_v37 = vadd.f32 %v5874_v32, %v2554_v8  ;;  %v2492_v15 = vsub.f32 %v5785_v20, %v5947_v19 }
 0x421   :  { %v2555_v52 = vmul.f32 %v5869_v17, %v2535_v29  ;;  %v2628_v51 = vadd.f32 %v2627_v21, %v5982_v33  ;;  %4750 = vrsqrt.f32 %v2511_v41  ;;  %v2667_v62 = vrot.slane %v2666_v28, 2 }
 0x422   :  { %v329_v56 = vpop.xlane.xlu1 %328  ;;  %v2605_v23 = vmul.f32 %v6021_v42, %v2589_v55  ;;  %4752 = vrsqrt.f32 %v2512_v26  ;;  %v2632_v54 = vadd.f32 %v2631_v30, %v2630_v3  ;;  %v2636_v5 = vadd.f32 %v2635_v24, %v2604_v1 }
 0x423   :  { %vm365_vm10 = vcmp.le.f32.partialorder %v329_v56, 36.0  ;;  %v2561_v20 = vmul.f32 %v5869_v17, %v2541_v61  ;;  %v2673_v19 = vrot.slane %v2672_v2, 2  ;;  %v2677_v8 = vrot.slane %v2611_v39, 4 }
 0x424   :  { %v4745_v22 = vpop.eup %4744  ;;  %v2590_v14 = vmax.f32 %v2574_v37, 0.0  ;;  %v350_v29 = vpop.xlane.xlu0 %349  ;;  %v2641_v60 = vrot.slane %v2605_v23, 4  ;;  %v6035_v33 = vsel %vm365_vm10, 1.0, %v6850_v40  ;;  %v2575_v11 = vadd.f32 %v5874_v32, %v2555_v52 }
 0x425   :  { %v2540_v36 = vmul.f32 %v4745_v22, %v2492_v15  ;;  %6866 = vst [vmem:[#allocation30_spill] sm:$0xff] %v6035_v33  ;;  %vm372_vm11 = vcmp.le.f32.partialorder %v350_v29, 36.0  ;;  %v2668_v55 = vadd.f32 %v2667_v62, %v2666_v28  ;;  %v6042_v41 = vsel %vm2729_vm7, %v2628_v51, %v5976_v7 }
 0x426   :  { %v2606_v3 = vmul.f32 %v6035_v33, %v2590_v14  ;;  %v332_v1 = vpop.xlane.xlu1 %331  ;;  %v2633_v26 = vrot.slane %v2632_v54, 1  ;;  %v2637_v30 = vrot.slane %v2636_v5, 2  ;;  %vm371_vm12 = vcmp.le.f32.partialorder %v347_v59, 36.0 }
 0x427   :  { %v2560_v21 = vmul.f32 %v5869_v17, %v2540_v36  ;;  %v2581_v24 = vadd.f32 %v5874_v32, %v2561_v20  ;;  %v2674_v61 = vadd.f32 %v2673_v19, %v2672_v2  ;;  %v2678_v37 = vadd.f32 %v2677_v8, %v2611_v39  ;;  %v4747_v15 = vpop.eup %4746 }
 0x428   :  { %v6047_v28 = vsel %vm372_vm11, 1.0, %v6850_v40  ;;  %v2642_v52 = vadd.f32 %v2641_v60, %v2605_v23  ;;  %v2591_v22 = vmax.f32 %v2575_v11, 0.0  ;;  %vm366_vm13 = vcmp.le.f32.partialorder %v332_v1, 36.0 }
 0x429   :  { %v2580_v56 = vadd.f32 %v5874_v32, %v2560_v21  ;;  %6867 = vst [vmem:[#allocation31_spill] sm:$0xff] %v6047_v28  ;;  %v2597_v62 = vmax.f32 %v2581_v24, 0.0  ;;  %v4749_v36 = vpop.eup %4748  ;;  %v2669_v7 = vrot.slane %v2668_v55, 1  ;;  %v2647_v14 = vrot.slane %v2606_v3, 4  ;;  %v353_v21 = vpop.xlane.xlu0 %352 }
 0x42a   :  { %v6050_v29 = vsel %vm366_vm13, 1.0, %v6850_v40  ;;  %v6052_v20 = vadd.f32 %v2637_v30, %v2636_v5  ;;  %v6056_v2 = vsel %vm371_vm12, 1.0, %v6850_v40  ;;  %v6060_v19 = vadd.f32 %v2633_v26, %v2632_v54  ;;  %v335_v30 = vpop.xlane.xlu1 %334 }
 0x42b   :  { %v2596_v51 = vmax.f32 %v2580_v56, 0.0  ;;  %6868 = vst [vmem:[#allocation32_spill] sm:$0xff] %v6056_v2  ;;  %v2613_v39 = vmul.f32 %v6047_v28, %v2597_v62  ;;  %v2607_v23 = vmul.f32 %v6050_v29, %v2591_v22  ;;  %v2675_v8 = vrot.slane %v2674_v61, 1 }
 0x42c   :  { %v2679_v60 = vrot.slane %v2678_v37, 2  ;;  %v2643_v1 = vrot.slane %v2642_v52, 2  ;;  %v6869_v5 = vsub.f32 %v5770_v58, %v5937_v16  ;;  %v6066_v18 = vadd.f32 %v2669_v7, %v2668_v55 }
 0x42d   :  { %v2612_v11 = vmul.f32 %v6056_v2, %v2596_v51  ;;  %v2689_v24 = vrot.slane %v2613_v39, 4  ;;  %v2653_v56 = vrot.slane %v2607_v23, 4  ;;  %v2648_v45 = vadd.f32 %v2647_v14, %v2606_v3 }
 0x42e   :  { %v2542_v59 = vmul.f32 %v4749_v36, %v6869_v5  ;;  %v6870_v54 = vsub.f32 %v5767_v44, %v5935_v53  ;;  %v4751_v22 = vpop.eup %4750  ;;  %v2639_v51 = vrot.slane %v6052_v20, 1  ;;  %vm373_vm14 = vcmp.le.f32.partialorder %v353_v21, 36.0 }
 0x42f   :  { %v2683_v62 = vrot.slane %v2612_v11, 4  ;;  %v2654_v2 = vadd.f32 %v2653_v56, %v2607_v23  ;;  %v4753_v33 = vpop.eup %4752  ;;  %v2680_v46 = vadd.f32 %v2679_v60, %v2678_v37  ;;  %vm367_vm15 = vcmp.le.f32.partialorder %v335_v30, 36.0  ;;  %v356_v23 = vpop.xlane.xlu0 %355 }
 0x430   :  { %v2536_v26 = vmul.f32 %v4747_v15, %v6870_v54  ;;  %v2562_v28 = vmul.f32 %v5869_v17, %v2542_v59  ;;  %v2676_v55 = vadd.f32 %v2675_v8, %v2674_v61  ;;  %v2644_v36 = vadd.f32 %v2643_v1, %v2642_v52 }
 0x431   :  { %v2684_v58 = vadd.f32 %v2683_v62, %v2612_v11  ;;  %v2690_v3 = vadd.f32 %v2689_v24, %v2613_v39  ;;  %v2649_v53 = vrot.slane %v2648_v45, 2  ;;  %v6076_v15 = vsel %vm373_vm14, 1.0, %v6850_v40  ;;  %v359_v39 = vpop.xlane.xlu1 %358 }
 0x432   :  { %v2556_v16 = vmul.f32 %v5869_v17, %v2536_v26  ;;  %v2582_v7 = vadd.f32 %v5874_v32, %v2562_v28  ;;  %v2655_v21 = vrot.slane %v2654_v2, 2  ;;  %v6080_v60 = vsel %vm367_vm15, 1.0, %v6850_v40 }
 0x433   :  { %v2685_v44 = vrot.slane %v2684_v58, 2  ;;  %v6871_v61 = vsub.f32 %v5779_v35, %v5945_v47  ;;  %v2681_v28 = vrot.slane %v2680_v46, 1  ;;  %v6872_v1 = vsub.f32 %v5792_v38, %v5970_v57 }
 0x434   :  { %v2576_v14 = vadd.f32 %v5874_v32, %v2556_v16  ;;  %v2598_v37 = vmax.f32 %v2582_v7, 0.0  ;;  %v2691_v56 = vrot.slane %v2690_v3, 2  ;;  %vm374_vm2 = vcmp.le.f32.partialorder %v356_v23, 36.0 }
 0x435   :  { %v2543_v52 = vmul.f32 %v4751_v22, %v6871_v61  ;;  %v2686_v8 = vadd.f32 %v2685_v44, %v2684_v58  ;;  %v2544_v24 = vmul.f32 %v4753_v33, %v6872_v1  ;;  %v2650_v30 = vadd.f32 %v2649_v53, %v2648_v45 }
 0x436   :  { %v2592_v11 = vmax.f32 %v2576_v14, 0.0  ;;  %v2614_v5 = vmul.f32 %v6076_v15, %v2598_v37  ;;  %vm375_vm3 = vcmp.le.f32.partialorder %v359_v39, 36.0  ;;  %vm2735_vm4 = vcmask 1044484  }
 0x437   :  { %v2563_v59 = vmul.f32 %v5869_v17, %v2543_v52  ;;  %v2564_v35 = vmul.f32 %v5869_v17, %v2544_v24  ;;  %v2645_v47 = vrot.slane %v2644_v36, 1  ;;  %v2656_v54 = vadd.f32 %v2655_v21, %v2654_v2 }
 0x438   :  { %v2608_v62 = vmul.f32 %v6080_v60, %v2592_v11  ;;  %v2695_v26 = vrot.slane %v2614_v5, 4  ;;  %vm2737_vm5 = vcmask 1045509   ;;  %v2687_v38 = vrot.slane %v2686_v8, 1 }
 0x439   :  { %v2583_v22 = vadd.f32 %v5874_v32, %v2563_v59  ;;  %v6094_v33 = vsel %vm374_vm2, 1.0, %v6850_v40  ;;  %v2584_v58 = vadd.f32 %v5874_v32, %v2564_v35  ;;  %vm2739_vm6 = vcmask 1046534  }
 0x43a   :  { %v2659_v57 = vrot.slane %v2608_v62, 4  ;;  %v2692_v45 = vadd.f32 %v2691_v56, %v2690_v3  ;;  %v2696_v16 = vadd.f32 %v2695_v26, %v2614_v5  ;;  %v6098_v17 = vsel %vm375_vm3, 1.0, %v6850_v40 }
 0x43b   :  { %v2599_v7 = vmax.f32 %v2583_v22, 0.0  ;;  %v2640_v2 = vadd.f32 %v2639_v51, %v6052_v20  ;;  %v2651_v44 = vrot.slane %v2650_v30, 1  ;;  %v2600_v14 = vmax.f32 %v2584_v58, 0.0 }
 0x43c   :  { %v2660_v53 = vadd.f32 %v2659_v57, %v2608_v62  ;;  %v2682_v23 = vadd.f32 %v2681_v28, %v2680_v46  ;;  %v2657_v21 = vrot.slane %v2656_v54, 1  ;;  %v2697_v37 = vrot.slane %v2696_v16, 2 }
 0x43d   :  { %v2615_v61 = vmul.f32 %v6094_v33, %v2599_v7  ;;  %v2743_v32 = vsel %vm2729_vm7, %v2676_v55, %v6066_v18  ;;  %v2688_v52 = vadd.f32 %v2687_v38, %v2686_v8  ;;  %v2616_v39 = vmul.f32 %v6098_v17, %v2600_v14 }
 0x43e   :  { %v2661_v3 = vrot.slane %v2660_v53, 2  ;;  %v2646_v11 = vadd.f32 %v2645_v47, %v2644_v36  ;;  %v2693_v1 = vrot.slane %v2692_v45, 1  ;;  %v2698_v24 = vadd.f32 %v2697_v37, %v2696_v16  ;;  %v1877_v37 = vpop.f32.mrf.mxu1 }
 0x43f   :  { %v2701_v56 = vrot.slane %v2615_v61, 4  ;;  %v2652_v20 = vadd.f32 %v2651_v44, %v2650_v30  ;;  %v2707_v5 = vrot.slane %v2616_v39, 4  ;;  %v2732_v46 = vsel %vm2731_vm0, %v6060_v19, %v6042_v41 }
 0x440   :  { %v2662_v51 = vadd.f32 %v2661_v3, %v2660_v53  ;;  %v2744_v28 = vsel %vm2731_vm0, %v2682_v23, %v2743_v32  ;;  %v2658_v62 = vadd.f32 %v2657_v21, %v2656_v54  ;;  %v2734_v18 = vsel %vm2733_vm1, %v2640_v2, %v2732_v46  ;;  %v1763_v46 = vld [vmem:[#allocation2 + $0x140] sm:$0xff] }
 0x441   :  { %v2702_v59 = vadd.f32 %v2701_v56, %v2615_v61  ;;  %v2745_v55 = vsel %vm2733_vm1, %v2688_v52, %v2744_v28  ;;  %v2699_v8 = vrot.slane %v2698_v24, 1  ;;  %v2708_v36 = vadd.f32 %v2707_v5, %v2616_v39  ;;  %v1768_v56 = vld [vmem:[#allocation2 + $0x168] sm:$0xff]  ;;  %v1762_v28 = vld [vmem:[#allocation2 + $0x138] sm:$0xff] }
 0x442   :  { %v2663_v35 = vrot.slane %v2662_v51, 1  ;;  %v2694_v47 = vadd.f32 %v2693_v1, %v2692_v45  ;;  %v2736_v30 = vsel %vm2735_vm4, %v2646_v11, %v2734_v18  ;;  %vm2741_vm8 = vcmask 1047559   ;;  %v1770_v1 = vld [vmem:[#allocation2 + $0x178] sm:$0xff]  ;;  %v1764_v5 = vld [vmem:[#allocation2 + $0x148] sm:$0xff]  ;;  %v1759_v18 = vld [vmem:[#allocation2 + $0x120] sm:$0xff] }
 0x443   :  { %v2703_v26 = vrot.slane %v2702_v59, 2  ;;  %v2709_v22 = vrot.slane %v2708_v36, 2  ;;  %v2738_v41 = vsel %vm2737_vm5, %v2652_v20, %v2736_v30  ;;  %v2700_v58 = vadd.f32 %v2699_v8, %v2698_v24  ;;  %4561 = vmatprep.subr.mxu1 %v1770_v1  ;;  %v1769_v24 = vld [vmem:[#allocation2 + $0x170] sm:$0xff]  ;;  %v1766_v20 = vld [vmem:[#allocation2 + $0x158] sm:$0xff] }
 0x444   :  { %v2664_v38 = vadd.f32 %v2663_v35, %v2662_v51  ;;  %v2740_v57 = vsel %vm2739_vm6, %v2658_v62, %v2738_v41  ;;  %v2746_v54 = vsel %vm2735_vm4, %v2694_v47, %v2745_v55  ;;  %v1765_v51 = vld [vmem:[#allocation2 + $0x150] sm:$0xff]  ;;  %v1760_v62 = vld [vmem:[#allocation2 + $0x128] sm:$0xff]  ;;  %v1758_v55 = vld [vmem:[#allocation2 + $0x118] sm:$0xff] }
 0x445   :  { %v2704_v19 = vadd.f32 %v2703_v26, %v2702_v59  ;;  %v2710_v16 = vadd.f32 %v2709_v22, %v2708_v36  ;;  %v2747_v44 = vsel %vm2737_vm5, %v2700_v58, %v2746_v54  ;;  %v1761_v59 = vld [vmem:[#allocation2 + $0x130] sm:$0xff]  ;;  %v1756_v36 = vld [vmem:[#allocation2 + $0x108] sm:$0xff]  ;;  %v1755_v35 = vld [vmem:[#allocation2 + $0x100] sm:$0xff] }
 0x446   :  { %v2742_v7 = vsel %vm2741_vm8, %v2664_v38, %v2740_v57  ;;  %v1757_v8 = vld [vmem:[#allocation2 + $0x110] sm:$0xff] }
 0x447   :  { %v2705_v2 = vrot.slane %v2704_v19, 1  ;;  %4558 = vmatprep.mubr.f32.mxu1 %v2742_v7  ;;  %v2711_v45 = vrot.slane %v2710_v16, 1 }
 0x449   :  { %v2706_v53 = vadd.f32 %v2705_v2, %v2704_v19  ;;  %v2712_v14 = vadd.f32 %v2711_v45, %v2710_v16 }
 0x44b   :  { %v2748_v23 = vsel %vm2739_vm6, %v2706_v53, %v2747_v44 }
 0x44c   :  { %v2749_v21 = vsel %vm2741_vm8, %v2712_v14, %v2748_v23  ;;  %v6843_v14 = vsub.s32 7, %v5046_v4 }
 0x44d   :  { %4559 = vmatmul.mubr.f32.vlgmr.msra.gmra.mxu1 %v2749_v21  ;;  %v6135_v21 = vld [vmem:[%s6812_s9 + $0x8] sm:$0x7] }
 0x44e   :  { %4562 = vmatpush3.msra.mxu1 %v1770_v1 }
 0x44f   :  { %4563 = vmatprep.subr.mxu1 %v1769_v24 }
 0x450   :  { %4564 = vmatpush3.msra.mxu1 %v1769_v24 }
 0x451   :  { %4565 = vmatprep.subr.mxu1 %v1768_v56 }
 0x452   :  { %4566 = vmatpush3.msra.mxu1 %v1768_v56 }
 0x50d   :  { %v4560_v61 = vpop.f32.mrf.mxu1 }
 0x50e   :  { %v6119_v32 = vadd.f32 %v4560_v61, %v1877_v37  ;;  %v4839_v37 = vld [vmem:[%s6812_s9] sm:$0xff] }
 0x50f   :  { %v2818_v52 = vpop.f32.mrf.mxu1  ;;  %v2860_v61 = vrot.slane %v4839_v37, %v6843_v14  ;;  %v3045_v37 = vld [vmem:[#allocation5 + $0x1a0] sm:$0xff] }
 0x510   :  { %v6122_v3 = vadd.f32 %v2818_v52, %v5415_v31  ;;  %2831 = vadd.xlane.f32.xlu1 %v6119_v32  ;;  %v2836_v39 = vmul.f32 %v6119_v32, %v6119_v32  ;;  %v1767_v31 = vld [vmem:[#allocation2 + $0x160] sm:$0xff] }
 0x511   :  { %4567 = vmatprep.subr.mxu1 %v1767_v31 }
 0x512   :  { %2829 = vadd.xlane.f32.xlu0 %v6122_v3  ;;  %v2835_v11 = vmul.f32 %v6122_v3, %v6122_v3  ;;  %4568 = vmatpush3.msra.mxu1 %v1767_v31 }
 0x513   :  { %4569 = vmatprep.subr.mxu1 %v1766_v20 }
 0x514   :  { %2839 = vadd.xlane.f32.xlu1 %v2836_v39  ;;  %4570 = vmatpush3.msra.mxu1 %v1766_v20 }
 0x515   :  { %4571 = vmatprep.subr.mxu1 %v1765_v51 }
 0x516   :  { %2837 = vadd.xlane.f32.xlu0 %v2835_v11  ;;  %4572 = vmatpush3.msra.mxu1 %v1765_v51 }
 0x517   :  { %4573 = vmatprep.subr.mxu1 %v1764_v5 }
 0x518   :  { %4574 = vmatpush3.msra.mxu1 %v1764_v5 }
 0x519   :  { %4575 = vmatprep.subr.mxu1 %v1763_v46 }
 0x51a   :  { %4576 = vmatpush3.msra.mxu1 %v1763_v46 }
 0x51b   :  { %4577 = vmatprep.subr.mxu1 %v1762_v28 }
 0x51c   :  { %4578 = vmatpush3.msra.mxu1 %v1762_v28 }
 0x51d   :  { %4579 = vmatprep.subr.mxu1 %v1761_v59 }
 0x51e   :  { %4580 = vmatpush3.msra.mxu1 %v1761_v59 }
 0x51f   :  { %4581 = vmatprep.subr.mxu1 %v1760_v62 }
 0x520   :  { %4582 = vmatpush3.msra.mxu1 %v1760_v62 }
 0x521   :  { %4583 = vmatprep.subr.mxu1 %v1759_v18 }
 0x522   :  { %4584 = vmatpush3.msra.mxu1 %v1759_v18  ;;  %v1505_v18 = vmul.f32 %v5613_v27, %v5613_v27 }
 0x523   :  { %4585 = vmatprep.subr.mxu1 %v1758_v55 }
 0x524   :  { %4586 = vmatpush3.msra.mxu1 %v1758_v55  ;;  %v1506_v55 = vmul.f32 %v5611_v34, %v5611_v34 }
 0x525   :  { %4587 = vmatprep.subr.mxu1 %v1757_v8 }
 0x526   :  { %4588 = vmatpush3.msra.mxu1 %v1757_v8  ;;  %v1507_v8 = vmul.f32 %v5617_v63, %v5617_v63 }
 0x527   :  { %4589 = vmatprep.subr.mxu1 %v1756_v36 }
 0x528   :  { %4590 = vmatpush3.msra.mxu1 %v1756_v36  ;;  %v3056_v36 = vld [vmem:[#allocation5 + $0x1f8] sm:$0xff] }
 0x529   :  { %4591 = vmatprep.subr.mxu1 %v1755_v35 }
 0x52a   :  { %4592 = vmatpush3.msra.mxu1 %v1755_v35  ;;  %v1508_v35 = vmul.f32 %v5615_v13, %v5615_v13 }
 0x52b   :  { %3057 = vmatprep.subr.mxu1 %v3056_v36  ;;  %v3037_v36 = vld [vmem:[#allocation5 + $0x160] sm:$0xff] }
 0x599   :  { %v2832_v47 = vpop.xlane.xlu1 %2831 }
 0x59a   :  { %v2834_v26 = vmul.f32 0.0078125, %v2832_v47  ;;  %v3055_v47 = vld [vmem:[#allocation5 + $0x1f0] sm:$0xff] }
 0x59b   :  { %v2830_v30 = vpop.xlane.xlu0 %2829 }
 0x59c   :  { %v2833_v22 = vmul.f32 0.0078125, %v2830_v30  ;;  %v2844_v41 = vmul.f32 %v2834_v26, %v2834_v26  ;;  %v2850_v23 = vsub.f32 %v6119_v32, %v2834_v26  ;;  %v2866_v32 = vrot.slane %v6135_v21, %v5057_v10  ;;  %v3054_v26 = vld [vmem:[#allocation5 + $0x1e8] sm:$0xff]  ;;  %v3053_v30 = vld [vmem:[#allocation5 + $0x1e0] sm:$0xff] }
 0x59d   :  { %v2840_v38 = vpop.xlane.xlu1 %2839 }
 0x59e   :  { %v2842_v19 = vmul.f32 0.0078125, %v2840_v38  ;;  %v2843_v54 = vmul.f32 %v2833_v22, %v2833_v22  ;;  %v2849_v39 = vsub.f32 %v6122_v3, %v2833_v22  ;;  %v3052_v22 = vld [vmem:[#allocation5 + $0x1d8] sm:$0xff]  ;;  %v1509_v38 = vmul.f32 %v5621_v0, %v5621_v0 }
 0x59f   :  { %v2838_v57 = vpop.xlane.xlu0 %2837 }
 0x5a0   :  { %v2846_v58 = vsub.f32 %v2842_v19, %v2844_v41  ;;  %v2841_v16 = vmul.f32 0.0078125, %v2838_v57  ;;  %v3051_v41 = vld [vmem:[#allocation5 + $0x1d0] sm:$0xff]  ;;  %v3050_v19 = vld [vmem:[#allocation5 + $0x1c8] sm:$0xff]  ;;  %v3208_v57 = vld [vmem:[#allocation7 + $0x1f8] sm:$0xff] }
 0x5a1   :  { %3209 = vmatprep.subr.mxu0 %v3208_v57  ;;  %v3192_v57 = vld [vmem:[#allocation7 + $0x178] sm:$0xff] }
 0x5a2   :  { %v2848_v7 = vmax.f32 %v2846_v58, 0.0  ;;  %v2845_v2 = vsub.f32 %v2841_v16, %v2843_v54  ;;  %v3049_v54 = vld [vmem:[#allocation5 + $0x1c0] sm:$0xff]  ;;  %v3207_v58 = vld [vmem:[#allocation7 + $0x1f0] sm:$0xff]  ;;  %v3048_v16 = vld [vmem:[#allocation5 + $0x1b8] sm:$0xff] }
 0x5a3   :  { %3210 = vmatpush1.msra.mxu0 %v3207_v58  ;;  %v3191_v58 = vld [vmem:[#allocation7 + $0x170] sm:$0xff] }
 0x5a4   :  { %v2852_v45 = vadd.f32 1e-05, %v2848_v7  ;;  %v2847_v44 = vmax.f32 %v2845_v2, 0.0  ;;  %v3206_v7 = vld [vmem:[#allocation7 + $0x1e8] sm:$0xff]  ;;  %v1510_v2 = vmul.f32 %v5619_v25, %v5619_v25 }
 0x5a5   :  { %3211 = vmatprep.subr.mxu0 %v3206_v7  ;;  %v3190_v7 = vld [vmem:[#allocation7 + $0x168] sm:$0xff] }
 0x5a6   :  { %4754 = vrsqrt.f32 %v2852_v45  ;;  %v2851_v53 = vadd.f32 1e-05, %v2847_v44  ;;  %v3047_v45 = vld [vmem:[#allocation5 + $0x1b0] sm:$0xff]  ;;  %v3205_v44 = vld [vmem:[#allocation7 + $0x1e0] sm:$0xff] }
 0x5a7   :  { %3212 = vmatpush1.msra.mxu0 %v3205_v44  ;;  %v3031_v44 = vld [vmem:[#allocation5 + $0x130] sm:$0xff] }
 0x5a8   :  { %4756 = vrsqrt.f32 %v2851_v53  ;;  %v3046_v53 = vld [vmem:[#allocation5 + $0x1a8] sm:$0xff] }
 0x5b3   :  { %v4755_v52 = vpop.eup %4754 }
 0x5b4   :  { %v2856_v11 = vmul.f32 %v4755_v52, %v2850_v23  ;;  %v3204_v23 = vld [vmem:[#allocation7 + $0x1d8] sm:$0xff] }
 0x5b5   :  { %v4757_v1 = vpop.eup %4756  ;;  %3213 = vmatprep.subr.mxu0 %v3204_v23  ;;  %v3044_v52 = vld [vmem:[#allocation5 + $0x198] sm:$0xff]  ;;  %v3030_v23 = vld [vmem:[#allocation5 + $0x128] sm:$0xff] }
 0x5b6   :  { %v2855_v24 = vmul.f32 %v4757_v1, %v2849_v39  ;;  %v2862_v56 = vmul.f32 %v2860_v61, %v2856_v11  ;;  %v3202_v39 = vld [vmem:[#allocation7 + $0x1c8] sm:$0xff]  ;;  %v1511_v11 = vmul.f32 %v5625_v50, %v5625_v50  ;;  %v3043_v1 = vld [vmem:[#allocation5 + $0x190] sm:$0xff] }
 0x5b8   :  { %v2861_v31 = vmul.f32 %v2860_v61, %v2855_v24  ;;  %v2868_v20 = vadd.f32 %v2866_v32, %v2862_v56  ;;  %v3203_v61 = vld [vmem:[#allocation7 + $0x1d0] sm:$0xff]  ;;  %v3042_v24 = vld [vmem:[#allocation5 + $0x188] sm:$0xff]  ;;  %v3200_v56 = vld [vmem:[#allocation7 + $0x1b8] sm:$0xff] }
 0x5b9   :  { %3214 = vmatpush1.msra.mxu0 %v3203_v61  ;;  %v3029_v61 = vld [vmem:[#allocation5 + $0x120] sm:$0xff] }
 0x5ba   :  { %v2867_v51 = vadd.f32 %v2866_v32, %v2861_v31  ;;  %v2870_v46 = vmax.f32 %v2868_v20, 0.0  ;;  %v3201_v32 = vld [vmem:[#allocation7 + $0x1c0] sm:$0xff]  ;;  %3215 = vmatprep.subr.mxu0 %v3202_v39  ;;  %v3199_v20 = vld [vmem:[#allocation7 + $0x1b0] sm:$0xff] }
 0x5bb   :  { %v3041_v31 = vld [vmem:[#allocation5 + $0x180] sm:$0xff]  ;;  %3216 = vmatpush1.msra.mxu0 %v3201_v32  ;;  %v3186_v32 = vld [vmem:[#allocation7 + $0x148] sm:$0xff] }
 0x5bc   :  { %v2869_v5 = vmax.f32 %v2867_v51, 0.0  ;;  %v1512_v51 = vmul.f32 %v5623_v12, %v5623_v12  ;;  %3217 = vmatprep.subr.mxu0 %v3200_v56  ;;  %v6875_v39 = vld [vmem:[#allocation21_spill] sm:$0xff] }
 0x5bd   :  { %3218 = vmatpush1.msra.mxu0 %v3199_v20  ;;  %v3185_v56 = vld [vmem:[#allocation7 + $0x140] sm:$0xff]  ;;  %v3184_v20 = vld [vmem:[#allocation7 + $0x138] sm:$0xff] }
 0x5be   :  { %4593 = vmatprep.mubr.f32.mxu1 %v2869_v5  ;;  %v3040_v5 = vld [vmem:[#allocation5 + $0x178] sm:$0xff] }
 0x5bf   :  { %4594 = vmatmul.mubr.f32.vlgmr.msra.gmra.mxu1 %v2870_v46  ;;  %v3198_v46 = vld [vmem:[#allocation7 + $0x1a8] sm:$0xff] }
 0x5c0   :  { %3121 = vmatprep.mubr.f32.mxu1 %v6850_v40  ;;  %3058 = vmatpush1.msra.mxu1 %v3055_v47  ;;  %v3036_v47 = vld [vmem:[#allocation5 + $0x158] sm:$0xff] }
 0x5c1   :  { %3059 = vmatprep.subr.mxu1 %v3054_v26  ;;  %3219 = vmatprep.subr.mxu0 %v3198_v46  ;;  %v3194_v26 = vld [vmem:[#allocation7 + $0x188] sm:$0xff]  ;;  %v3025_v46 = vld [vmem:[#allocation5 + $0x100] sm:$0xff] }
 0x5c2   :  { %3060 = vmatpush1.msra.mxu1 %v3053_v30  ;;  %v3035_v30 = vld [vmem:[#allocation5 + $0x150] sm:$0xff] }
 0x5c3   :  { %3061 = vmatprep.subr.mxu1 %v3052_v22  ;;  %v3193_v22 = vld [vmem:[#allocation7 + $0x180] sm:$0xff] }
 0x5c4   :  { %3062 = vmatpush1.msra.mxu1 %v3051_v41 }
 0x5c5   :  { %3063 = vmatprep.subr.mxu1 %v3050_v19  ;;  %v3034_v19 = vld [vmem:[#allocation5 + $0x148] sm:$0xff] }
 0x5c6   :  { %3064 = vmatpush1.msra.mxu1 %v3049_v54  ;;  %v3033_v54 = vld [vmem:[#allocation5 + $0x140] sm:$0xff] }
 0x5c7   :  { %3065 = vmatprep.subr.mxu1 %v3048_v16  ;;  %v3032_v16 = vld [vmem:[#allocation5 + $0x138] sm:$0xff] }
 0x5c8   :  { %3066 = vmatpush1.msra.mxu1 %v3047_v45 }
 0x5c9   :  { %3067 = vmatprep.subr.mxu1 %v3046_v53  ;;  %v3189_v53 = vld [vmem:[#allocation7 + $0x160] sm:$0xff] }
 0x5ca   :  { %3068 = vmatpush1.msra.mxu1 %v3045_v37  ;;  %v3188_v37 = vld [vmem:[#allocation7 + $0x158] sm:$0xff] }
 0x5cb   :  { %3069 = vmatprep.subr.mxu1 %v3044_v52  ;;  %v3187_v52 = vld [vmem:[#allocation7 + $0x150] sm:$0xff] }
 0x5cc   :  { %3070 = vmatpush1.msra.mxu1 %v3043_v1  ;;  %v3028_v1 = vld [vmem:[#allocation5 + $0x118] sm:$0xff] }
 0x5cd   :  { %3071 = vmatprep.subr.mxu1 %v3042_v24  ;;  %v3027_v24 = vld [vmem:[#allocation5 + $0x110] sm:$0xff] }
 0x5ce   :  { %3072 = vmatpush1.msra.mxu1 %v3041_v31  ;;  %v3026_v31 = vld [vmem:[#allocation5 + $0x108] sm:$0xff] }
 0x5cf   :  { %3073 = vmatprep.subr.mxu1 %v3040_v5 }
 0x67f   :  { %v6146_v28 = vpop.f32.mrf.mxu1 }
 0x680   :  { %v2953_v62 = vmul.f32 %v6146_v28, %v6146_v28 }
 0x681   :  { %v6148_v59 = vpop.f32.mrf.mxu1 }
 0x682   :  { %v2952_v3 = vmul.f32 %v6148_v59, %v6148_v59  ;;  %2946 = vadd.xlane.f32.xlu0 %v6148_v59 }
 0x684   :  { %2954 = vadd.xlane.f32.xlu1 %v2952_v3  ;;  %v3039_v3 = vld [vmem:[#allocation5 + $0x170] sm:$0xff] }
 0x685   :  { %3074 = vmatpush1.msra.mxu1 %v3039_v3  ;;  %v3183_v3 = vld [vmem:[#allocation7 + $0x130] sm:$0xff] }
 0x686   :  { %2948 = vadd.xlane.f32.xlu0 %v6146_v28 }
 0x688   :  { %2956 = vadd.xlane.f32.xlu1 %v2953_v62  ;;  %v3197_v62 = vld [vmem:[#allocation7 + $0x1a0] sm:$0xff] }
 0x689   :  { %3220 = vmatpush1.msra.mxu0 %v3197_v62  ;;  %v3182_v62 = vld [vmem:[#allocation7 + $0x128] sm:$0xff] }
 0x68a   :  { %1457 = vadd.xlane.f32.xlu0 %v5613_v27 }
 0x68c   :  { %1521 = vadd.xlane.f32.xlu1 %v1505_v18  ;;  %v3038_v18 = vld [vmem:[#allocation5 + $0x168] sm:$0xff] }
 0x68d   :  { %3075 = vmatprep.subr.mxu1 %v3038_v18  ;;  %v3181_v18 = vld [vmem:[#allocation7 + $0x120] sm:$0xff] }
 0x68e   :  { %1459 = vadd.xlane.f32.xlu0 %v5611_v34  ;;  %3076 = vmatpush1.msra.mxu1 %v3037_v36 }
 0x68f   :  { %3077 = vmatprep.subr.mxu1 %v3036_v47  ;;  %v3178_v47 = vld [vmem:[#allocation7 + $0x108] sm:$0xff] }
 0x690   :  { %1523 = vadd.xlane.f32.xlu1 %v1506_v55  ;;  %v3196_v55 = vld [vmem:[#allocation7 + $0x198] sm:$0xff]  ;;  %3078 = vmatpush1.msra.mxu1 %v3035_v30  ;;  %v6878_v30 = vld [vmem:[#allocation26_spill] sm:$0xff] }
 0x691   :  { %3221 = vmatprep.subr.mxu0 %v3196_v55  ;;  %3079 = vmatprep.subr.mxu1 %v3034_v19  ;;  %v3180_v55 = vld [vmem:[#allocation7 + $0x118] sm:$0xff] }
 0x692   :  { %1461 = vadd.xlane.f32.xlu0 %v5617_v63  ;;  %3080 = vmatpush1.msra.mxu1 %v3033_v54 }
 0x693   :  { %3081 = vmatprep.subr.mxu1 %v3032_v16 }
 0x694   :  { %1525 = vadd.xlane.f32.xlu1 %v1507_v8  ;;  %v1513_v8 = vmul.f32 %v5629_v43, %v5629_v43  ;;  %3082 = vmatpush1.msra.mxu1 %v3031_v44 }
 0x695   :  { %3083 = vmatprep.subr.mxu1 %v3030_v23 }
 0x696   :  { %1463 = vadd.xlane.f32.xlu0 %v5615_v13  ;;  %3084 = vmatpush1.msra.mxu1 %v3029_v61 }
 0x697   :  { %3085 = vmatprep.subr.mxu1 %v3028_v1 }
 0x698   :  { %1527 = vadd.xlane.f32.xlu1 %v1508_v35  ;;  %v3195_v35 = vld [vmem:[#allocation7 + $0x190] sm:$0xff]  ;;  %3086 = vmatpush1.msra.mxu1 %v3027_v24 }
 0x699   :  { %3222 = vmatpush1.msra.mxu0 %v3195_v35  ;;  %3087 = vmatprep.subr.mxu1 %v3026_v31  ;;  %v3179_v35 = vld [vmem:[#allocation7 + $0x110] sm:$0xff] }
 0x69a   :  { %1465 = vadd.xlane.f32.xlu0 %v5621_v0  ;;  %3223 = vmatprep.subr.mxu0 %v3194_v26  ;;  %v3177_v26 = vld [vmem:[#allocation7 + $0x100] sm:$0xff] }
 0x69b   :  { %3224 = vmatpush1.msra.mxu0 %v3193_v22  ;;  %3088 = vmatpush1.msra.mxu1 %v3025_v46  ;;  %v1519_v22 = vmul.f32 %v6878_v30, %v6878_v30 }
 0x69c   :  { %1529 = vadd.xlane.f32.xlu1 %v1509_v38  ;;  %v6873_v38 = vld [vmem:[#allocation20_spill] sm:$0xff]  ;;  %3225 = vmatprep.subr.mxu0 %v3192_v57 }
 0x69d   :  { %v1514_v41 = vmul.f32 %v6873_v38, %v6873_v38  ;;  %3226 = vmatpush1.msra.mxu0 %v3191_v58 }
 0x69e   :  { %1467 = vadd.xlane.f32.xlu0 %v5619_v25  ;;  %3227 = vmatprep.subr.mxu0 %v3190_v7 }
 0x69f   :  { %3228 = vmatpush1.msra.mxu0 %v3189_v53 }
 0x6a0   :  { %1531 = vadd.xlane.f32.xlu1 %v1510_v2  ;;  %v6874_v2 = vld [vmem:[#allocation22_spill] sm:$0xff]  ;;  %3229 = vmatprep.subr.mxu0 %v3188_v37 }
 0x6a1   :  { %v1515_v45 = vmul.f32 %v6874_v2, %v6874_v2  ;;  %3230 = vmatpush1.msra.mxu0 %v3187_v52 }
 0x6a2   :  { %1469 = vadd.xlane.f32.xlu0 %v5625_v50  ;;  %3231 = vmatprep.subr.mxu0 %v3186_v32 }
 0x6a3   :  { %3232 = vmatpush1.msra.mxu0 %v3185_v56 }
 0x6a4   :  { %1533 = vadd.xlane.f32.xlu1 %v1511_v11  ;;  %v1516_v11 = vmul.f32 %v6875_v39, %v6875_v39  ;;  %3233 = vmatprep.subr.mxu0 %v3184_v20 }
 0x6a5   :  { %3234 = vmatpush1.msra.mxu0 %v3183_v3 }
 0x6a6   :  { %1471 = vadd.xlane.f32.xlu0 %v5623_v12  ;;  %3235 = vmatprep.subr.mxu0 %v3182_v62 }
 0x6a7   :  { %3236 = vmatpush1.msra.mxu0 %v3181_v18 }
 0x6a8   :  { %1535 = vadd.xlane.f32.xlu1 %v1512_v51  ;;  %v6876_v51 = vld [vmem:[#allocation24_spill] sm:$0xff]  ;;  %3237 = vmatprep.subr.mxu0 %v3180_v55 }
 0x6a9   :  { %v1517_v5 = vmul.f32 %v6876_v51, %v6876_v51  ;;  %3238 = vmatpush1.msra.mxu0 %v3179_v35 }
 0x6aa   :  { %1473 = vadd.xlane.f32.xlu0 %v5629_v43  ;;  %3239 = vmatprep.subr.mxu0 %v3178_v47 }
 0x6ab   :  { %3240 = vmatpush1.msra.mxu0 %v3177_v26 }
 0x6ac   :  { %1537 = vadd.xlane.f32.xlu1 %v1513_v8  ;;  %v6877_v8 = vld [vmem:[#allocation23_spill] sm:$0xff] }
 0x6ad   :  { %v1518_v36 = vmul.f32 %v6877_v8, %v6877_v8 }
 0x6ae   :  { %1475 = vadd.xlane.f32.xlu0 %v6873_v38 }
 0x6b0   :  { %1539 = vadd.xlane.f32.xlu1 %v1514_v41  ;;  %v6879_v41 = vld [vmem:[#allocation25_spill] sm:$0xff] }
 0x6b1   :  { %v1520_v19 = vmul.f32 %v6879_v41, %v6879_v41 }
 0x6b2   :  { %1477 = vadd.xlane.f32.xlu0 %v6874_v2 }
 0x6b4   :  { %1541 = vadd.xlane.f32.xlu1 %v1515_v45 }
 0x6b6   :  { %1479 = vadd.xlane.f32.xlu0 %v6875_v39 }
 0x6b8   :  { %1543 = vadd.xlane.f32.xlu1 %v1516_v11 }
 0x6ba   :  { %1481 = vadd.xlane.f32.xlu0 %v6876_v51 }
 0x6bc   :  { %1545 = vadd.xlane.f32.xlu1 %v1517_v5 }
 0x6be   :  { %1483 = vadd.xlane.f32.xlu0 %v6877_v8 }
 0x6c0   :  { %1547 = vadd.xlane.f32.xlu1 %v1518_v36 }
 0x6c2   :  { %1485 = vadd.xlane.f32.xlu0 %v6878_v30 }
 0x6c4   :  { %1549 = vadd.xlane.f32.xlu1 %v1519_v22 }
 0x6c6   :  { %1487 = vadd.xlane.f32.xlu0 %v6879_v41 }
 0x6c8   :  { %1551 = vadd.xlane.f32.xlu1 %v1520_v19 }
 0x70b   :  { %v2947_v57 = vpop.xlane.xlu0 %2946 }
 0x70c   :  { %v2950_v54 = vmul.f32 0.0078125, %v2947_v57 }
 0x70d   :  { %v2955_v58 = vpop.xlane.xlu1 %2954 }
 0x70e   :  { %v2960_v16 = vmul.f32 %v2950_v54, %v2950_v54  ;;  %v2958_v7 = vmul.f32 0.0078125, %v2955_v58 }
 0x70f   :  { %v2949_v45 = vpop.xlane.xlu0 %2948 }
 0x710   :  { %v2962_v44 = vsub.f32 %v2958_v7, %v2960_v16  ;;  %v2951_v53 = vmul.f32 0.0078125, %v2949_v45 }
 0x711   :  { %v2957_v23 = vpop.xlane.xlu1 %2956 }
 0x712   :  { %v2964_v37 = vmax.f32 %v2962_v44, 0.0  ;;  %v2961_v61 = vmul.f32 %v2951_v53, %v2951_v53  ;;  %v2959_v52 = vmul.f32 0.0078125, %v2957_v23 }
 0x713   :  { %v1458_v11 = vpop.xlane.xlu0 %1457 }
 0x714   :  { %v2968_v1 = vadd.f32 1e-05, %v2964_v37  ;;  %v2963_v32 = vsub.f32 %v2959_v52, %v2961_v61  ;;  %v6204_v24 = vmul.f32 0.0078125, %v1458_v11  ;;  %v2966_v11 = vsub.f32 %v6148_v59, %v2950_v54 }
 0x715   :  { %v1522_v56 = vpop.xlane.xlu1 %1521  ;;  %v2967_v54 = vsub.f32 %v6146_v28, %v2951_v53 }
 0x716   :  { %4758 = vrsqrt.f32 %v2968_v1  ;;  %v2965_v31 = vmax.f32 %v2963_v32, 0.0  ;;  %v1569_v20 = vmul.f32 %v6204_v24, %v6204_v24  ;;  %v1553_v5 = vmul.f32 0.0078125, %v1522_v56 }
 0x717   :  { %v1460_v46 = vpop.xlane.xlu0 %1459 }
 0x718   :  { %v2969_v3 = vadd.f32 1e-05, %v2965_v31  ;;  %v6208_v62 = vmul.f32 0.0078125, %v1460_v46  ;;  %v1585_v18 = vsub.f32 %v1553_v5, %v1569_v20  ;;  %v6880_v31 = vld [vmem:[#allocation16_spill] sm:$0xff] }
 0x719   :  { %v1524_v55 = vpop.xlane.xlu1 %1523  ;;  %v2977_v20 = vrot.slane %v6135_v21, %v6880_v31 }
 0x71a   :  { %4760 = vrsqrt.f32 %v2969_v3  ;;  %v1570_v36 = vmul.f32 %v6208_v62, %v6208_v62  ;;  %v1554_v35 = vmul.f32 0.0078125, %v1524_v55  ;;  %v1601_v47 = vmax.f32 %v1585_v18, 0.0 }
 0x71b   :  { %v1462_v26 = vpop.xlane.xlu0 %1461 }
 0x71c   :  { %v1586_v22 = vsub.f32 %v1554_v35, %v1570_v36  ;;  %v6212_v19 = vmul.f32 0.0078125, %v1462_v26  ;;  %v1633_v57 = vadd.f32 1e-05, %v1601_v47  ;;  %v6881_v36 = vld [vmem:[#allocation17_spill] sm:$0xff] }
 0x71d   :  { %v1526_v58 = vpop.xlane.xlu1 %1525  ;;  %v2983_v35 = vrot.slane %v6135_v21, %v6881_v36 }
 0x71e   :  { %v1602_v16 = vmax.f32 %v1586_v22, 0.0  ;;  %v1571_v7 = vmul.f32 %v6212_v19, %v6212_v19  ;;  %v1555_v45 = vmul.f32 0.0078125, %v1526_v58  ;;  %4762 = vrsqrt.f32 %v1633_v57 }
 0x71f   :  { %v1464_v44 = vpop.xlane.xlu0 %1463 }
 0x720   :  { %v1634_v23 = vadd.f32 1e-05, %v1602_v16  ;;  %v1587_v37 = vsub.f32 %v1555_v45, %v1571_v7  ;;  %v6216_v61 = vmul.f32 0.0078125, %v1464_v44 }
 0x721   :  { %v1528_v52 = vpop.xlane.xlu1 %1527 }
 0x722   :  { %4764 = vrsqrt.f32 %v1634_v23  ;;  %v1603_v1 = vmax.f32 %v1587_v37, 0.0  ;;  %v1572_v32 = vmul.f32 %v6216_v61, %v6216_v61  ;;  %v1556_v5 = vmul.f32 0.0078125, %v1528_v52 }
 0x723   :  { %v4759_v56 = vpop.eup %4758  ;;  %v1466_v46 = vpop.xlane.xlu0 %1465 }
 0x724   :  { %v1635_v3 = vadd.f32 1e-05, %v1603_v1  ;;  %v6223_v18 = vmul.f32 0.0078125, %v1466_v46  ;;  %v2972_v55 = vmul.f32 %v4759_v56, %v2966_v11  ;;  %v1588_v47 = vsub.f32 %v1556_v5, %v1572_v32  ;;  %v6237_v1 = vld [vmem:[%s6812_s9 + $0x10] sm:$0xff]  ;;  %v4841_v46 = vld [vmem:[%s6803_s0] sm:$0xff] }
 0x725   :  { %v1530_v59 = vpop.xlane.xlu1 %1529  ;;  %v6241_v32 = vrot.slane %v6237_v1, %v6880_v31  ;;  %v1617_v56 = vsub.f32 %v5613_v27, %v6204_v24  ;;  %v6255_v27 = vrot.slane %v6237_v1, %v6881_v36  ;;  %v1618_v24 = vsub.f32 %v5611_v34, %v6208_v62 }
 0x726   :  { %4766 = vrsqrt.f32 %v1635_v3  ;;  %v1573_v26 = vmul.f32 %v6223_v18, %v6223_v18  ;;  %v1557_v22 = vmul.f32 0.0078125, %v1530_v59  ;;  %v1604_v58 = vmax.f32 %v1588_v47, 0.0 }
 0x727   :  { %v4761_v57 = vpop.eup %4760  ;;  %v1468_v16 = vpop.xlane.xlu0 %1467  ;;  %v2978_v7 = vmul.f32 %v2977_v20, %v2972_v55 }
 0x728   :  { %v1589_v45 = vsub.f32 %v1557_v22, %v1573_v26  ;;  %v6230_v44 = vmul.f32 0.0078125, %v1468_v16  ;;  %v2973_v23 = vmul.f32 %v4761_v57, %v2967_v54  ;;  %v1636_v37 = vadd.f32 1e-05, %v1604_v58 }
 0x729   :  { %v1532_v52 = vpop.xlane.xlu1 %1531  ;;  %v2984_v21 = vadd.f32 %v2983_v35, %v2978_v7 }
 0x72a   :  { %v1605_v11 = vmax.f32 %v1589_v45, 0.0  ;;  %v1574_v28 = vmul.f32 %v6230_v44, %v6230_v44  ;;  %v1558_v53 = vmul.f32 0.0078125, %v1532_v52  ;;  %4768 = vrsqrt.f32 %v1636_v37 }
 0x72b   :  { %v1470_v5 = vpop.xlane.xlu0 %1469  ;;  %v6248_v3 = vadd.f32 %v4841_v46, %v2984_v21  ;;  %v2979_v55 = vmul.f32 %v2977_v20, %v2973_v23  ;;  %v4763_v47 = vpop.eup %4762  ;;  %v1619_v46 = vsub.f32 %v5617_v63, %v6212_v19 }
 0x72c   :  { %v1637_v59 = vadd.f32 1e-05, %v1605_v11  ;;  %v1590_v54 = vsub.f32 %v1558_v53, %v1574_v28  ;;  %v6250_v26 = vmul.f32 0.0078125, %v1470_v5  ;;  %v1665_v16 = vmul.f32 %v4763_v47, %v1617_v56 }
 0x72d   :  { %6882 = vst [vmem:[#allocation20_spill] sm:$0xff] %v6248_v3  ;;  %v1534_v22 = vpop.xlane.xlu1 %1533  ;;  %v6841_v57 = vmax.f32 %v6248_v3, 0.0  ;;  %v2985_v58 = vadd.f32 %v2983_v35, %v2979_v55  ;;  %v4842_v35 = vld [vmem:[%s6803_s0 + $0x8] sm:$0xff] }
 0x72e   :  { %4770 = vrsqrt.f32 %v1637_v59  ;;  %v1606_v7 = vmax.f32 %v1590_v54, 0.0  ;;  %v1575_v20 = vmul.f32 %v6250_v26, %v6250_v26  ;;  %v1559_v23 = vmul.f32 0.0078125, %v1534_v22 }
 0x72f   :  { %v4765_v45 = vpop.eup %4764  ;;  %3122 = vmatmul.mubr.f32.vlgmr.msra.gmra.mxu1 %v6841_v57  ;;  %v1472_v37 = vpop.xlane.xlu0 %1471  ;;  %v6266_v52 = vadd.f32 %v4842_v35, %v2985_v58  ;;  %v1685_v21 = vmul.f32 %v6241_v32, %v1665_v16 }
 0x730   :  { %v1638_v34 = vadd.f32 1e-05, %v1606_v7  ;;  %v6269_v62 = vmul.f32 0.0078125, %v1472_v37  ;;  %3127 = vmatprep.mubr.f32.mxu1 %v6850_v40  ;;  %v1666_v11 = vmul.f32 %v4765_v45, %v1618_v24  ;;  %v1591_v28 = vsub.f32 %v1559_v23, %v1575_v20 }
 0x731   :  { %6883 = vst [vmem:[#allocation22_spill] sm:$0xff] %v6266_v52  ;;  %v1536_v53 = vpop.xlane.xlu1 %1535  ;;  %v6842_v56 = vmax.f32 %v6266_v52, 0.0  ;;  %v1705_v5 = vadd.f32 %v6255_v27, %v1685_v21  ;;  %v1620_v21 = vsub.f32 %v5615_v13, %v6216_v61 }
 0x732   :  { %4772 = vrsqrt.f32 %v1638_v34  ;;  %v1576_v55 = vmul.f32 %v6269_v62, %v6269_v62  ;;  %v1560_v47 = vmul.f32 0.0078125, %v1536_v53  ;;  %v1607_v54 = vmax.f32 %v1591_v28, 0.0 }
 0x733   :  { %v4767_v59 = vpop.eup %4766  ;;  %3128 = vmatmul.mubr.f32.gmra.mxu1 %v6842_v56  ;;  %v1474_v22 = vpop.xlane.xlu0 %1473  ;;  %v1721_v58 = vmax.f32 %v1705_v5, 0.0  ;;  %v1686_v16 = vmul.f32 %v6241_v32, %v1666_v11 }
 0x734   :  { %v1592_v24 = vsub.f32 %v1560_v47, %v1576_v55  ;;  %v6281_v7 = vmul.f32 0.0078125, %v1474_v22  ;;  %v1667_v20 = vmul.f32 %v4767_v59, %v1619_v46  ;;  %v1639_v45 = vadd.f32 1e-05, %v1607_v54 }
 0x735   :  { %3274 = vmatmul.mubr.f32.vlgmr.msra.gmra.mxu0 %v1721_v58  ;;  %v1538_v63 = vpop.xlane.xlu1 %1537  ;;  %v1706_v19 = vadd.f32 %v6255_v27, %v1686_v16  ;;  %v1621_v22 = vsub.f32 %v5621_v0, %v6223_v18 }
 0x736   :  { %v1608_v23 = vmax.f32 %v1592_v24, 0.0  ;;  %v1577_v37 = vmul.f32 %v6281_v7, %v6281_v7  ;;  %v1561_v35 = vmul.f32 0.0078125, %v1538_v63  ;;  %3278 = vmatprep.mubr.f32.mxu0 %v6850_v40  ;;  %4774 = vrsqrt.f32 %v1639_v45 }
 0x737   :  { %v1476_v34 = vpop.xlane.xlu0 %1475  ;;  %v1722_v11 = vmax.f32 %v1706_v19, 0.0  ;;  %v1687_v28 = vmul.f32 %v6241_v32, %v1667_v20  ;;  %v4769_v53 = vpop.eup %4768 }
 0x738   :  { %v1640_v5 = vadd.f32 1e-05, %v1608_v23  ;;  %v1593_v46 = vsub.f32 %v1561_v35, %v1577_v37  ;;  %v6290_v55 = vmul.f32 0.0078125, %v1476_v34  ;;  %v1668_v54 = vmul.f32 %v4769_v53, %v1620_v21 }
 0x739   :  { %3279 = vmatmul.mubr.f32.gmra.mxu0 %v1722_v11  ;;  %v1540_v47 = vpop.xlane.xlu1 %1539  ;;  %v1707_v59 = vadd.f32 %v6255_v27, %v1687_v28  ;;  %v1622_v35 = vsub.f32 %v5619_v25, %v6230_v44 }
 0x73a   :  { %4776 = vrsqrt.f32 %v1640_v5  ;;  %v1609_v13 = vmax.f32 %v1593_v46, 0.0  ;;  %v1578_v61 = vmul.f32 %v6290_v55, %v6290_v55  ;;  %3283 = vmatprep.mubr.f32.mxu0 %v6850_v40  ;;  %v1562_v16 = vmul.f32 0.0078125, %v1540_v47 }
 0x73b   :  { %v4771_v58 = vpop.eup %4770  ;;  %v1478_v24 = vpop.xlane.xlu0 %1477  ;;  %v1723_v20 = vmax.f32 %v1707_v59, 0.0  ;;  %v1688_v45 = vmul.f32 %v6241_v32, %v1668_v54 }
 0x73c   :  { %v1641_v63 = vadd.f32 1e-05, %v1609_v13  ;;  %v6299_v19 = vmul.f32 0.0078125, %v1478_v24  ;;  %v1669_v23 = vmul.f32 %v4771_v58, %v1621_v22  ;;  %v1594_v37 = vsub.f32 %v1562_v16, %v1578_v61 }
 0x73d   :  { %3284 = vmatmul.mubr.f32.gmra.mxu0 %v1723_v20  ;;  %v1542_v0 = vpop.xlane.xlu1 %1541  ;;  %v1708_v18 = vadd.f32 %v6255_v27, %v1688_v45  ;;  %v1623_v16 = vsub.f32 %v5625_v50, %v6250_v26 }
 0x73e   :  { %4778 = vrsqrt.f32 %v1641_v63  ;;  %v1579_v21 = vmul.f32 %v6299_v19, %v6299_v19  ;;  %v1563_v34 = vmul.f32 0.0078125, %v1542_v0  ;;  %3288 = vmatprep.mubr.f32.mxu0 %v6850_v40  ;;  %v1610_v28 = vmax.f32 %v1594_v37, 0.0 }
 0x73f   :  { %v4773_v11 = vpop.eup %4772  ;;  %v1480_v53 = vpop.xlane.xlu0 %1479  ;;  %v1724_v5 = vmax.f32 %v1708_v18, 0.0  ;;  %v1689_v46 = vmul.f32 %v6241_v32, %v1669_v23 }
 0x740   :  { %v1595_v47 = vsub.f32 %v1563_v34, %v1579_v21  ;;  %v6308_v59 = vmul.f32 0.0078125, %v1480_v53  ;;  %v1670_v54 = vmul.f32 %v4773_v11, %v1622_v35  ;;  %v1642_v22 = vadd.f32 1e-05, %v1610_v28 }
 0x741   :  { %3289 = vmatmul.mubr.f32.gmra.mxu0 %v1724_v5  ;;  %v1544_v25 = vpop.xlane.xlu1 %1543  ;;  %v1709_v44 = vadd.f32 %v6255_v27, %v1689_v46  ;;  %v1624_v34 = vsub.f32 %v5623_v12, %v6269_v62 }
 0x742   :  { %v1611_v13 = vmax.f32 %v1595_v47, 0.0  ;;  %v1580_v61 = vmul.f32 %v6308_v59, %v6308_v59  ;;  %v1564_v58 = vmul.f32 0.0078125, %v1544_v25  ;;  %3293 = vmatprep.mubr.f32.mxu0 %v6850_v40  ;;  %4780 = vrsqrt.f32 %v1642_v22 }
 0x743   :  { %v1482_v24 = vpop.xlane.xlu0 %1481  ;;  %v1725_v20 = vmax.f32 %v1709_v44, 0.0  ;;  %v1690_v45 = vmul.f32 %v6241_v32, %v1670_v54  ;;  %v4775_v63 = vpop.eup %4774  ;;  %v1625_v44 = vsub.f32 %v5629_v43, %v6281_v7 }
 0x744   :  { %v1643_v23 = vadd.f32 1e-05, %v1611_v13  ;;  %v1596_v37 = vsub.f32 %v1564_v58, %v1580_v61  ;;  %v6317_v0 = vmul.f32 0.0078125, %v1482_v24  ;;  %v1671_v21 = vmul.f32 %v4775_v63, %v1623_v16 }
 0x745   :  { %3294 = vmatmul.mubr.f32.gmra.mxu0 %v1725_v20  ;;  %v1546_v18 = vpop.xlane.xlu1 %1545  ;;  %v1710_v35 = vadd.f32 %v6255_v27, %v1690_v45 }
 0x746   :  { %4782 = vrsqrt.f32 %v1643_v23  ;;  %v1612_v50 = vmax.f32 %v1596_v37, 0.0  ;;  %v1581_v26 = vmul.f32 %v6317_v0, %v6317_v0  ;;  %3298 = vmatprep.mubr.f32.mxu0 %v6850_v40  ;;  %v1565_v28 = vmul.f32 0.0078125, %v1546_v18 }
 0x747   :  { %v4777_v11 = vpop.eup %4776  ;;  %v1484_v53 = vpop.xlane.xlu0 %1483  ;;  %v1726_v5 = vmax.f32 %v1710_v35, 0.0  ;;  %v1691_v46 = vmul.f32 %v6241_v32, %v1671_v21 }
 0x748   :  { %v1644_v47 = vadd.f32 1e-05, %v1612_v50  ;;  %v6326_v54 = vmul.f32 0.0078125, %v1484_v53  ;;  %v1672_v22 = vmul.f32 %v4777_v11, %v1624_v34  ;;  %v1597_v25 = vsub.f32 %v1565_v28, %v1581_v26 }
 0x749   :  { %3299 = vmatmul.mubr.f32.gmra.mxu0 %v1726_v5  ;;  %v1548_v12 = vpop.xlane.xlu1 %1547  ;;  %v1711_v62 = vadd.f32 %v6255_v27, %v1691_v46  ;;  %v1626_v50 = vsub.f32 %v6873_v38, %v6290_v55 }
 0x74a   :  { %4784 = vrsqrt.f32 %v1644_v47  ;;  %v1582_v13 = vmul.f32 %v6326_v54, %v6326_v54  ;;  %v1566_v61 = vmul.f32 0.0078125, %v1548_v12  ;;  %3303 = vmatprep.mubr.f32.mxu0 %v6850_v40  ;;  %v1613_v16 = vmax.f32 %v1597_v25, 0.0 }
 0x74b   :  { %v4779_v58 = vpop.eup %4778  ;;  %v1486_v24 = vpop.xlane.xlu0 %1485  ;;  %v1727_v20 = vmax.f32 %v1711_v62, 0.0  ;;  %v1692_v45 = vmul.f32 %v6241_v32, %v1672_v22  ;;  %v1627_v62 = vsub.f32 %v6874_v2, %v6299_v19  ;;  %v1628_v2 = vsub.f32 %v6875_v39, %v6308_v59 }
 0x74c   :  { %v1598_v63 = vsub.f32 %v1566_v61, %v1582_v13  ;;  %v6335_v23 = vmul.f32 0.0078125, %v1486_v24  ;;  %v1673_v37 = vmul.f32 %v4779_v58, %v1625_v44  ;;  %v1645_v18 = vadd.f32 1e-05, %v1613_v16 }
 0x74d   :  { %3304 = vmatmul.mubr.f32.gmra.mxu0 %v1727_v20  ;;  %v1550_v43 = vpop.xlane.xlu1 %1549  ;;  %v1712_v7 = vadd.f32 %v6255_v27, %v1692_v45  ;;  %v1629_v39 = vsub.f32 %v6876_v51, %v6317_v0 }
 0x74e   :  { %v1614_v35 = vmax.f32 %v1598_v63, 0.0  ;;  %v1583_v21 = vmul.f32 %v6335_v23, %v6335_v23  ;;  %v1567_v34 = vmul.f32 0.0078125, %v1550_v43  ;;  %3308 = vmatprep.mubr.f32.mxu0 %v6850_v40  ;;  %4786 = vrsqrt.f32 %v1645_v18 }
 0x74f   :  { %v1488_v26 = vpop.xlane.xlu0 %1487  ;;  %v1728_v11 = vmax.f32 %v1712_v7, 0.0  ;;  %v1693_v28 = vmul.f32 %v6241_v32, %v1673_v37  ;;  %v4781_v53 = vpop.eup %4780  ;;  %v1631_v51 = vsub.f32 %v6878_v30, %v6335_v23 }
 0x750   :  { %v1646_v5 = vadd.f32 1e-05, %v1614_v35  ;;  %v1599_v46 = vsub.f32 %v1567_v34, %v1583_v21  ;;  %v6344_v47 = vmul.f32 0.0078125, %v1488_v26  ;;  %v1674_v12 = vmul.f32 %v4781_v53, %v1626_v50 }
 0x751   :  { %3309 = vmatmul.mubr.f32.gmra.mxu0 %v1728_v11  ;;  %v1552_v22 = vpop.xlane.xlu1 %1551  ;;  %v1713_v25 = vadd.f32 %v6255_v27, %v1693_v28  ;;  %v1630_v11 = vsub.f32 %v6877_v8, %v6326_v54 }
 0x752   :  { %4788 = vrsqrt.f32 %v1646_v5  ;;  %v1615_v38 = vmax.f32 %v1599_v46, 0.0  ;;  %v1584_v55 = vmul.f32 %v6344_v47, %v6344_v47  ;;  %3313 = vmatprep.mubr.f32.mxu0 %v6850_v40  ;;  %v1568_v13 = vmul.f32 0.0078125, %v1552_v22 }
 0x753   :  { %v4783_v44 = vpop.eup %4782  ;;  %v1729_v61 = vmax.f32 %v1713_v25, 0.0  ;;  %v1694_v58 = vmul.f32 %v6241_v32, %v1674_v12 }
 0x754   :  { %v1647_v16 = vadd.f32 1e-05, %v1615_v38  ;;  %v1675_v24 = vmul.f32 %v4783_v44, %v1627_v62  ;;  %v1600_v20 = vsub.f32 %v1568_v13, %v1584_v55  ;;  %v1632_v55 = vsub.f32 %v6879_v41, %v6344_v47 }
 0x755   :  { %3314 = vmatmul.mubr.f32.gmra.mxu0 %v1729_v61  ;;  %v1714_v45 = vadd.f32 %v6255_v27, %v1694_v58 }
 0x756   :  { %4790 = vrsqrt.f32 %v1647_v16  ;;  %3318 = vmatprep.mubr.f32.mxu0 %v6850_v40  ;;  %v1695_v19 = vmul.f32 %v6241_v32, %v1675_v24  ;;  %v1616_v37 = vmax.f32 %v1600_v20, 0.0 }
 0x757   :  { %v4785_v63 = vpop.eup %4784  ;;  %v1730_v18 = vmax.f32 %v1714_v45, 0.0 }
 0x758   :  { %v1715_v43 = vadd.f32 %v6255_v27, %v1695_v19  ;;  %v1676_v7 = vmul.f32 %v4785_v63, %v1628_v2  ;;  %v1648_v35 = vadd.f32 1e-05, %v1616_v37 }
 0x759   :  { %3319 = vmatmul.mubr.f32.gmra.mxu0 %v1730_v18 }
 0x75a   :  { %3323 = vmatprep.mubr.f32.mxu0 %v6850_v40  ;;  %v1731_v21 = vmax.f32 %v1715_v43, 0.0  ;;  %v1696_v34 = vmul.f32 %v6241_v32, %v1676_v7  ;;  %4792 = vrsqrt.f32 %v1648_v35 }
 0x75b   :  { %v4787_v59 = vpop.eup %4786 }
 0x75c   :  { %v1716_v50 = vadd.f32 %v6255_v27, %v1696_v34  ;;  %v1677_v26 = vmul.f32 %v4787_v59, %v1629_v39 }
 0x75d   :  { %3324 = vmatmul.mubr.f32.gmra.mxu0 %v1731_v21 }
 0x75e   :  { %3328 = vmatprep.mubr.f32.mxu0 %v6850_v40  ;;  %v1732_v28 = vmax.f32 %v1716_v50, 0.0  ;;  %v1697_v5 = vmul.f32 %v6241_v32, %v1677_v26 }
 0x75f   :  { %v4789_v53 = vpop.eup %4788 }
 0x760   :  { %v1678_v46 = vmul.f32 %v4789_v53, %v1630_v11  ;;  %v1717_v22 = vadd.f32 %v6255_v27, %v1697_v5 }
 0x761   :  { %3329 = vmatmul.mubr.f32.gmra.mxu0 %v1732_v28 }
 0x762   :  { %3333 = vmatprep.mubr.f32.mxu0 %v6850_v40  ;;  %v1698_v0 = vmul.f32 %v6241_v32, %v1678_v46  ;;  %v1733_v12 = vmax.f32 %v1717_v22, 0.0 }
 0x763   :  { %v4791_v25 = vpop.eup %4790 }
 0x764   :  { %v1718_v8 = vadd.f32 %v6255_v27, %v1698_v0  ;;  %v1679_v54 = vmul.f32 %v4791_v25, %v1631_v51 }
 0x765   :  { %3334 = vmatmul.mubr.f32.gmra.mxu0 %v1733_v12 }
 0x766   :  { %3338 = vmatprep.mubr.f32.mxu0 %v6850_v40  ;;  %v1734_v62 = vmax.f32 %v1718_v8, 0.0  ;;  %v1699_v38 = vmul.f32 %v6241_v32, %v1679_v54 }
 0x767   :  { %v4793_v44 = vpop.eup %4792 }
 0x768   :  { %v1719_v30 = vadd.f32 %v6255_v27, %v1699_v38  ;;  %v1680_v23 = vmul.f32 %v4793_v44, %v1632_v55 }
 0x769   :  { %3339 = vmatmul.mubr.f32.gmra.mxu0 %v1734_v62 }
 0x76a   :  { %3343 = vmatprep.mubr.f32.mxu0 %v6850_v40  ;;  %v1735_v13 = vmax.f32 %v1719_v30, 0.0  ;;  %v1700_v61 = vmul.f32 %v6241_v32, %v1680_v23 }
 0x76c   :  { %v1720_v58 = vadd.f32 %v6255_v27, %v1700_v61 }
 0x76d   :  { %3344 = vmatmul.mubr.f32.gmra.mxu0 %v1735_v13 }
 0x76e   :  { %3348 = vmatprep.mubr.f32.mxu0 %v6850_v40  ;;  %v1736_v16 = vmax.f32 %v1720_v58, 0.0 }
 0x771   :  { %3349 = vmatmul.mubr.f32.gmra.mxu0 %v1736_v16 }
 0x772   :  { %3353 = vmatprep.mubr.f32.mxu0 %v6850_v40 }
 0x7ef   :  { %v6384_v41 = vpop.f32.mrf.mxu1 }
 0x7f0   :  { %v3140_v47 = vmul.f32 %v6384_v41, %v6384_v41  ;;  %3134 = vadd.xlane.f32.xlu0 %v6384_v41 }
 0x7f1   :  { %v6389_v24 = vpop.f32.mrf.mxu1 }
 0x7f2   :  { %3142 = vadd.xlane.f32.xlu1 %v3140_v47 }
 0x7f3   :  { %v6391_v32 = vpop.f32.mrf.mxu1 }
 0x7f4   :  { %v3141_v27 = vmul.f32 %v6391_v32, %v6391_v32  ;;  %3136 = vadd.xlane.f32.xlu0 %v6391_v32 }
 0x7f5   :  { %v6396_v20 = vpop.f32.mrf.mxu0 }
 0x7f6   :  { %3144 = vadd.xlane.f32.xlu1 %v3141_v27 }
 0x7f7   :  { %v3277_v45 = vpop.f32.mrf.mxu0 }
 0x7f9   :  { %v6398_v2 = vpop.f32.mrf.mxu0 }
 0x7fb   :  { %v3282_v19 = vpop.f32.mrf.mxu0 }
 0x7fd   :  { %v6400_v63 = vpop.f32.mrf.mxu0 }
 0x7ff   :  { %v3287_v37 = vpop.f32.mrf.mxu0 }
 0x801   :  { %v6402_v18 = vpop.f32.mrf.mxu0 }
 0x803   :  { %v3292_v43 = vpop.f32.mrf.mxu0 }
 0x805   :  { %v6404_v7 = vpop.f32.mrf.mxu0 }
 0x807   :  { %v3297_v35 = vpop.f32.mrf.mxu0 }
 0x809   :  { %v6406_v21 = vpop.f32.mrf.mxu0 }
 0x80b   :  { %v3302_v34 = vpop.f32.mrf.mxu0 }
 0x80d   :  { %v6408_v39 = vpop.f32.mrf.mxu0 }
 0x80f   :  { %v3307_v59 = vpop.f32.mrf.mxu0 }
 0x811   :  { %v6410_v50 = vpop.f32.mrf.mxu0 }
 0x813   :  { %v3312_v26 = vpop.f32.mrf.mxu0 }
 0x815   :  { %v6412_v11 = vpop.f32.mrf.mxu0 }
 0x817   :  { %v3317_v28 = vpop.f32.mrf.mxu0 }
 0x819   :  { %v6414_v53 = vpop.f32.mrf.mxu0 }
 0x81b   :  { %v3322_v5 = vpop.f32.mrf.mxu0 }
 0x81c   :  { %v6884_v5 = vsub.s32 3, %v5046_v4 }
 0x81d   :  { %v6416_v46 = vpop.f32.mrf.mxu0 }
 0x81f   :  { %v3327_v22 = vpop.f32.mrf.mxu0 }
 0x820   :  { %v3165_v22 = vrot.slane %v6237_v1, %v6884_v5 }
 0x821   :  { %v6418_v51 = vpop.f32.mrf.mxu0 }
 0x823   :  { %v3332_v0 = vpop.f32.mrf.mxu0 }
 0x825   :  { %v6420_v25 = vpop.f32.mrf.mxu0 }
 0x827   :  { %v3337_v12 = vpop.f32.mrf.mxu0 }
 0x829   :  { %v6422_v8 = vpop.f32.mrf.mxu0 }
 0x82b   :  { %v3342_v54 = vpop.f32.mrf.mxu0 }
 0x82c   :  { %v6885_v54 = vsub.s32 4, %v5046_v4 }
 0x82d   :  { %v6424_v62 = vpop.f32.mrf.mxu0 }
 0x82f   :  { %v3347_v38 = vpop.f32.mrf.mxu0 }
 0x830   :  { %v3171_v38 = vrot.slane %v6237_v1, %v6885_v54 }
 0x831   :  { %v6426_v55 = vpop.f32.mrf.mxu0 }
 0x833   :  { %v3352_v44 = vpop.f32.mrf.mxu0 }
 0x879   :  { %v3135_v30 = vpop.xlane.xlu0 %3134 }
 0x87a   :  { %v3138_v23 = vmul.f32 0.0078125, %v3135_v30 }
 0x87b   :  { %v3143_v13 = vpop.xlane.xlu1 %3142 }
 0x87c   :  { %v3148_v61 = vmul.f32 %v3138_v23, %v3138_v23  ;;  %v3146_v58 = vmul.f32 0.0078125, %v3143_v13  ;;  %v3154_v28 = vsub.f32 %v6384_v41, %v3138_v23 }
 0x87d   :  { %v3137_v16 = vpop.xlane.xlu0 %3136 }
 0x87e   :  { %v3150_v47 = vsub.f32 %v3146_v58, %v3148_v61  ;;  %v3139_v27 = vmul.f32 0.0078125, %v3137_v16 }
 0x87f   :  { %v3145_v45 = vpop.xlane.xlu1 %3144 }
 0x880   :  { %v3152_v19 = vmax.f32 %v3150_v47, 0.0  ;;  %v3149_v37 = vmul.f32 %v3139_v27, %v3139_v27  ;;  %v3147_v43 = vmul.f32 0.0078125, %v3145_v45  ;;  %v3155_v44 = vsub.f32 %v6391_v32, %v3139_v27 }
 0x882   :  { %v3156_v35 = vadd.f32 1e-05, %v3152_v19  ;;  %v3151_v34 = vsub.f32 %v3147_v43, %v3149_v37  ;;  %v6886_v43 = vld [vmem:[#allocation15_spill] sm:$0xff] }
 0x884   :  { %4794 = vrsqrt.f32 %v3156_v35  ;;  %v3153_v59 = vmax.f32 %v3151_v34, 0.0 }
 0x886   :  { %v3157_v26 = vadd.f32 1e-05, %v3153_v59 }
 0x888   :  { %4796 = vrsqrt.f32 %v3157_v26 }
 0x891   :  { %v4795_v0 = vpop.eup %4794 }
 0x892   :  { %v3160_v12 = vmul.f32 %v4795_v0, %v3154_v28 }
 0x894   :  { %v3166_v30 = vmul.f32 %v3165_v22, %v3160_v12 }
 0x895   :  { %v4797_v13 = vpop.eup %4796 }
 0x896   :  { %v3172_v61 = vadd.f32 %v3171_v38, %v3166_v30  ;;  %v3161_v58 = vmul.f32 %v4797_v13, %v3155_v44 }
 0x898   :  { %v3174_v16 = vmax.f32 %v3172_v61, 0.0  ;;  %v3167_v47 = vmul.f32 %v3165_v22, %v3161_v58  ;;  %v6887_v58 = vld [vmem:[#allocation18_spill] sm:$0xff] }
 0x89a   :  { %3354 = vmatmul.mubr.f32.gmra.mxu0 %v3174_v16  ;;  %v3173_v41 = vadd.f32 %v3171_v38, %v3167_v47 }
 0x89b   :  { %3358 = vmatprep.mubr.f32.mxu0 %v6850_v40 }
 0x89c   :  { %v3175_v23 = vmax.f32 %v3173_v41, 0.0 }
 0x89e   :  { %3359 = vmatmul.mubr.f32.gmra.mxu0 %v3175_v23 }
 0x95a   :  { %v3355_v45 = vpop.f32.mrf.mxu0 }
 0x95c   :  { %v3356_v19 = vpop.f32.mrf.mxu0 }
 0x95d   :  { %v3366_v37 = vcombine.high %v3356_v19, %v3356_v19  ;;  %v3373_v35 = vrot.slane %v3356_v19, %v6886_v43 }
 0x95e   :  { %v3360_v1 = vpop.f32.mrf.mxu0 }
 0x95f   :  { %v3380_v32 = vrot.slane %v3366_v37, %v6886_v43  ;;  %v3381_v27 = vcombine.high %v3373_v35, %v3373_v35  ;;  %v3389_v34 = vrot.slane %v3373_v35, %v6886_v43 }
 0x960   :  { %v3361_v59 = vpop.f32.mrf.mxu0 }
 0x961   :  { %v3403_v26 = vrot.slane %v3381_v27, %v6886_v43  ;;  %v3411_v28 = vcombine.high %v3389_v34, %v3389_v34  ;;  %v3382_v5 = vcombine.high %v3380_v32, %v3380_v32  ;;  %v3467_v40 = vrot.slane %v3389_v34, %v5057_v10 }
 0x962   :  { %v3422_v22 = vrot.slane %v3361_v59, %v6886_v43  ;;  %v3396_v0 = vrot.slane %v3380_v32, %v6886_v43  ;;  %v3415_v23 = vcombine.high %v3361_v59, %v3361_v59 }
 0x963   :  { %v3471_v12 = vrot.slane %v3403_v26, %v5057_v10  ;;  %v3475_v54 = vrot.slane %v3411_v28, %v5057_v10  ;;  %v3544_v38 = vadd.f32 %v3467_v40, %v6396_v20  ;;  %v6449_v30 = vrot.slane %v3382_v5, %v6886_v43 }
 0x964   :  { %v3438_v13 = vrot.slane %v3422_v22, %v6886_v43  ;;  %v3483_v61 = vrot.slane %v3396_v0, %v5057_v10  ;;  %v3412_v20 = vcombine.high %v3396_v0, %v3396_v0  ;;  %v3429_v1 = vrot.slane %v3415_v23, %v6886_v43 }
 0x965   :  { %v3545_v44 = vadd.f32 %v3471_v12, %v6398_v2  ;;  %v6454_v16 = vadd.f32 %v3544_v38, %v6887_v58  ;;  %v3546_v41 = vadd.f32 %v3475_v54, %v6400_v63  ;;  %v3413_v2 = vcombine.high %v3403_v26, %v3403_v26 }
 0x966   :  { %v3499_v45 = vrot.slane %v3438_v13, %v5057_v10  ;;  %v3548_v35 = vadd.f32 %v3483_v61, %v6404_v7  ;;  %v3487_v63 = vrot.slane %v6449_v30, %v5057_v10  ;;  %v3430_v32 = vcombine.high %v3422_v22, %v3422_v22 }
 0x967   :  { %v6457_v47 = vadd.f32 %v3545_v44, %v6887_v58  ;;  %3576 = vadd.xlane.f32.xlu0 %v6454_v16  ;;  %v6464_v19 = vadd.f32 %v3546_v41, %v6887_v58  ;;  %v3624_v37 = vmul.f32 %v6454_v16, %v6454_v16  ;;  %v3491_v7 = vrot.slane %v3412_v20, %v5057_v10 }
 0x968   :  { %v3552_v34 = vadd.f32 %v3499_v45, %v6412_v11  ;;  %v6477_v59 = vadd.f32 %v3548_v35, %v6887_v58  ;;  %v3549_v26 = vadd.f32 %v3487_v63, %v6406_v21  ;;  %v3479_v28 = vrot.slane %v3413_v2, %v5057_v10  ;;  %v6888_v11 = vld [vmem:[#allocation19_spill] sm:$0xff] }
 0x969   :  { %3578 = vadd.xlane.f32.xlu1 %v6457_v47  ;;  %v3625_v27 = vmul.f32 %v6457_v47, %v6457_v47  ;;  %v3445_v5 = vrot.slane %v3429_v1, %v6886_v43  ;;  %v3452_v40 = vrot.slane %v3430_v32, %v6886_v43  ;;  %v3550_v12 = vadd.f32 %v3491_v7, %v6408_v39 }
 0x96a   :  { %v6486_v22 = vadd.f32 %v3549_v26, %v6887_v58  ;;  %v6489_v0 = vadd.f32 %v3552_v34, %v6888_v11  ;;  %v3547_v21 = vadd.f32 %v3479_v28, %v6402_v18  ;;  %v3460_v54 = vcombine.high %v3438_v13, %v3438_v13 }
 0x96b   :  { %3580 = vadd.xlane.f32.xlu0 %v6464_v19  ;;  %v3503_v38 = vrot.slane %v3452_v40, %v5057_v10  ;;  %v3515_v44 = vrot.slane %v3445_v5, %v5057_v10  ;;  %v6498_v61 = vadd.f32 %v3550_v12, %v6887_v58  ;;  %v3628_v39 = vmul.f32 %v6477_v59, %v6477_v59 }
 0x96c   :  { %v6501_v41 = vadd.f32 %v3547_v21, %v6887_v58  ;;  %v3507_v18 = vrot.slane %v3460_v54, %v5057_v10  ;;  %v3626_v13 = vmul.f32 %v6464_v19, %v6464_v19  ;;  %v3431_v23 = vcombine.high %v3429_v1, %v3429_v1 }
 0x96d   :  { %3640 = vadd.xlane.f32.xlu1 %v3624_v37  ;;  %v3553_v20 = vadd.f32 %v3503_v38, %v6414_v53  ;;  %v3556_v2 = vadd.f32 %v3515_v44, %v6420_v25  ;;  %v3414_v53 = vcombine.high %v6449_v30, %v6449_v30  ;;  %v3630_v1 = vmul.f32 %v6498_v61, %v6498_v61 }
 0x96e   :  { %v3554_v35 = vadd.f32 %v3507_v18, %v6416_v46  ;;  %v3459_v25 = vrot.slane %v3431_v23, %v6886_v43  ;;  %v3461_v32 = vcombine.high %v3445_v5, %v3445_v5  ;;  %v3632_v46 = vmul.f32 %v6489_v0, %v6489_v0 }
 0x96f   :  { %3642 = vadd.xlane.f32.xlu0 %v3625_v27  ;;  %v6513_v45 = vadd.f32 %v3553_v20, %v6888_v11  ;;  %v6516_v37 = vadd.f32 %v3556_v2, %v6888_v11  ;;  %v3495_v30 = vrot.slane %v3414_v53, %v5057_v10  ;;  %v3462_v34 = vcombine.high %v3452_v40, %v3452_v40  ;;  %v3005_v53 = vld [vmem:[#allocation2 + $0x270] sm:$0xff] }
 0x970   :  { %v6525_v63 = vadd.f32 %v3554_v35, %v6888_v11  ;;  %v3519_v43 = vrot.slane %v3459_v25, %v5057_v10  ;;  %v3627_v26 = vmul.f32 %v6501_v41, %v6501_v41  ;;  %v3523_v12 = vrot.slane %v3461_v32, %v5057_v10  ;;  %v3006_v35 = vld [vmem:[#allocation2 + $0x278] sm:$0xff] }
 0x971   :  { %3584 = vadd.xlane.f32.xlu1 %v6477_v59  ;;  %v3633_v27 = vmul.f32 %v6513_v45, %v6513_v45  ;;  %v3551_v28 = vadd.f32 %v3495_v30, %v6410_v50  ;;  %v3463_v21 = vcombine.high %v3459_v25, %v3459_v25  ;;  %v3511_v44 = vrot.slane %v3462_v34, %v5057_v10  ;;  %v3004_v25 = vld [vmem:[#allocation2 + $0x268] sm:$0xff]  ;;  %v3002_v32 = vld [vmem:[#allocation2 + $0x258] sm:$0xff]  ;;  %v2999_v30 = vld [vmem:[#allocation2 + $0x240] sm:$0xff] }
 0x972   :  { %v3634_v7 = vmul.f32 %v6525_v63, %v6525_v63  ;;  %v3557_v5 = vadd.f32 %v3519_v43, %v6422_v8  ;;  %v3558_v38 = vadd.f32 %v3523_v12, %v6424_v62  ;;  %v3629_v50 = vmul.f32 %v6486_v22, %v6486_v22  ;;  %4596 = vmatprep.subr.mxu1 %v3006_v35  ;;  %v2998_v43 = vld [vmem:[#allocation2 + $0x238] sm:$0xff]  ;;  %v2997_v34 = vld [vmem:[#allocation2 + $0x230] sm:$0xff]  ;;  %v2992_v12 = vld [vmem:[#allocation2 + $0x208] sm:$0xff] }
 0x973   :  { %3586 = vadd.xlane.f32.xlu0 %v6486_v22  ;;  %v6544_v54 = vadd.f32 %v3551_v28, %v6887_v58  ;;  %v3555_v58 = vadd.f32 %v3511_v44, %v6418_v51  ;;  %v3527_v18 = vrot.slane %v3463_v21, %v5057_v10  ;;  %4597 = vmatpush3.msra.mxu1 %v3006_v35  ;;  %v2994_v28 = vld [vmem:[#allocation2 + $0x218] sm:$0xff]  ;;  %v2991_v21 = vld [vmem:[#allocation2 + $0x200] sm:$0xff] }
 0x974   :  { %v6547_v40 = vadd.f32 %v3557_v5, %v6888_v11  ;;  %v6556_v8 = vadd.f32 %v3558_v38, %v6888_v11  ;;  %4598 = vmatprep.subr.mxu1 %v3005_v53  ;;  %v2993_v5 = vld [vmem:[#allocation2 + $0x210] sm:$0xff] }
 0x975   :  { %3592 = vadd.xlane.f32.xlu1 %v6489_v0  ;;  %v6562_v62 = vadd.f32 %v3555_v58, %v6888_v11  ;;  %v3631_v51 = vmul.f32 %v6544_v54, %v6544_v54  ;;  %4599 = vmatpush3.msra.mxu1 %v3005_v53 }
 0x976   :  { %v3637_v2 = vmul.f32 %v6547_v40, %v6547_v40  ;;  %4600 = vmatprep.subr.mxu1 %v3004_v25 }
 0x977   :  { %3588 = vadd.xlane.f32.xlu0 %v6498_v61  ;;  %v3635_v23 = vmul.f32 %v6562_v62, %v6562_v62  ;;  %4601 = vmatpush3.msra.mxu1 %v3004_v25 }
 0x979   :  { %3582 = vadd.xlane.f32.xlu1 %v6501_v41 }
 0x97b   :  { %3648 = vadd.xlane.f32.xlu0 %v3628_v39  ;;  %v3636_v39 = vmul.f32 %v6516_v37, %v6516_v37 }
 0x97d   :  { %3644 = vadd.xlane.f32.xlu1 %v3626_v13  ;;  %v3559_v13 = vadd.f32 %v3527_v18, %v6426_v55  ;;  %v3638_v55 = vmul.f32 %v6556_v8, %v6556_v8 }
 0x97f   :  { %3594 = vadd.xlane.f32.xlu0 %v6513_v45  ;;  %v6569_v20 = vadd.f32 %v3559_v13, %v6888_v11 }
 0x981   :  { %3600 = vadd.xlane.f32.xlu1 %v6516_v37  ;;  %v3639_v11 = vmul.f32 %v6569_v20, %v6569_v20 }
 0x983   :  { %3596 = vadd.xlane.f32.xlu0 %v6525_v63 }
 0x985   :  { %3652 = vadd.xlane.f32.xlu1 %v3630_v1  ;;  %v3003_v1 = vld [vmem:[#allocation2 + $0x260] sm:$0xff] }
 0x986   :  { %4602 = vmatprep.subr.mxu1 %v3003_v1 }
 0x987   :  { %3656 = vadd.xlane.f32.xlu0 %v3632_v46  ;;  %4603 = vmatpush3.msra.mxu1 %v3003_v1  ;;  %v3001_v46 = vld [vmem:[#allocation2 + $0x250] sm:$0xff] }
 0x988   :  { %4604 = vmatprep.subr.mxu1 %v3002_v32 }
 0x989   :  { %3658 = vadd.xlane.f32.xlu1 %v3633_v27  ;;  %4605 = vmatpush3.msra.mxu1 %v3002_v32  ;;  %v3000_v27 = vld [vmem:[#allocation2 + $0x248] sm:$0xff] }
 0x98a   :  { %4606 = vmatprep.subr.mxu1 %v3001_v46 }
 0x98b   :  { %3646 = vadd.xlane.f32.xlu0 %v3627_v26  ;;  %4607 = vmatpush3.msra.mxu1 %v3001_v46  ;;  %v2996_v26 = vld [vmem:[#allocation2 + $0x228] sm:$0xff] }
 0x98c   :  { %4608 = vmatprep.subr.mxu1 %v3000_v27 }
 0x98d   :  { %3660 = vadd.xlane.f32.xlu1 %v3634_v7  ;;  %4609 = vmatpush3.msra.mxu1 %v3000_v27  ;;  %v2995_v7 = vld [vmem:[#allocation2 + $0x220] sm:$0xff] }
 0x98e   :  { %4610 = vmatprep.subr.mxu1 %v2999_v30 }
 0x98f   :  { %3590 = vadd.xlane.f32.xlu0 %v6544_v54  ;;  %4611 = vmatpush3.msra.mxu1 %v2999_v30 }
 0x990   :  { %4612 = vmatprep.subr.mxu1 %v2998_v43 }
 0x991   :  { %3602 = vadd.xlane.f32.xlu1 %v6547_v40  ;;  %4613 = vmatpush3.msra.mxu1 %v2998_v43 }
 0x992   :  { %4614 = vmatprep.subr.mxu1 %v2997_v34 }
 0x993   :  { %3650 = vadd.xlane.f32.xlu0 %v3629_v50  ;;  %4615 = vmatpush3.msra.mxu1 %v2997_v34 }
 0x994   :  { %4616 = vmatprep.subr.mxu1 %v2996_v26 }
 0x995   :  { %3604 = vadd.xlane.f32.xlu1 %v6556_v8  ;;  %4617 = vmatpush3.msra.mxu1 %v2996_v26 }
 0x996   :  { %4618 = vmatprep.subr.mxu1 %v2995_v7 }
 0x997   :  { %3598 = vadd.xlane.f32.xlu0 %v6562_v62  ;;  %4619 = vmatpush3.msra.mxu1 %v2995_v7 }
 0x998   :  { %4620 = vmatprep.subr.mxu1 %v2994_v28 }
 0x999   :  { %3664 = vadd.xlane.f32.xlu1 %v3636_v39  ;;  %4621 = vmatpush3.msra.mxu1 %v2994_v28 }
 0x99a   :  { %4622 = vmatprep.subr.mxu1 %v2993_v5 }
 0x99b   :  { %3606 = vadd.xlane.f32.xlu0 %v6569_v20  ;;  %4623 = vmatpush3.msra.mxu1 %v2993_v5 }
 0x99c   :  { %4624 = vmatprep.subr.mxu1 %v2992_v12 }
 0x99d   :  { %3654 = vadd.xlane.f32.xlu1 %v3631_v51  ;;  %4625 = vmatpush3.msra.mxu1 %v2992_v12 }
 0x99e   :  { %4626 = vmatprep.subr.mxu1 %v2991_v21 }
 0x99f   :  { %3666 = vadd.xlane.f32.xlu0 %v3637_v2  ;;  %4627 = vmatpush3.msra.mxu1 %v2991_v21 }
 0x9a1   :  { %3662 = vadd.xlane.f32.xlu1 %v3635_v23 }
 0x9a3   :  { %3668 = vadd.xlane.f32.xlu0 %v3638_v55 }
 0x9a5   :  { %3670 = vadd.xlane.f32.xlu1 %v3639_v11 }
 0x9f0   :  { %v3577_v38 = vpop.xlane.xlu0 %3576 }
 0x9f1   :  { %v3608_v50 = vmul.f32 0.0078125, %v3577_v38 }
 0x9f2   :  { %v3579_v44 = vpop.xlane.xlu1 %3578 }
 0x9f3   :  { %v3688_v39 = vmul.f32 %v3608_v50, %v3608_v50  ;;  %v3609_v13 = vmul.f32 0.0078125, %v3579_v44 }
 0x9f4   :  { %v3581_v58 = vpop.xlane.xlu0 %3580 }
 0x9f5   :  { %v3689_v11 = vmul.f32 %v3609_v13, %v3609_v13  ;;  %v6584_v26 = vmul.f32 0.0078125, %v3581_v58  ;;  %v3736_v58 = vsub.f32 %v6454_v16, %v3608_v50 }
 0x9f6   :  { %v3641_v18 = vpop.xlane.xlu1 %3640 }
 0x9f7   :  { %v3672_v51 = vmul.f32 0.0078125, %v3641_v18  ;;  %v3690_v12 = vmul.f32 %v6584_v26, %v6584_v26 }
 0x9f8   :  { %v3643_v23 = vpop.xlane.xlu0 %3642 }
 0x9f9   :  { %v3704_v2 = vsub.f32 %v3672_v51, %v3688_v39  ;;  %v3673_v53 = vmul.f32 0.0078125, %v3643_v23  ;;  %v6598_v23 = vld [vmem:[%s6812_s9 + $0x10] sm:$0xff] }
 0x9fa   :  { %v3585_v55 = vpop.xlane.xlu1 %3584 }
 0x9fb   :  { %v3720_v35 = vmax.f32 %v3704_v2, 0.0  ;;  %v3705_v1 = vsub.f32 %v3673_v53, %v3689_v11  ;;  %v6586_v7 = vmul.f32 0.0078125, %v3585_v55  ;;  %v6889_v55 = vsub.s32 5, %v5046_v4 }
 0x9fc   :  { %v6582_v32 = vpop.xlane.xlu0 %3586 }
 0x9fd   :  { %v3752_v25 = vadd.f32 1e-05, %v3720_v35  ;;  %v3721_v27 = vmax.f32 %v3705_v1, 0.0  ;;  %v3692_v21 = vmul.f32 %v6586_v7, %v6586_v7  ;;  %v6603_v11 = vrot.slane %v6598_v23, %v6889_v55 }
 0x9fe   :  { %v3593_v46 = vpop.xlane.xlu1 %3592 }
 0x9ff   :  { %4798 = vrsqrt.f32 %v3752_v25  ;;  %v3753_v30 = vadd.f32 1e-05, %v3721_v27  ;;  %v6890_v27 = vsub.s32 6, %v5046_v4 }
 0xa00   :  { %v3589_v43 = vpop.xlane.xlu0 %3588 }
 0xa01   :  { %4800 = vrsqrt.f32 %v3753_v30  ;;  %v6605_v1 = vmul.f32 0.0078125, %v3589_v43  ;;  %v6610_v30 = vrot.slane %v6598_v23, %v6890_v27 }
 0xa02   :  { %v3583_v34 = vpop.xlane.xlu1 %3582 }
 0xa03   :  { %v3694_v55 = vmul.f32 %v6605_v1, %v6605_v1 }
 0xa04   :  { %v3649_v28 = vpop.xlane.xlu0 %3648 }
 0xa05   :  { %v3676_v38 = vmul.f32 0.0078125, %v3649_v28 }
 0xa06   :  { %v3645_v5 = vpop.xlane.xlu1 %3644 }
 0xa07   :  { %v3674_v44 = vmul.f32 0.0078125, %v3645_v5  ;;  %v3708_v18 = vsub.f32 %v3676_v38, %v3692_v21  ;;  %v6612_v5 = vmul.f32 0.0078125, %v3593_v46 }
 0xa08   :  { %v3595_v51 = vpop.xlane.xlu0 %3594 }
 0xa09   :  { %v3706_v39 = vsub.f32 %v3674_v44, %v3690_v12  ;;  %v3724_v35 = vmax.f32 %v3708_v18, 0.0  ;;  %v6614_v12 = vmul.f32 0.0078125, %v3595_v51  ;;  %v3737_v44 = vsub.f32 %v6457_v47, %v3609_v13 }
 0xa0a   :  { %v6592_v2 = vpop.xlane.xlu1 %3600  ;;  %v3696_v46 = vmul.f32 %v6612_v5, %v6612_v5  ;;  %v6623_v51 = vmul.f32 0.0078125, %v3583_v34  ;;  %v6891_v34 = vld [vmem:[#allocation27_spill] sm:$0xff] }
 0xa0b   :  { %v3722_v53 = vmax.f32 %v3706_v39, 0.0  ;;  %v3756_v50 = vadd.f32 1e-05, %v3724_v35  ;;  %v3697_v47 = vmul.f32 %v6614_v12, %v6614_v12 }
 0xa0c   :  { %v4799_v25 = vpop.eup %4798  ;;  %v3597_v21 = vpop.xlane.xlu0 %3596  ;;  %v3691_v14 = vmul.f32 %v6623_v51, %v6623_v51 }
 0xa0d   :  { %v3784_v16 = vmul.f32 %v4799_v25, %v3736_v58  ;;  %v3754_v28 = vadd.f32 1e-05, %v3722_v53  ;;  %4802 = vrsqrt.f32 %v3756_v50 }
 0xa0e   :  { %v3653_v38 = vpop.xlane.xlu1 %3652  ;;  %v4801_v39 = vpop.eup %4800 }
 0xa0f   :  { %v3804_v18 = vmul.f32 %v6603_v11, %v3784_v16  ;;  %v3678_v43 = vmul.f32 0.0078125, %v3653_v38  ;;  %4804 = vrsqrt.f32 %v3754_v28  ;;  %v3785_v35 = vmul.f32 %v4801_v39, %v3737_v44 }
 0xa10   :  { %v3657_v53 = vpop.xlane.xlu0 %3656  ;;  %v6628_v28 = vmul.f32 0.0078125, %v3597_v21  ;;  %v6635_v21 = vmul.f32 0.0078125, %v6582_v32 }
 0xa11   :  { %v3824_v58 = vadd.f32 %v6610_v30, %v3804_v18  ;;  %v3710_v13 = vsub.f32 %v3678_v43, %v3694_v55  ;;  %v3805_v16 = vmul.f32 %v6603_v11, %v3785_v35  ;;  %v3680_v50 = vmul.f32 0.0078125, %v3657_v53 }
 0xa12   :  { %v3659_v25 = vpop.xlane.xlu1 %3658 }
 0xa13   :  { %v3840_v27 = vmax.f32 %v3824_v58, 0.0  ;;  %v3681_v38 = vmul.f32 0.0078125, %v3659_v25  ;;  %v3726_v18 = vmax.f32 %v3710_v13, 0.0  ;;  %v3825_v44 = vadd.f32 %v6610_v30, %v3805_v16 }
 0xa14   :  { %v3712_v39 = vsub.f32 %v3680_v50, %v3696_v46  ;;  %v3647_v55 = vpop.xlane.xlu0 %3646  ;;  %v3698_v13 = vmul.f32 %v6628_v28, %v6628_v28 }
 0xa15   :  { %v3713_v57 = vsub.f32 %v3681_v38, %v3697_v47  ;;  %v3856_v56 = vmul.f32 %v6891_v34, %v3840_v27  ;;  %v3758_v43 = vadd.f32 1e-05, %v3726_v18  ;;  %v3841_v58 = vmax.f32 %v3825_v44, 0.0  ;;  %v6892_v47 = vld [vmem:[#allocation28_spill] sm:$0xff] }
 0xa16   :  { %v3661_v3 = vpop.xlane.xlu1 %3660  ;;  %v3728_v52 = vmax.f32 %v3712_v39, 0.0  ;;  %v3675_v53 = vmul.f32 0.0078125, %v3647_v55  ;;  %v3738_v55 = vsub.f32 %v6464_v19, %v6584_v26 }
 0xa17   :  { %v3729_v35 = vmax.f32 %v3713_v57, 0.0  ;;  %4806 = vrsqrt.f32 %v3758_v43  ;;  %v3682_v46 = vmul.f32 0.0078125, %v3661_v3  ;;  %v3857_v25 = vmul.f32 %v6892_v47, %v3841_v58 }
 0xa18   :  { %v3760_v27 = vadd.f32 1e-05, %v3728_v52  ;;  %v3707_v50 = vsub.f32 %v3675_v53, %v3691_v14  ;;  %v3591_v18 = vpop.xlane.xlu0 %3590  ;;  %v3740_v57 = vsub.f32 %v6477_v59, %v6586_v7  ;;  %v3872_v32 = vrot.slane %v3856_v56, 4 }
 0xa19   :  { %v3761_v16 = vadd.f32 1e-05, %v3729_v35  ;;  %v3714_v38 = vsub.f32 %v3682_v46, %v3698_v13  ;;  %v3693_v3 = vmul.f32 %v6635_v21, %v6635_v21  ;;  %v3878_v53 = vrot.slane %v3857_v25, 4 }
 0xa1a   :  { %v3603_v34 = vpop.xlane.xlu1 %3602  ;;  %4808 = vrsqrt.f32 %v3760_v27  ;;  %v3723_v44 = vmax.f32 %v3707_v50, 0.0  ;;  %v4803_v39 = vpop.eup %4802  ;;  %v3744_v59 = vsub.f32 %v6489_v0, %v6612_v5  ;;  %v6651_v13 = vmul.f32 0.0078125, %v6592_v2 }
 0xa1b   :  { %4810 = vrsqrt.f32 %v3761_v16  ;;  %v3730_v52 = vmax.f32 %v3714_v38, 0.0  ;;  %v3788_v58 = vmul.f32 %v4803_v39, %v3740_v57  ;;  %v3742_v47 = vsub.f32 %v6498_v61, %v6605_v1 }
 0xa1c   :  { %v4805_v43 = vpop.eup %4804  ;;  %v3755_v35 = vadd.f32 1e-05, %v3723_v44  ;;  %v3651_v26 = vpop.xlane.xlu0 %3650  ;;  %v3873_v16 = vadd.f32 %v3872_v32, %v3856_v56  ;;  %v6657_v57 = vmul.f32 0.0078125, %v3591_v18  ;;  %v3739_v0 = vsub.f32 %v6501_v41, %v6623_v51 }
 0xa1d   :  { %v3786_v7 = vmul.f32 %v4805_v43, %v3738_v55  ;;  %v3762_v19 = vadd.f32 1e-05, %v3730_v52  ;;  %v3677_v27 = vmul.f32 0.0078125, %v3651_v26  ;;  %v3808_v50 = vmul.f32 %v6603_v11, %v3788_v58 }
 0xa1e   :  { %v3605_v46 = vpop.xlane.xlu1 %3604  ;;  %4812 = vrsqrt.f32 %v3755_v35  ;;  %v3745_v2 = vsub.f32 %v6513_v45, %v6614_v12  ;;  %v3879_v44 = vadd.f32 %v3878_v53, %v3857_v25  ;;  %v3700_v56 = vmul.f32 %v6651_v13, %v6651_v13 }
 0xa1f   :  { %v3806_v38 = vmul.f32 %v6603_v11, %v3786_v7  ;;  %4814 = vrsqrt.f32 %v3762_v19  ;;  %v3709_v5 = vsub.f32 %v3677_v27, %v3693_v3  ;;  %v6668_v32 = vmul.f32 0.0078125, %v3603_v34 }
 0xa20   :  { %v3599_v18 = vpop.xlane.xlu0 %3598  ;;  %v3746_v41 = vsub.f32 %v6525_v63, %v6628_v28  ;;  %v3874_v45 = vrot.slane %v3873_v16, 2  ;;  %v3695_v25 = vmul.f32 %v6657_v57, %v6657_v57  ;;  %v3828_v52 = vadd.f32 %v6610_v30, %v3808_v50 }
 0xa21   :  { %v3826_v61 = vadd.f32 %v6610_v30, %v3806_v38  ;;  %v3725_v51 = vmax.f32 %v3709_v5, 0.0  ;;  %v6677_v58 = vmul.f32 0.0078125, %v3605_v46  ;;  %v3880_v53 = vrot.slane %v3879_v44, 2 }
 0xa22   :  { %v3665_v39 = vpop.xlane.xlu1 %3664  ;;  %v3701_v63 = vmul.f32 %v6668_v32, %v6668_v32  ;;  %v6681_v28 = vmul.f32 0.0078125, %v3599_v18 }
 0xa23   :  { %v3684_v55 = vmul.f32 0.0078125, %v3665_v39  ;;  %v3842_v12 = vmax.f32 %v3826_v61, 0.0  ;;  %v3757_v34 = vadd.f32 1e-05, %v3725_v51 }
 0xa24   :  { %v4807_v43 = vpop.eup %4806  ;;  %v3607_v19 = vpop.xlane.xlu0 %3606 }
 0xa25   :  { %v3716_v35 = vsub.f32 %v3684_v55, %v3700_v56  ;;  %v3790_v7 = vmul.f32 %v4807_v43, %v3742_v47  ;;  %v3858_v27 = vmul.f32 %v5988_v9, %v3842_v12  ;;  %4816 = vrsqrt.f32 %v3757_v34 }
 0xa26   :  { %v3655_v26 = vpop.xlane.xlu1 %3654  ;;  %v3844_v56 = vmax.f32 %v3828_v52, 0.0  ;;  %v6687_v47 = vadd.f32 %v3874_v45, %v3873_v16  ;;  %v3702_v55 = vmul.f32 %v6677_v58, %v6677_v58  ;;  %v6691_v9 = vadd.f32 %v3880_v53, %v3879_v44 }
 0xa27   :  { %v3732_v50 = vmax.f32 %v3716_v35, 0.0  ;;  %v3679_v5 = vmul.f32 0.0078125, %v3655_v26  ;;  %v4809_v46 = vpop.eup %4808  ;;  %v3810_v61 = vmul.f32 %v6603_v11, %v3790_v7  ;;  %v3884_v39 = vrot.slane %v3858_v27, 4 }
 0xa28   :  { %v4811_v51 = vpop.eup %4810  ;;  %v3792_v18 = vmul.f32 %v4809_v46, %v3744_v59  ;;  %v3699_v34 = vmul.f32 %v6681_v28, %v6681_v28  ;;  %v3667_v26 = vpop.xlane.xlu0 %3666  ;;  %v3860_v44 = vmul.f32 %v6021_v42, %v3844_v56 }
 0xa29   :  { %v3764_v43 = vadd.f32 1e-05, %v3732_v50  ;;  %v3793_v12 = vmul.f32 %v4811_v51, %v3745_v2  ;;  %v3711_v35 = vsub.f32 %v3679_v5, %v3695_v25  ;;  %v3830_v52 = vadd.f32 %v6610_v30, %v3810_v61 }
 0xa2a   :  { %v3663_v38 = vpop.xlane.xlu1 %3662  ;;  %v3812_v16 = vmul.f32 %v6603_v11, %v3792_v18  ;;  %v3685_v45 = vmul.f32 0.0078125, %v3667_v26  ;;  %v3885_v2 = vadd.f32 %v3884_v39, %v3858_v27  ;;  %v6700_v61 = vmul.f32 0.0078125, %v3607_v19 }
 0xa2b   :  { %4818 = vrsqrt.f32 %v3764_v43  ;;  %v3683_v59 = vmul.f32 0.0078125, %v3663_v38  ;;  %v4813_v7 = vpop.eup %4812  ;;  %v3813_v46 = vmul.f32 %v6603_v11, %v3793_v12  ;;  %v3727_v50 = vmax.f32 %v3711_v35, 0.0 }
 0xa2c   :  { %v4815_v53 = vpop.eup %4814  ;;  %v3832_v51 = vadd.f32 %v6610_v30, %v3812_v16  ;;  %v3787_v25 = vmul.f32 %v4813_v7, %v3739_v0  ;;  %v3717_v5 = vsub.f32 %v3685_v45, %v3701_v63  ;;  %v3669_v43 = vpop.xlane.xlu0 %3668  ;;  %v3846_v26 = vmax.f32 %v3830_v52, 0.0 }
 0xa2d   :  { %v3715_v3 = vsub.f32 %v3683_v59, %v3699_v34  ;;  %v3794_v1 = vmul.f32 %v4815_v53, %v3746_v41  ;;  %v3759_v18 = vadd.f32 1e-05, %v3727_v50  ;;  %v3833_v42 = vadd.f32 %v6610_v30, %v3813_v46 }
 0xa2e   :  { %v3848_v38 = vmax.f32 %v3832_v51, 0.0  ;;  %v3807_v14 = vmul.f32 %v6603_v11, %v3787_v25  ;;  %v3733_v12 = vmax.f32 %v3717_v5, 0.0  ;;  %v3671_v36 = vpop.xlane.xlu1 %3670  ;;  %v3686_v0 = vmul.f32 0.0078125, %v3669_v43 }
 0xa2f   :  { %v3731_v35 = vmax.f32 %v3715_v3, 0.0  ;;  %v3814_v27 = vmul.f32 %v6603_v11, %v3794_v1  ;;  %4820 = vrsqrt.f32 %v3759_v18  ;;  %v3886_v56 = vrot.slane %v3885_v2, 2 }
 0xa30   :  { %v3827_v63 = vadd.f32 %v6610_v30, %v3807_v14  ;;  %v3765_v41 = vadd.f32 1e-05, %v3733_v12  ;;  %v3864_v39 = vmul.f32 %v5991_v6, %v3848_v38  ;;  %v3718_v52 = vsub.f32 %v3686_v0, %v3702_v55 }
 0xa31   :  { %v3763_v19 = vadd.f32 1e-05, %v3731_v35  ;;  %v3834_v34 = vadd.f32 %v6610_v30, %v3814_v27  ;;  %v3687_v16 = vmul.f32 0.0078125, %v3671_v36  ;;  %v3703_v3 = vmul.f32 %v6700_v61, %v6700_v61 }
 0xa32   :  { %v3843_v45 = vmax.f32 %v3827_v63, 0.0  ;;  %4822 = vrsqrt.f32 %v3765_v41  ;;  %v3896_v59 = vrot.slane %v3860_v44, 4  ;;  %v4817_v1 = vpop.eup %4816  ;;  %v3849_v7 = vmax.f32 %v3833_v42, 0.0  ;;  %v6895_v41 = vld [vmem:[#allocation29_spill] sm:$0xff] }
 0xa33   :  { %4824 = vrsqrt.f32 %v3763_v19  ;;  %v3734_v46 = vmax.f32 %v3718_v52, 0.0  ;;  %v3862_v14 = vmul.f32 %v6050_v29, %v3846_v26  ;;  %v6893_v50 = vsub.f32 %v6486_v22, %v6635_v21 }
 0xa34   :  { %v3719_v53 = vsub.f32 %v3687_v16, %v3703_v3  ;;  %v3859_v55 = vmul.f32 %v6008_v49, %v3843_v45  ;;  %v3876_v36 = vrot.slane %v6687_v47, 1  ;;  %v3920_v51 = vrot.slane %v3864_v39, 4 }
 0xa35   :  { %v3789_v6 = vmul.f32 %v4817_v1, %v6893_v50  ;;  %v3850_v25 = vmax.f32 %v3834_v34, 0.0  ;;  %v3766_v5 = vadd.f32 1e-05, %v3734_v46  ;;  %v3887_v18 = vadd.f32 %v3886_v56, %v3885_v2  ;;  %v6896_v1 = vld [vmem:[#allocation30_spill] sm:$0xff] }
 0xa36   :  { %v3735_v38 = vmax.f32 %v3719_v53, 0.0  ;;  %v3882_v12 = vrot.slane %v6691_v9, 1  ;;  %v3890_v35 = vrot.slane %v3859_v55, 4  ;;  %v3865_v26 = vmul.f32 %v6003_v48, %v3849_v7 }
 0xa37   :  { %v3809_v43 = vmul.f32 %v6603_v11, %v3789_v6  ;;  %4826 = vrsqrt.f32 %v3766_v5  ;;  %v3897_v22 = vadd.f32 %v3896_v59, %v3860_v44  ;;  %v3908_v21 = vrot.slane %v3862_v14, 4 }
 0xa38   :  { %v4819_v29 = vpop.eup %4818  ;;  %v6894_v49 = vsub.f32 %v6516_v37, %v6651_v13  ;;  %v3767_v27 = vadd.f32 1e-05, %v3735_v38  ;;  %v3891_v2 = vadd.f32 %v3890_v35, %v3859_v55  ;;  %v3921_v63 = vadd.f32 %v3920_v51, %v3864_v39 }
 0xa39   :  { %v3829_v0 = vadd.f32 %v6610_v30, %v3809_v43  ;;  %v3866_v19 = vmul.f32 %v6895_v41, %v3850_v25  ;;  %v3750_v56 = vsub.f32 %v6556_v8, %v6677_v58  ;;  %v3888_v34 = vrot.slane %v3887_v18, 1 }
 0xa3a   :  { %v3796_v42 = vmul.f32 %v4819_v29, %v6894_v49  ;;  %4828 = vrsqrt.f32 %v3767_v27  ;;  %v3892_v52 = vrot.slane %v3891_v2, 2  ;;  %v3926_v16 = vrot.slane %v3865_v26, 4 }
 0xa3b   :  { %v3845_v44 = vmax.f32 %v3829_v0, 0.0  ;;  %v3877_v37 = vadd.f32 %v3876_v36, %v6687_v47  ;;  %v3883_v13 = vadd.f32 %v3882_v12, %v6691_v9  ;;  %v3898_v45 = vrot.slane %v3897_v22, 2 }
 0xa3c   :  { %v3816_v48 = vmul.f32 %v6603_v11, %v3796_v42  ;;  %v4821_v3 = vpop.eup %4820  ;;  %v3747_v39 = vsub.f32 %v6562_v62, %v6681_v28  ;;  %v3909_v58 = vadd.f32 %v3908_v21, %v3862_v14  ;;  %v3751_v7 = vsub.f32 %v6569_v20, %v6700_v61 }
 0xa3d   :  { %v3861_v8 = vmul.f32 %v6896_v1, %v3845_v44  ;;  %v6897_v46 = vsub.f32 %v6544_v54, %v6657_v57  ;;  %v3889_v47 = vadd.f32 %v3888_v34, %v3887_v18  ;;  %v3893_v6 = vadd.f32 %v3892_v52, %v3891_v2  ;;  %v6899_v18 = vld [vmem:[#allocation31_spill] sm:$0xff] }
 0xa3e   :  { %v3836_v59 = vadd.f32 %v6610_v30, %v3816_v48  ;;  %v3932_v9 = vrot.slane %v3866_v19, 4  ;;  %v3922_v36 = vrot.slane %v3921_v63, 2  ;;  %v3927_v62 = vadd.f32 %v3926_v16, %v3865_v26 }
 0xa3f   :  { %v3791_v50 = vmul.f32 %v4821_v3, %v6897_v46  ;;  %v3902_v55 = vrot.slane %v3861_v8, 4  ;;  %v4823_v51 = vpop.eup %4822  ;;  %v3899_v25 = vadd.f32 %v3898_v45, %v3897_v22  ;;  %v3984_v14 = vsel %vm2729_vm7, %v3883_v13, %v3877_v37 }
 0xa40   :  { %v3852_v53 = vmax.f32 %v3836_v59, 0.0  ;;  %v4825_v5 = vpop.eup %4824  ;;  %v6898_v20 = vsub.f32 %v6547_v40, %v6668_v32  ;;  %v3910_v57 = vrot.slane %v3909_v58, 2  ;;  %v3894_v35 = vrot.slane %v3893_v6, 1 }
 0xa41   :  { %v3811_v28 = vmul.f32 %v6603_v11, %v3791_v50  ;;  %v3903_v54 = vadd.f32 %v3902_v55, %v3861_v8  ;;  %v3795_v38 = vmul.f32 %v4825_v5, %v3747_v39  ;;  %v3985_v29 = vsel %vm2731_vm0, %v3889_v47, %v3984_v14 }
 0xa42   :  { %v3797_v61 = vmul.f32 %v4823_v51, %v6898_v20  ;;  %v3868_v43 = vmul.f32 %v6899_v18, %v3852_v53  ;;  %v3923_v21 = vadd.f32 %v3922_v36, %v3921_v63  ;;  %v3933_v49 = vadd.f32 %v3932_v9, %v3866_v19  ;;  %v6900_v9 = vld [vmem:[#allocation32_spill] sm:$0xff] }
 0xa43   :  { %v3831_v12 = vadd.f32 %v6610_v30, %v3811_v28  ;;  %v3904_v22 = vrot.slane %v3903_v54, 2  ;;  %v3815_v42 = vmul.f32 %v6603_v11, %v3795_v38  ;;  %v3900_v40 = vrot.slane %v3899_v25, 1 }
 0xa44   :  { %v3817_v26 = vmul.f32 %v6603_v11, %v3797_v61  ;;  %v3928_v32 = vrot.slane %v3927_v62, 2  ;;  %v4827_v0 = vpop.eup %4826  ;;  %v3911_v34 = vadd.f32 %v3910_v57, %v3909_v58  ;;  %v3944_v48 = vrot.slane %v3868_v43, 4 }
 0xa45   :  { %v3847_v27 = vmax.f32 %v3831_v12, 0.0  ;;  %v3905_v41 = vadd.f32 %v3904_v22, %v3903_v54  ;;  %v3835_v44 = vadd.f32 %v6610_v30, %v3815_v42  ;;  %v3798_v52 = vmul.f32 %v4827_v0, %v3750_v56 }
 0xa46   :  { %v3837_v2 = vadd.f32 %v6610_v30, %v3817_v26  ;;  %v3895_v37 = vadd.f32 %v3894_v35, %v3893_v6  ;;  %v3924_v63 = vrot.slane %v3923_v21, 1  ;;  %v3934_v19 = vrot.slane %v3933_v49, 2 }
 0xa47   :  { %v3863_v16 = vmul.f32 %v6080_v60, %v3847_v27  ;;  %v3945_v45 = vadd.f32 %v3944_v48, %v3868_v43  ;;  %v4829_v3 = vpop.eup %4828  ;;  %v3851_v39 = vmax.f32 %v3835_v44, 0.0  ;;  %v3818_v59 = vmul.f32 %v6603_v11, %v3798_v52 }
 0xa48   :  { %v3853_v13 = vmax.f32 %v3837_v2, 0.0  ;;  %v3906_v1 = vrot.slane %v3905_v41, 1  ;;  %v3799_v46 = vmul.f32 %v4829_v3, %v3751_v7  ;;  %v3901_v50 = vadd.f32 %v3900_v40, %v3899_v25 }
 0xa49   :  { %v3914_v8 = vrot.slane %v3863_v16, 4  ;;  %v3929_v47 = vadd.f32 %v3928_v32, %v3927_v62  ;;  %v3867_v56 = vmul.f32 %v6900_v9, %v3851_v39  ;;  %v3986_v60 = vsel %vm2733_vm1, %v3895_v37, %v3985_v29 }
 0xa4a   :  { %v3869_v58 = vmul.f32 %v6076_v15, %v3853_v13  ;;  %v3838_v6 = vadd.f32 %v6610_v30, %v3818_v59  ;;  %v3819_v55 = vmul.f32 %v6603_v11, %v3799_v46  ;;  %v3935_v36 = vadd.f32 %v3934_v19, %v3933_v49 }
 0xa4b   :  { %v3915_v53 = vadd.f32 %v3914_v8, %v3863_v16  ;;  %v3946_v51 = vrot.slane %v3945_v45, 2  ;;  %v3907_v14 = vadd.f32 %v3906_v1, %v3905_v41  ;;  %v3938_v7 = vrot.slane %v3867_v56, 4 }
 0xa4c   :  { %v3950_v28 = vrot.slane %v3869_v58, 4  ;;  %v3854_v20 = vmax.f32 %v3838_v6, 0.0  ;;  %v3912_v25 = vrot.slane %v3911_v34, 1  ;;  %v3839_v15 = vadd.f32 %v6610_v30, %v3819_v55  ;;  %v3131_v6 = vpop.f32.mrf.mxu1 }
 0xa4d   :  { %v3916_v5 = vrot.slane %v3915_v53, 2  ;;  %v3930_v62 = vrot.slane %v3929_v47, 1  ;;  %v3987_v57 = vsel %vm2735_vm4, %v3901_v50, %v3986_v60  ;;  %v3939_v43 = vadd.f32 %v3938_v7, %v3867_v56  ;;  %v3022_v7 = vld [vmem:[#allocation2 + $0x2f0] sm:$0xff] }
 0xa4e   :  { %v3951_v61 = vadd.f32 %v3950_v28, %v3869_v58  ;;  %v3870_v18 = vmul.f32 %v6094_v33, %v3854_v20  ;;  %v3855_v38 = vmax.f32 %v3839_v15, 0.0  ;;  %v3936_v11 = vrot.slane %v3935_v36, 1  ;;  %v3023_v20 = vld [vmem:[#allocation2 + $0x2f8] sm:$0xff] }
 0xa4f   :  { %v3917_v54 = vadd.f32 %v3916_v5, %v3915_v53  ;;  %v3947_v12 = vadd.f32 %v3946_v51, %v3945_v45  ;;  %v3988_v26 = vsel %vm2737_vm5, %v3907_v14, %v3987_v57  ;;  %v3940_v22 = vrot.slane %v3939_v43, 2  ;;  %4631 = vmatprep.subr.mxu1 %v3023_v20  ;;  %v3019_v15 = vld [vmem:[#allocation2 + $0x2d8] sm:$0xff] }
 0xa50   :  { %v3952_v35 = vrot.slane %v3951_v61, 2  ;;  %v3956_v49 = vrot.slane %v3870_v18, 4  ;;  %v3913_v42 = vadd.f32 %v3912_v25, %v3911_v34  ;;  %v3871_v30 = vmul.f32 %v6098_v17, %v3855_v38  ;;  %v3021_v25 = vld [vmem:[#allocation2 + $0x2e8] sm:$0xff]  ;;  %v3015_v57 = vld [vmem:[#allocation2 + $0x2b8] sm:$0xff]  ;;  %v3012_v38 = vld [vmem:[#allocation2 + $0x2a0] sm:$0xff] }
 0xa51   :  { %v3918_v29 = vrot.slane %v3917_v54, 1  ;;  %v3925_v27 = vadd.f32 %v3924_v63, %v3923_v21  ;;  %v3931_v0 = vadd.f32 %v3930_v62, %v3929_v47  ;;  %v3941_v2 = vadd.f32 %v3940_v22, %v3939_v43  ;;  %v3018_v62 = vld [vmem:[#allocation2 + $0x2d0] sm:$0xff]  ;;  %v3013_v43 = vld [vmem:[#allocation2 + $0x2a8] sm:$0xff] }
 0xa52   :  { %v3953_v40 = vadd.f32 %v3952_v35, %v3951_v61  ;;  %v3957_v41 = vadd.f32 %v3956_v49, %v3870_v18  ;;  %v3989_v33 = vsel %vm2739_vm6, %v3913_v42, %v3988_v26  ;;  %v3937_v48 = vadd.f32 %v3936_v11, %v3935_v36  ;;  %v3017_v61 = vld [vmem:[#allocation2 + $0x2c8] sm:$0xff]  ;;  %v3014_v18 = vld [vmem:[#allocation2 + $0x2b0] sm:$0xff]  ;;  %v3011_v11 = vld [vmem:[#allocation2 + $0x298] sm:$0xff] }
 0xa53   :  { %v3919_v32 = vadd.f32 %v3918_v29, %v3917_v54  ;;  %v3948_v44 = vrot.slane %v3947_v12, 1  ;;  %v3962_v52 = vrot.slane %v3871_v30, 4  ;;  %v3942_v37 = vrot.slane %v3941_v2, 1  ;;  %v3016_v54 = vld [vmem:[#allocation2 + $0x2c0] sm:$0xff]  ;;  %v3009_v35 = vld [vmem:[#allocation2 + $0x288] sm:$0xff] }
 0xa54   :  { %v3954_v13 = vrot.slane %v3953_v40, 1  ;;  %v3958_v19 = vrot.slane %v3957_v41, 2  ;;  %v3991_v21 = vsel %vm2729_vm7, %v3931_v0, %v3925_v27  ;;  %v3008_v29 = vld [vmem:[#allocation2 + $0x280] sm:$0xff] }
 0xa55   :  { %v3990_v16 = vsel %vm2741_vm8, %v3919_v32, %v3989_v33  ;;  %v3963_v34 = vadd.f32 %v3962_v52, %v3871_v30  ;;  %v3943_v45 = vadd.f32 %v3942_v37, %v3941_v2  ;;  %v3949_v63 = vadd.f32 %v3948_v44, %v3947_v12  ;;  %v3010_v12 = vld [vmem:[#allocation2 + $0x290] sm:$0xff] }
 0xa56   :  { %4628 = vmatprep.mubr.f32.mxu1 %v3990_v16  ;;  %v3959_v17 = vadd.f32 %v3958_v19, %v3957_v41  ;;  %v3992_v39 = vsel %vm2731_vm0, %v3937_v48, %v3991_v21  ;;  %v3955_v59 = vadd.f32 %v3954_v13, %v3953_v40  ;;  %v4277_v13 = vld [vmem:[%s6812_s9 + $0x18] sm:$0x7]  ;;  %v6901_v19 = vsub.s32 7, %v5046_v4  ;;  %s4964_s9 = smov [#allocation10]  }
 0xa57   :  { %v3964_v3 = vrot.slane %v3963_v34, 2  ;;  %v3993_v8 = vsel %vm2733_vm1, %v3943_v45, %v3992_v39  ;;  %s4245_s25 = sshll.u32 %s4964_s9, 4  ;;  %s4246_s25 = int_to_ptr.vmem [resolvable:$true] %s4245_s25 }
 0xa58   :  { %v3960_v1 = vrot.slane %v3959_v17, 1  ;;  %v3994_v50 = vsel %vm2735_vm4, %v3949_v63, %v3993_v8  ;;  %s4924_s26 = scalar_lea.vmem %s4246_s25, 256  ;;  %p4929_p7 = scmp.lt.s32.totalorder %s4246_s25, %s4246_s25 }
 0xa59   :  { %v3965_v46 = vadd.f32 %v3964_v3, %v3963_v34  ;;  %v3995_v47 = vsel %vm2737_vm5, %v3955_v59, %v3994_v50  ;;  %v4108_v34 = vrot.slane %v6598_v23, %v6901_v19  ;;  %v4114_v3 = vrot.slane %v4277_v13, %v5057_v10  ;;  %p4925_p6 = scmp.ne.s32.totalorder %s4246_s25, %s4924_s26  ;;  %p4930_p8 = scmp.lt.s32.totalorder %s4924_s26, %s4924_s26 }
 0xa5a   :  { %v3961_v58 = vadd.f32 %v3960_v1, %v3959_v17 }
 0xa5b   :  { %v3966_v9 = vrot.slane %v3965_v46, 1  ;;  %p4931_p9 = por %p4930_p8, %p4929_p7 }
 0xa5c   :  { %v3996_v56 = vsel %vm2739_vm6, %v3961_v58, %v3995_v47 }
 0xa5d   :  { %v3967_v53 = vadd.f32 %v3966_v9, %v3965_v46  ;;  %p4932_p10 = pnand %p4931_p9, %p4925_p6 }
 0xa5f   :  { %v3997_v60 = vsel %vm2741_vm8, %v3967_v53, %v3996_v56 }
 0xa60   :  { %4629 = vmatmul.mubr.f32.vlgmr.msra.gmra.mxu1 %v3997_v60 }
 0xa61   :  { %4632 = vmatpush3.msra.mxu1 %v3023_v20 }
 0xa62   :  { %4633 = vmatprep.subr.mxu1 %v3022_v7 }
 0xa63   :  { %4634 = vmatpush3.msra.mxu1 %v3022_v7 }
 0xa64   :  { %4635 = vmatprep.subr.mxu1 %v3021_v25 }
 0xa65   :  { %4636 = vmatpush3.msra.mxu1 %v3021_v25 }
 0xb20   :  { %v4630_v55 = vpop.f32.mrf.mxu1 }
 0xb21   :  { %v6771_v36 = vadd.f32 %v4630_v55, %v3131_v6 }
 0xb22   :  { %v4066_v51 = vpop.f32.mrf.mxu1 }
 0xb23   :  { %v6774_v28 = vadd.f32 %v4066_v51, %v6389_v24  ;;  %4079 = vadd.xlane.f32.xlu1 %v6771_v36  ;;  %v4084_v14 = vmul.f32 %v6771_v36, %v6771_v36  ;;  %v3020_v24 = vld [vmem:[#allocation2 + $0x2e0] sm:$0xff] }
 0xb24   :  { %4637 = vmatprep.subr.mxu1 %v3020_v24 }
 0xb25   :  { %4077 = vadd.xlane.f32.xlu0 %v6774_v28  ;;  %v4083_v5 = vmul.f32 %v6774_v28, %v6774_v28  ;;  %4638 = vmatpush3.msra.mxu1 %v3020_v24 }
 0xb26   :  { %4639 = vmatprep.subr.mxu1 %v3019_v15 }
 0xb27   :  { %4087 = vadd.xlane.f32.xlu1 %v4084_v14  ;;  %4640 = vmatpush3.msra.mxu1 %v3019_v15 }
 0xb28   :  { %4641 = vmatprep.subr.mxu1 %v3018_v62 }
 0xb29   :  { %4085 = vadd.xlane.f32.xlu0 %v4083_v5  ;;  %4642 = vmatpush3.msra.mxu1 %v3018_v62  ;;  %v4225_v62 = vrot.slane %v4277_v13, %v6880_v31 }
 0xb2a   :  { %4643 = vmatprep.subr.mxu1 %v3017_v61 }
 0xb2b   :  { %4644 = vmatpush3.msra.mxu1 %v3017_v61 }
 0xb2c   :  { %4645 = vmatprep.subr.mxu1 %v3016_v54 }
 0xb2d   :  { %4646 = vmatpush3.msra.mxu1 %v3016_v54 }
 0xb2e   :  { %4647 = vmatprep.subr.mxu1 %v3015_v57 }
 0xb2f   :  { %4648 = vmatpush3.msra.mxu1 %v3015_v57 }
 0xb30   :  { %4649 = vmatprep.subr.mxu1 %v3014_v18 }
 0xb31   :  { %4650 = vmatpush3.msra.mxu1 %v3014_v18 }
 0xb32   :  { %4651 = vmatprep.subr.mxu1 %v3013_v43 }
 0xb33   :  { %4652 = vmatpush3.msra.mxu1 %v3013_v43  ;;  %v6902_v43 = vld [vmem:[#allocation17_spill] sm:$0xff] }
 0xb34   :  { %4653 = vmatprep.subr.mxu1 %v3012_v38 }
 0xb35   :  { %4654 = vmatpush3.msra.mxu1 %v3012_v38  ;;  %v4231_v38 = vrot.slane %v4277_v13, %v6902_v43 }
 0xb36   :  { %4655 = vmatprep.subr.mxu1 %v3011_v11 }
 0xb37   :  { %4656 = vmatpush3.msra.mxu1 %v3011_v11 }
 0xb38   :  { %4657 = vmatprep.subr.mxu1 %v3010_v12 }
 0xb39   :  { %4658 = vmatpush3.msra.mxu1 %v3010_v12 }
 0xb3a   :  { %4659 = vmatprep.subr.mxu1 %v3009_v35 }
 0xb3b   :  { %4660 = vmatpush3.msra.mxu1 %v3009_v35 }
 0xb3c   :  { %4661 = vmatprep.subr.mxu1 %v3008_v29 }
 0xb3d   :  { %4662 = vmatpush3.msra.mxu1 %v3008_v29 }
 0xbac   :  { %v4080_v26 = vpop.xlane.xlu1 %4079 }
 0xbad   :  { %v4082_v22 = vmul.f32 0.0078125, %v4080_v26 }
 0xbae   :  { %v4078_v49 = vpop.xlane.xlu0 %4077 }
 0xbaf   :  { %v4081_v42 = vmul.f32 0.0078125, %v4078_v49  ;;  %v4092_v27 = vmul.f32 %v4082_v22, %v4082_v22  ;;  %v4098_v37 = vsub.f32 %v6771_v36, %v4082_v22  ;;  %v6903_v49 = vld [vmem:[#allocation22_spill] sm:$0xff] }
 0xbb0   :  { %v4088_v30 = vpop.xlane.xlu1 %4087 }
 0xbb1   :  { %v4090_v40 = vmul.f32 0.0078125, %v4088_v30  ;;  %v4091_v0 = vmul.f32 %v4081_v42, %v4081_v42  ;;  %v4097_v17 = vsub.f32 %v6774_v28, %v4081_v42  ;;  %v6904_v42 = vmax.f32 %v6903_v49, 0.0 }
 0xbb2   :  { %v4086_v32 = vpop.xlane.xlu0 %4085 }
 0xbb3   :  { %v4094_v2 = vsub.f32 %v4090_v40, %v4092_v27  ;;  %v4089_v41 = vmul.f32 0.0078125, %v4086_v32  ;;  %v6905_v27 = vld [vmem:[#allocation20_spill] sm:$0xff] }
 0xbb4   :  { %v6906_v40 = vmax.f32 %v6905_v27, 0.0 }
 0xbb5   :  { %v4096_v33 = vmax.f32 %v4094_v2, 0.0  ;;  %v4093_v48 = vsub.f32 %v4089_v41, %v4091_v0 }
 0xbb7   :  { %v4100_v44 = vadd.f32 1e-05, %v4096_v33  ;;  %v4095_v52 = vmax.f32 %v4093_v48, 0.0 }
 0xbb9   :  { %4830 = vrsqrt.f32 %v4100_v44  ;;  %v4099_v16 = vadd.f32 1e-05, %v4095_v52 }
 0xbbb   :  { %4832 = vrsqrt.f32 %v4099_v16 }
 0xbc6   :  { %v4831_v45 = vpop.eup %4830 }
 0xbc7   :  { %v4104_v21 = vmul.f32 %v4831_v45, %v4098_v37 }
 0xbc8   :  { %v4833_v63 = vpop.eup %4832 }
 0xbc9   :  { %v4103_v39 = vmul.f32 %v4833_v63, %v4097_v17  ;;  %v4110_v59 = vmul.f32 %v4108_v34, %v4104_v21 }
 0xbcb   :  { %v4109_v1 = vmul.f32 %v4108_v34, %v4103_v39  ;;  %v4116_v8 = vadd.f32 %v4114_v3, %v4110_v59 }
 0xbcd   :  { %v4115_v46 = vadd.f32 %v4114_v3, %v4109_v1  ;;  %v4118_v58 = vmax.f32 %v4116_v8, 0.0 }
 0xbcf   :  { %v4117_v50 = vmax.f32 %v4115_v46, 0.0 }
 0xbd1   :  { %4663 = vmatprep.mubr.f32.mxu1 %v4117_v50 }
 0xbd2   :  { %4664 = vmatmul.mubr.f32.vlgmr.msra.gmra.mxu1 %v4118_v58 }
 0xc92   :  { %v4665_v47 = vpop.f32.mrf.mxu1 }
 0xc93   :  { %4196 = vadd.xlane.f32.xlu1 %v4665_v47  ;;  %v4201_v23 = vmul.f32 %v4665_v47, %v4665_v47 }
 0xc94   :  { %v4185_v4 = vpop.f32.mrf.mxu1 }
 0xc95   :  { %4194 = vadd.xlane.f32.xlu0 %v4185_v4  ;;  %v4200_v9 = vmul.f32 %v4185_v4, %v4185_v4 }
 0xc97   :  { %4204 = vadd.xlane.f32.xlu1 %v4201_v23 }
 0xc99   :  { %4202 = vadd.xlane.f32.xlu0 %v4200_v9 }
 0xd1c   :  { %v4197_v56 = vpop.xlane.xlu1 %4196 }
 0xd1d   :  { %v4199_v53 = vmul.f32 0.0078125, %v4197_v56 }
 0xd1e   :  { %v4195_v10 = vpop.xlane.xlu0 %4194 }
 0xd1f   :  { %v4198_v60 = vmul.f32 0.0078125, %v4195_v10  ;;  %v4209_v55 = vmul.f32 %v4199_v53, %v4199_v53  ;;  %v4215_v61 = vsub.f32 %v4665_v47, %v4199_v53 }
 0xd20   :  { %v4205_v6 = vpop.xlane.xlu1 %4204 }
 0xd21   :  { %v4207_v36 = vmul.f32 0.0078125, %v4205_v6  ;;  %v4208_v28 = vmul.f32 %v4198_v60, %v4198_v60  ;;  %v4214_v57 = vsub.f32 %v4185_v4, %v4198_v60 }
 0xd22   :  { %v4203_v51 = vpop.xlane.xlu0 %4202 }
 0xd23   :  { %v4211_v14 = vsub.f32 %v4207_v36, %v4209_v55  ;;  %v4206_v5 = vmul.f32 0.0078125, %v4203_v51 }
 0xd25   :  { %v4213_v20 = vmax.f32 %v4211_v14, 0.0  ;;  %v4210_v7 = vsub.f32 %v4206_v5, %v4208_v28 }
 0xd27   :  { %v4217_v25 = vadd.f32 1e-05, %v4213_v20  ;;  %v4212_v24 = vmax.f32 %v4210_v7, 0.0 }
 0xd29   :  { %4834 = vrsqrt.f32 %v4217_v25  ;;  %v4216_v15 = vadd.f32 1e-05, %v4212_v24 }
 0xd2b   :  { %4836 = vrsqrt.f32 %v4216_v15 }
 0xd36   :  { %v4835_v54 = vpop.eup %4834 }
 0xd37   :  { %v4221_v18 = vmul.f32 %v4835_v54, %v4215_v61 }
 0xd38   :  { %v4837_v11 = vpop.eup %4836 }
 0xd39   :  { %v4220_v12 = vmul.f32 %v4837_v11, %v4214_v57  ;;  %v4227_v35 = vmul.f32 %v4225_v62, %v4221_v18 }
 0xd3b   :  { %v4226_v29 = vmul.f32 %v4225_v62, %v4220_v12  ;;  %v4233_v26 = vadd.f32 %v4231_v38, %v4227_v35 }
 0xd3d   :  { %v4232_v22 = vadd.f32 %v4231_v38, %v4226_v29  ;;  %v4235_v30 = vadd.f32 %v4233_v26, %v6904_v42 }
 0xd3f   :  { %v4234_v31 = vadd.f32 %v4232_v22, %v6906_v40  ;;  %v4237_v32 = vmax.f32 %v4235_v30, 0.0 }
 0xd41   :  { %v4236_v0 = vmax.f32 %v4234_v31, 0.0  ;;  %4239 = vst [vmem:[#allocation10 + $0x8] sm:$0xff] %v4237_v32 }
 0xd43   :  { %4238 = vst [vmem:[#allocation10] sm:$0xff] %v4236_v0 }
 0xd44   :  { %4935 = shalt.err (!%p4932_p10)
}
 0xd45   :  { %4251 = dma.vmem_to_hbm [thread:$0]  %s4246_s25, 256, %s6813_s10, [#allocation4], %s4956_s23, %s4956_s23, %s4957_s24  }
 0xd46   :  { %4950 = dma.done.wait [#allocation4], 256  }
 0xd47   :  { %4951 = vsyncadd [#allocation4], 4294967040 }
 0xd48   :  { %4255 = vsyncpa [#allocation3], 1 }
 0xd49   :  { %4256 = vsyncpa [#allocation6], 1 }
 0xd4a   :  { %4257 = vsyncpa [#allocation9], 1 }
 0xd4b   :  { %4258 = vsyncpa [#allocation4], 1 }

</bundles_post_ra>
